<compile_context>
chip_gen: v7x
topology: tpu7x:2x2x1
jax: 0.10.0
libtpu: 0.0.40
codegen_flags: <defaults>
</compile_context>

<pallas_src>
import functools

import jax
import jax.numpy as jnp
from jax.experimental import pallas as pl
from jax.experimental.pallas import tpu as pltpu

EPS = 1e-5


# --------------------------------------------------------------------------
# In-kernel BN finalize (previous stage's stats -> scale/shift)
# --------------------------------------------------------------------------
def _scale_shift(sum_in_ref, ssq_in_ref, gamma_ref, beta_ref, count):
    """Train-mode BN: scale = gamma*rsqrt(var+eps), shift = beta - mean*scale,
    from per-core partial sums (G, C, 1).  One-pass biased variance."""
    s = sum_in_ref[0]
    q = ssq_in_ref[0]
    for g in range(1, sum_in_ref.shape[0]):      # static unroll over core partials
        s = s + sum_in_ref[g]
        q = q + ssq_in_ref[g]
    inv = 1.0 / count
    mean = s * inv
    var = jnp.maximum(q * inv - mean * mean, 0.0)
    scale = gamma_ref[...] * jax.lax.rsqrt(var + EPS)
    shift = beta_ref[...] - mean * scale
    return scale, shift


def _init_acc(t, sum_ref, ssq_ref):
    @pl.when(t == 0)
    def _():
        sum_ref[...] = jnp.zeros_like(sum_ref)
        ssq_ref[...] = jnp.zeros_like(ssq_ref)


# --------------------------------------------------------------------------
# Kernels
# --------------------------------------------------------------------------
def _dw_stage_kernel(xl_ref, xc_ref, xr_ref, ml_ref, mc_ref, mr_ref,
                     w_ref, b_ref, sum_in_ref, ssq_in_ref, gam_ref, bet_ref,
                     y_ref, sum_ref, ssq_ref,
                     *, offsets, thalo, count, identity_bn):
    """Depthwise conv (static flat tap `offsets`, |off| <= thalo) fused with:
       - previous-stage BN normalize (scale/shift) + zero-pad mask at read,
       - conv bias + ReLU,
       - masked per-channel sum / sum-of-squares accumulation (per core)."""
    t = pl.program_id(1)
    T = y_ref.shape[-1]

    # Narrow halo: (C, thalo | T | thalo).
    halo = jnp.concatenate([xl_ref[0], xc_ref[0], xr_ref[0]], axis=-1)
    mh = jnp.concatenate([ml_ref[0], mc_ref[0], mr_ref[0]], axis=-1)

    if identity_bn:
        xn = jnp.where(mh > 0.5, halo, 0.0)
    else:
        scale, shift = _scale_shift(sum_in_ref, ssq_in_ref, gam_ref, bet_ref, count)
        xn = jnp.where(mh > 0.5, halo * scale + shift, 0.0)     # (C, T+2*thalo)

    w = w_ref[...]                                              # (C, K)
    acc = jnp.zeros((xn.shape[0], T), jnp.float32)
    for k, off in enumerate(offsets):                           # static tap unroll
        acc = acc + w[:, k:k + 1] * xn[:, thalo + off:thalo + off + T]
    y = jnp.maximum(acc + b_ref[...], 0.0)                      # bias + ReLU
    y_ref[0] = y

    ym = jnp.where(mc_ref[0] > 0.5, y, 0.0)                     # interior-only stats
    _init_acc(t, sum_ref, ssq_ref)
    sum_ref[0] = sum_ref[0] + jnp.sum(ym, axis=-1, keepdims=True)
    ssq_ref[0] = ssq_ref[0] + jnp.sum(ym * ym, axis=-1, keepdims=True)


def _pw_stage_kernel(xc_ref, mc_ref, w_ref, b_ref,
                     sum_in_ref, ssq_in_ref, gam_ref, bet_ref,
                     y_ref, sum_ref, ssq_ref, *, count):
    """1x1 (full C->C) conv fused with previous-BN normalize, bias + ReLU and
    masked stats accumulation."""
    t = pl.program_id(1)
    scale, shift = _scale_shift(sum_in_ref, ssq_in_ref, gam_ref, bet_ref, count)
    m0 = mc_ref[0]                                              # (1, T)
    xn = jnp.where(m0 > 0.5, xc_ref[0] * scale + shift, 0.0)    # (C, T)
    w = w_ref[...]                                              # (C_out, C_in)
    C = xn.shape[0]
    if C >= 32:
        # Large dim: contraction on the MXU (full-precision f32 path).
        acc = jnp.dot(w, xn, preferred_element_type=jnp.float32,
                      precision=jax.lax.Precision.HIGHEST)
    else:
        # Tiny dim (test config C=8): exact-f32 unrolled VPU FMAs.
        acc = jnp.zeros(xn.shape, jnp.float32)
        for ci in range(C):
            acc = acc + w[:, ci:ci + 1] * xn[ci:ci + 1, :]
    y = jnp.maximum(acc + b_ref[...], 0.0)
    y_ref[0] = y

    ym = jnp.where(m0 > 0.5, y, 0.0)
    _init_acc(t, sum_ref, ssq_ref)
    sum_ref[0] = sum_ref[0] + jnp.sum(ym, axis=-1, keepdims=True)
    ssq_ref[0] = ssq_ref[0] + jnp.sum(ym * ym, axis=-1, keepdims=True)


def _mul_stage_kernel(u_ref, a_ref, sum_in_ref, ssq_in_ref, gam_ref, bet_ref,
                      y_ref, sum_ref, ssq_ref, *, count):
    """y = ReLU(u * BN5(attn_raw)), output written directly in (C, Mp_pad)
    layout; u is exactly zero at every padding position, so no mask is needed."""
    t = pl.program_id(1)
    scale, shift = _scale_shift(sum_in_ref, ssq_in_ref, gam_ref, bet_ref, count)
    attn = a_ref[0] * scale + shift
    y = jnp.maximum(u_ref[0] * attn, 0.0)                       # (C, T)
    y_ref[...] = y

    _init_acc(t, sum_ref, ssq_ref)
    sum_ref[0] = sum_ref[0] + jnp.sum(y, axis=-1, keepdims=True)
    ssq_ref[0] = ssq_ref[0] + jnp.sum(y * y, axis=-1, keepdims=True)


# --------------------------------------------------------------------------
# pallas_call wrappers
# --------------------------------------------------------------------------
def _dw_stage(x3, mask3, w, b, sum_in, ssq_in, gam, bet, *,
              offsets, thalo, T, G, count, identity_bn=False):
    NT, C, _ = x3.shape
    NTh = NT // G
    K = w.shape[1]
    HB = T // thalo                     # halo-blocks per tile along lanes
    assert max(abs(int(o)) for o in offsets) <= thalo
    assert T % thalo == 0 and NT % G == 0

    tile = lambda g, t: g * NTh + t
    cent3 = lambda g, t: (tile(g, t), 0, 0)
    left3 = lambda g, t: (jnp.maximum(tile(g, t) - 1, 0), 0, HB - 1)
    right3 = lambda g, t: (jnp.minimum(tile(g, t) + 1, NT - 1), 0, 0)
    par2 = lambda g, t: (0, 0)
    par3 = lambda g, t: (0, 0, 0)
    accm = lambda g, t: (g, 0, 0)

    in_specs = [
        pl.BlockSpec((1, C, thalo), left3),     # narrow left halo
        pl.BlockSpec((1, C, T), cent3),         # center tile
        pl.BlockSpec((1, C, thalo), right3),    # narrow right halo
        pl.BlockSpec((1, 1, thalo), left3),
        pl.BlockSpec((1, 1, T), cent3),
        pl.BlockSpec((1, 1, thalo), right3),
        pl.BlockSpec((C, K), par2),
        pl.BlockSpec((C, 1), par2),
        pl.BlockSpec((G, C, 1), par3),          # prev-stage sum partials
        pl.BlockSpec((G, C, 1), par3),          # prev-stage sumsq partials
        pl.BlockSpec((C, 1), par2),             # gamma
        pl.BlockSpec((C, 1), par2),             # beta
    ]
    out_specs = (
        pl.BlockSpec((1, C, T), cent3),         # raw stage output slab
        pl.BlockSpec((1, C, 1), accm),          # per-core sum accumulator
        pl.BlockSpec((1, C, 1), accm),          # per-core sumsq accumulator
    )
    out_shape = (
        jax.ShapeDtypeStruct((NT, C, T), jnp.float32),
        jax.ShapeDtypeStruct((G, C, 1), jnp.float32),
        jax.ShapeDtypeStruct((G, C, 1), jnp.float32),
    )
    kernel = functools.partial(_dw_stage_kernel,
                               offsets=tuple(int(o) for o in offsets),
                               thalo=thalo, count=count, identity_bn=identity_bn)
    return pl.pallas_call(
        kernel, grid=(G, NTh),
        in_specs=in_specs, out_specs=out_specs, out_shape=out_shape,
        compiler_params=pltpu.CompilerParams(
            dimension_semantics=("parallel", "arbitrary")),
    )(x3, x3, x3, mask3, mask3, mask3, w, b, sum_in, ssq_in, gam, bet)


def _pw_stage(x3, mask3, w, b, sum_in, ssq_in, gam, bet, *, T, G, count):
    NT, C, _ = x3.shape
    NTh = NT // G
    cent3 = lambda g, t: (g * NTh + t, 0, 0)
    par2 = lambda g, t: (0, 0)
    par3 = lambda g, t: (0, 0, 0)
    accm = lambda g, t: (g, 0, 0)
    in_specs = [
        pl.BlockSpec((1, C, T), cent3),
        pl.BlockSpec((1, 1, T), cent3),
        pl.BlockSpec((C, C), par2),
        pl.BlockSpec((C, 1), par2),
        pl.BlockSpec((G, C, 1), par3),
        pl.BlockSpec((G, C, 1), par3),
        pl.BlockSpec((C, 1), par2),
        pl.BlockSpec((C, 1), par2),
    ]
    out_specs = (
        pl.BlockSpec((1, C, T), cent3),
        pl.BlockSpec((1, C, 1), accm),
        pl.BlockSpec((1, C, 1), accm),
    )
    out_shape = (
        jax.ShapeDtypeStruct((NT, C, T), jnp.float32),
        jax.ShapeDtypeStruct((G, C, 1), jnp.float32),
        jax.ShapeDtypeStruct((G, C, 1), jnp.float32),
    )
    return pl.pallas_call(
        functools.partial(_pw_stage_kernel, count=count),
        grid=(G, NTh), in_specs=in_specs, out_specs=out_specs, out_shape=out_shape,
        compiler_params=pltpu.CompilerParams(
            dimension_semantics=("parallel", "arbitrary")),
    )(x3, mask3, w, b, sum_in, ssq_in, gam, bet)


def _mul_stage(u3, a3, sum_in, ssq_in, gam, bet, *, T, G, count):
    NT, C, _ = u3.shape
    NTh = NT // G
    Mp_pad = NT * T
    cent3 = lambda g, t: (g * NTh + t, 0, 0)
    par3 = lambda g, t: (0, 0, 0)
    par2 = lambda g, t: (0, 0)
    accm = lambda g, t: (g, 0, 0)
    out_lane = lambda g, t: (0, g * NTh + t)    # direct (C, Mp_pad) layout
    in_specs = [
        pl.BlockSpec((1, C, T), cent3),
        pl.BlockSpec((1, C, T), cent3),
        pl.BlockSpec((G, C, 1), par3),
        pl.BlockSpec((G, C, 1), par3),
        pl.BlockSpec((C, 1), par2),
        pl.BlockSpec((C, 1), par2),
    ]
    out_specs = (
        pl.BlockSpec((C, T), out_lane),
        pl.BlockSpec((1, C, 1), accm),
        pl.BlockSpec((1, C, 1), accm),
    )
    out_shape = (
        jax.ShapeDtypeStruct((C, Mp_pad), jnp.float32),
        jax.ShapeDtypeStruct((G, C, 1), jnp.float32),
        jax.ShapeDtypeStruct((G, C, 1), jnp.float32),
    )
    return pl.pallas_call(
        functools.partial(_mul_stage_kernel, count=count),
        grid=(G, NTh), in_specs=in_specs, out_specs=out_specs, out_shape=out_shape,
        compiler_params=pltpu.CompilerParams(
            dimension_semantics=("parallel", "arbitrary")),
    )(u3, a3, sum_in, ssq_in, gam, bet)


# --------------------------------------------------------------------------
# Forward pass
# --------------------------------------------------------------------------
def _round_up(x, m):
    return (x + m - 1) // m * m


def _bn_scale_shift(ssum, ssq, count, gamma, beta):
    """Finalize train-mode BN from (G, C, 1) partial sums (used only for BN#6)."""
    s = jnp.sum(ssum, axis=0)[:, 0]
    q = jnp.sum(ssq, axis=0)[:, 0]
    mean = s / count
    var = jnp.maximum(q / count - mean * mean, 0.0)
    scale = gamma * jax.lax.rsqrt(var + EPS)
    shift = beta - mean * scale
    return scale, shift


def lska11_forward(x_nchw, params):
    """LSKA11.forward (train-mode BN).  x_nchw: (N, C, H, W), C == dim."""
    N, C, H, W = x_nchw.shape
    PH = PV = 4                      # max structural padding over all stages
    Hp, Wp = H + 2 * PV, W + 2 * PH
    Mp = N * Hp * Wp
    count = float(N * H * W)

    # Max flat tap reach (vertical, dilation 2, k=5).  The edge-clamped halo is
    # only safe because the structural padding absorbs every tap reach.
    max_reach = 4 * Wp
    assert 4 <= PH and 4 <= PV
    assert max_reach <= PV * Wp

    Thalo = _round_up(max_reach, 128)
    # Big lane tile (<= ~8K lanes) to amortize per-step overhead; multiple of
    # Thalo so the narrow halo BlockSpec tiles the slab evenly.
    T = max(Thalo, _round_up(min(Mp, 8192), Thalo))
    NT0 = pl.cdiv(Mp, T)
    # v7x: split tiles across both TensorCores when they divide evenly
    # (no padding penalty on single-core v5e/v6e otherwise).
    G = 2 if (NT0 >= 2 and NT0 % 2 == 0) else 1
    NT = _round_up(NT0, G)
    Mp_pad = NT * T
    assert T % Thalo == 0 and NT % G == 0

    # Canonical slab layout: (tile, channel, lane), padded spatial index on lanes.
    def to_slab(a_cnhw):
        c = a_cnhw.shape[0]
        a = jnp.pad(a_cnhw, ((0, 0), (0, 0), (PV, PV), (PH, PH)))
        a = a.reshape(c, Mp)
        a = jnp.pad(a, ((0, 0), (0, Mp_pad - Mp)))
        return jnp.transpose(a.reshape(c, NT, T), (1, 0, 2))

    x3 = to_slab(jnp.transpose(x_nchw, (1, 0, 2, 3)).astype(jnp.float32))
    mask3 = to_slab(jnp.ones((1, N, H, W), jnp.float32))   # interior indicator

    col = lambda v: v.astype(jnp.float32).reshape(C, 1)
    mat = lambda v: v.astype(jnp.float32)
    gam = col(params["gamma"])
    bet = col(params["beta"])
    dummy = jnp.zeros((G, C, 1), jnp.float32)

    common = dict(T=T, G=G, count=count)

    # stage 1: conv0h  (depthwise 1x3, pad 1) -- no preceding BN
    y, s, q = _dw_stage(x3, mask3, mat(params["w0h"]), col(params["b0h"]),
                        dummy, dummy, gam, bet,
                        offsets=(-1, 0, 1), thalo=Thalo, identity_bn=True, **common)

    # stage 2: conv0v  (depthwise 3x1, pad 1) -- BN#1 fused into the read
    y, s, q = _dw_stage(y, mask3, mat(params["w0v"]), col(params["b0v"]),
                        s, q, gam, bet,
                        offsets=(-Wp, 0, Wp), thalo=Thalo, **common)

    # stage 3: conv_spatial_h  (depthwise 1x5, dilation 2, pad 4)
    y, s, q = _dw_stage(y, mask3, mat(params["wsh"]), col(params["bsh"]),
                        s, q, gam, bet,
                        offsets=(-4, -2, 0, 2, 4), thalo=Thalo, **common)

    # stage 4: conv_spatial_v  (depthwise 5x1, dilation 2, pad 4)
    y, s, q = _dw_stage(y, mask3, mat(params["wsv"]), col(params["bsv"]),
                        s, q, gam, bet,
                        offsets=(-4 * Wp, -2 * Wp, 0, 2 * Wp, 4 * Wp),
                        thalo=Thalo, **common)

    # stage 5: conv1  (1x1 full C->C)
    y, s, q = _pw_stage(y, mask3, mat(params["w1"]), col(params["b1"]),
                        s, q, gam, bet, **common)

    # stage 6: y = ReLU(u * BN5(attn)), output directly in (C, Mp_pad) layout
    v, s, q = _mul_stage(x3, y, s, q, gam, bet, **common)
    sc6, sh6 = _bn_scale_shift(s, q, count,
                               params["gamma"].astype(jnp.float32),
                               params["beta"].astype(jnp.float32))

    # Final BN affine fused into the cheap crop (no slab transpose needed).
    out = v[:, :Mp].reshape(C, N, Hp, Wp)[:, :, PV:PV + H, PH:PH + W]
    out = out * sc6.reshape(C, 1, 1, 1) + sh6.reshape(C, 1, 1, 1)
    return jnp.transpose(out, (1, 0, 2, 3))


# --------------------------------------------------------------------------
# Pure-JAX reference (tolerance check)
# --------------------------------------------------------------------------
def _ref_forward(x, params):
    C = x.shape[1]
    gamma = params["gamma"].reshape(1, C, 1, 1)
    beta = params["beta"].reshape(1, C, 1, 1)
    hi = jax.lax.Precision.HIGHEST

    def bn(v):
        mean = jnp.mean(v, axis=(0, 2, 3), keepdims=True)
        var = jnp.mean((v - mean) ** 2, axis=(0, 2, 3), keepdims=True)
        return (v - mean) * jax.lax.rsqrt(var + EPS) * gamma + beta

    def dwconv(v, w, b, kh, kw, pad, dil):
        wf = w.reshape(C, 1, kh, kw)
        out = jax.lax.conv_general_dilated(
            v, wf, window_strides=(1, 1), padding=pad, rhs_dilation=dil,
            dimension_numbers=("NCHW", "OIHW", "NCHW"),
            feature_group_count=C, precision=hi)
        return out + b.reshape(1, C, 1, 1)

    u = x
    a = dwconv(x, params["w0h"], params["b0h"], 1, 3, [(0, 0), (1, 1)], (1, 1))
    a = bn(jax.nn.relu(a))
    a = dwconv(a, params["w0v"], params["b0v"], 3, 1, [(1, 1), (0, 0)], (1, 1))
    a = bn(jax.nn.relu(a))
    a = dwconv(a, params["wsh"], params["bsh"], 1, 5, [(0, 0), (4, 4)], (1, 2))
    a = bn(jax.nn.relu(a))
    a = dwconv(a, params["wsv"], params["bsv"], 5, 1, [(4, 4), (0, 0)], (2, 1))
    a = bn(jax.nn.relu(a))
    a = jnp.einsum("oc,nchw->nohw", params["w1"], a, precision=hi)
    a = a + params["b1"].reshape(1, C, 1, 1)
    a = bn(jax.nn.relu(a))
    return bn(jax.nn.relu(u * a))


# --------------------------------------------------------------------------
if __name__ == "__main__":
    key = jax.random.PRNGKey(0)
    ks = jax.random.split(key, 12)

    # in_channel == dim == 8 (depthwise, groups=dim), batch 2, 16x16 spatial.
    N, C, H, W = 2, 8, 16, 16
    x = jax.random.normal(ks[0], (N, C, H, W), jnp.float32)

    def rnd(k, shape, scale=1.0):
        return scale * jax.random.normal(k, shape, jnp.float32)

    params = {
        "w0h": rnd(ks[1], (C, 3), 3.0 ** -0.5),
        "b0h": rnd(ks[2], (C,), 0.1),
        "w0v": rnd(ks[3], (C, 3), 3.0 ** -0.5),
        "b0v": rnd(ks[4], (C,), 0.1),
        "wsh": rnd(ks[5], (C, 5), 5.0 ** -0.5),
        "bsh": rnd(ks[6], (C,), 0.1),
        "wsv": rnd(ks[7], (C, 5), 5.0 ** -0.5),
        "bsv": rnd(ks[8], (C,), 0.1),
        "w1": rnd(ks[9], (C, C), float(C) ** -0.5),
        "b1": rnd(ks[10], (C,), 0.1),
        "gamma": 1.0 + 0.1 * jax.random.normal(ks[11], (C,), jnp.float32),
        "beta": jnp.full((C,), 0.05, jnp.float32),
    }

    out = jax.jit(lska11_forward)(x, params)
    jax.block_until_ready(out)
    assert out.shape == (N, C, H, W), out.shape

    ref = _ref_forward(x, params)
    err = float(jnp.max(jnp.abs(out - ref)))
    assert err < 1e-3, f"max abs err {err}"

    print("KERNEL_OK")
</pallas_src>

<mosaic_0001>
module attributes {stable_mosaic.version = 11 : i64} {
  func.func @_dw_stage_kernel(%arg0: i32, %arg1: i32, %arg2: memref<1x8x128xf32, #tpu.memory_space<vmem>>, %arg3: memref<1x8x1152xf32, #tpu.memory_space<vmem>>, %arg4: memref<1x8x128xf32, #tpu.memory_space<vmem>>, %arg5: memref<1x1x128xf32, #tpu.memory_space<vmem>>, %arg6: memref<1x1x1152xf32, #tpu.memory_space<vmem>>, %arg7: memref<1x1x128xf32, #tpu.memory_space<vmem>>, %arg8: memref<8x5xf32, #tpu.memory_space<vmem>>, %arg9: memref<8x1xf32, #tpu.memory_space<vmem>>, %arg10: memref<1x8x1xf32, #tpu.memory_space<vmem>>, %arg11: memref<1x8x1xf32, #tpu.memory_space<vmem>>, %arg12: memref<8x1xf32, #tpu.memory_space<vmem>>, %arg13: memref<8x1xf32, #tpu.memory_space<vmem>>, %arg14: memref<1x8x1152xf32, #tpu.memory_space<vmem>>, %arg15: memref<1x8x1xf32, #tpu.memory_space<vmem>>, %arg16: memref<1x8x1xf32, #tpu.memory_space<vmem>>) attributes {dimension_semantics = [#tpu.dimension_semantics<parallel>, #tpu.dimension_semantics<arbitrary>], iteration_bounds = array<i64: 1, 1>, scalar_prefetch = 0 : i64, scratch_operands = 0 : i64, tpu.core_type = #tpu.core_type<tc>, window_params = [{transform_indices = @transform_0, window_bounds = array<i64: 1, 8, 128>}, {transform_indices = @transform_1, window_bounds = array<i64: 1, 8, 1152>}, {transform_indices = @transform_2, window_bounds = array<i64: 1, 8, 128>}, {transform_indices = @transform_3, window_bounds = array<i64: 1, 1, 128>}, {transform_indices = @transform_4, window_bounds = array<i64: 1, 1, 1152>}, {transform_indices = @transform_5, window_bounds = array<i64: 1, 1, 128>}, {pipeline_mode = #tpu.pipeline_mode<synchronous>, transform_indices = @transform_6, window_bounds = array<i64: 8, 5>}, {pipeline_mode = #tpu.pipeline_mode<synchronous>, transform_indices = @transform_7, window_bounds = array<i64: 8, 1>}, {pipeline_mode = #tpu.pipeline_mode<synchronous>, transform_indices = @transform_8, window_bounds = array<i64: 1, 8, 1>}, {pipeline_mode = #tpu.pipeline_mode<synchronous>, transform_indices = @transform_9, window_bounds = array<i64: 1, 8, 1>}, {pipeline_mode = #tpu.pipeline_mode<synchronous>, transform_indices = @transform_10, window_bounds = array<i64: 8, 1>}, {pipeline_mode = #tpu.pipeline_mode<synchronous>, transform_indices = @transform_11, window_bounds = array<i64: 8, 1>}, {transform_indices = @transform_12, window_bounds = array<i64: 1, 8, 1152>}, {transform_indices = @transform_13, window_bounds = array<i64: 1, 8, 1>}, {transform_indices = @transform_14, window_bounds = array<i64: 1, 8, 1>}]} {
    %c0 = arith.constant 0 : index
    %c0_0 = arith.constant 0 : index
    %c0_1 = arith.constant 0 : index
    %0 = vector.load %arg2[%c0, %c0_0, %c0_1] : memref<1x8x128xf32, #tpu.memory_space<vmem>>, vector<1x8x128xf32>
    %1 = vector.shape_cast %0 : vector<1x8x128xf32> to vector<8x128xf32>
    %c0_2 = arith.constant 0 : index
    %c0_3 = arith.constant 0 : index
    %c0_4 = arith.constant 0 : index
    %2 = vector.load %arg3[%c0_2, %c0_3, %c0_4] : memref<1x8x1152xf32, #tpu.memory_space<vmem>>, vector<1x8x1152xf32>
    %3 = vector.shape_cast %2 : vector<1x8x1152xf32> to vector<8x1152xf32>
    %c0_5 = arith.constant 0 : index
    %c0_6 = arith.constant 0 : index
    %c0_7 = arith.constant 0 : index
    %4 = vector.load %arg4[%c0_5, %c0_6, %c0_7] : memref<1x8x128xf32, #tpu.memory_space<vmem>>, vector<1x8x128xf32>
    %5 = vector.shape_cast %4 : vector<1x8x128xf32> to vector<8x128xf32>
    %6 = tpu.concatenate %1, %3, %5 in 1 : vector<8x128xf32>, vector<8x1152xf32>, vector<8x128xf32> -> vector<8x1408xf32>
    %c0_8 = arith.constant 0 : index
    %c0_9 = arith.constant 0 : index
    %c0_10 = arith.constant 0 : index
    %7 = vector.load %arg5[%c0_8, %c0_9, %c0_10] : memref<1x1x128xf32, #tpu.memory_space<vmem>>, vector<1x1x128xf32>
    %8 = vector.shape_cast %7 : vector<1x1x128xf32> to vector<1x128xf32>
    %c0_11 = arith.constant 0 : index
    %c0_12 = arith.constant 0 : index
    %c0_13 = arith.constant 0 : index
    %9 = vector.load %arg6[%c0_11, %c0_12, %c0_13] : memref<1x1x1152xf32, #tpu.memory_space<vmem>>, vector<1x1x1152xf32>
    %10 = vector.shape_cast %9 : vector<1x1x1152xf32> to vector<1x1152xf32>
    %c0_14 = arith.constant 0 : index
    %c0_15 = arith.constant 0 : index
    %c0_16 = arith.constant 0 : index
    %11 = vector.load %arg7[%c0_14, %c0_15, %c0_16] : memref<1x1x128xf32, #tpu.memory_space<vmem>>, vector<1x1x128xf32>
    %12 = vector.shape_cast %11 : vector<1x1x128xf32> to vector<1x128xf32>
    %13 = tpu.concatenate %8, %10, %12 in 1 : vector<1x128xf32>, vector<1x1152xf32>, vector<1x128xf32> -> vector<1x1408xf32>
    %c0_17 = arith.constant 0 : index
    %c0_18 = arith.constant 0 : index
    %c0_19 = arith.constant 0 : index
    %14 = vector.load %arg10[%c0_17, %c0_18, %c0_19] : memref<1x8x1xf32, #tpu.memory_space<vmem>>, vector<1x8x1xf32>
    %15 = vector.shape_cast %14 : vector<1x8x1xf32> to vector<8x1xf32>
    %c0_20 = arith.constant 0 : index
    %c0_21 = arith.constant 0 : index
    %c0_22 = arith.constant 0 : index
    %16 = vector.load %arg11[%c0_20, %c0_21, %c0_22] : memref<1x8x1xf32, #tpu.memory_space<vmem>>, vector<1x8x1xf32>
    %17 = vector.shape_cast %16 : vector<1x8x1xf32> to vector<8x1xf32>
    %cst = arith.constant 0.001953125 : f32
    %18 = vector.broadcast %cst : f32 to vector<8x1xf32>
    %19 = arith.mulf %15, %18 : vector<8x1xf32>
    %cst_23 = arith.constant 0.001953125 : f32
    %20 = vector.broadcast %cst_23 : f32 to vector<8x1xf32>
    %21 = arith.mulf %17, %20 : vector<8x1xf32>
    %22 = arith.mulf %19, %19 : vector<8x1xf32>
    %23 = arith.subf %21, %22 : vector<8x1xf32>
    %cst_24 = arith.constant 0.000000e+00 : f32
    %24 = vector.broadcast %cst_24 : f32 to vector<8x1xf32>
    %25 = arith.maximumf %23, %24 : vector<8x1xf32>
    %c0_25 = arith.constant 0 : index
    %c0_26 = arith.constant 0 : index
    %26 = vector.load %arg12[%c0_25, %c0_26] : memref<8x1xf32, #tpu.memory_space<vmem>>, vector<8x1xf32>
    %cst_27 = arith.constant 9.99999974E-6 : f32
    %27 = vector.broadcast %cst_27 : f32 to vector<8x1xf32>
    %28 = arith.addf %25, %27 : vector<8x1xf32>
    %29 = math.rsqrt %28 : vector<8x1xf32>
    %30 = arith.mulf %26, %29 : vector<8x1xf32>
    %c0_28 = arith.constant 0 : index
    %c0_29 = arith.constant 0 : index
    %31 = vector.load %arg13[%c0_28, %c0_29] : memref<8x1xf32, #tpu.memory_space<vmem>>, vector<8x1xf32>
    %32 = arith.mulf %19, %30 : vector<8x1xf32>
    %33 = arith.subf %31, %32 : vector<8x1xf32>
    %cst_30 = arith.constant 5.000000e-01 : f32
    %34 = vector.broadcast %cst_30 : f32 to vector<1x1408xf32>
    %35 = arith.cmpf ogt, %13, %34 : vector<1x1408xf32>
    %36 = vector.broadcast %30 : vector<8x1xf32> to vector<8x1408xf32>
    %37 = arith.mulf %6, %36 : vector<8x1408xf32>
    %38 = vector.broadcast %33 : vector<8x1xf32> to vector<8x1408xf32>
    %39 = arith.addf %37, %38 : vector<8x1408xf32>
    %cst_31 = arith.constant 0.000000e+00 : f32
    %40 = vector.shape_cast %35 : vector<1x1408xi1> to vector<1x1408xi1>
    %41 = vector.broadcast %40 : vector<1x1408xi1> to vector<8x1408xi1>
    %42 = vector.broadcast %cst_31 : f32 to vector<8x1408xf32>
    %43 = arith.select %41, %39, %42 : vector<8x1408xi1>, vector<8x1408xf32>
    %c0_32 = arith.constant 0 : index
    %c0_33 = arith.constant 0 : index
    %44 = vector.load %arg8[%c0_32, %c0_33] : memref<8x5xf32, #tpu.memory_space<vmem>>, vector<8x5xf32>
    %cst_34 = arith.constant 0.000000e+00 : f32
    %45 = vector.broadcast %cst_34 : f32 to vector<8x1152xf32>
    %46 = vector.extract_strided_slice %44 {offsets = [0, 0], sizes = [8, 1], strides = [1, 1]} : vector<8x5xf32> to vector<8x1xf32>
    %47 = vector.extract_strided_slice %43 {offsets = [0, 32], sizes = [8, 1152], strides = [1, 1]} : vector<8x1408xf32> to vector<8x1152xf32>
    %48 = vector.broadcast %46 : vector<8x1xf32> to vector<8x1152xf32>
    %49 = arith.mulf %48, %47 : vector<8x1152xf32>
    %50 = arith.addf %45, %49 : vector<8x1152xf32>
    %51 = vector.extract_strided_slice %44 {offsets = [0, 1], sizes = [8, 1], strides = [1, 1]} : vector<8x5xf32> to vector<8x1xf32>
    %52 = vector.extract_strided_slice %43 {offsets = [0, 80], sizes = [8, 1152], strides = [1, 1]} : vector<8x1408xf32> to vector<8x1152xf32>
    %53 = vector.broadcast %51 : vector<8x1xf32> to vector<8x1152xf32>
    %54 = arith.mulf %53, %52 : vector<8x1152xf32>
    %55 = arith.addf %50, %54 : vector<8x1152xf32>
    %56 = vector.extract_strided_slice %44 {offsets = [0, 2], sizes = [8, 1], strides = [1, 1]} : vector<8x5xf32> to vector<8x1xf32>
    %57 = vector.extract_strided_slice %43 {offsets = [0, 128], sizes = [8, 1152], strides = [1, 1]} : vector<8x1408xf32> to vector<8x1152xf32>
    %58 = vector.broadcast %56 : vector<8x1xf32> to vector<8x1152xf32>
    %59 = arith.mulf %58, %57 : vector<8x1152xf32>
    %60 = arith.addf %55, %59 : vector<8x1152xf32>
    %61 = vector.extract_strided_slice %44 {offsets = [0, 3], sizes = [8, 1], strides = [1, 1]} : vector<8x5xf32> to vector<8x1xf32>
    %62 = vector.extract_strided_slice %43 {offsets = [0, 176], sizes = [8, 1152], strides = [1, 1]} : vector<8x1408xf32> to vector<8x1152xf32>
    %63 = vector.broadcast %61 : vector<8x1xf32> to vector<8x1152xf32>
    %64 = arith.mulf %63, %62 : vector<8x1152xf32>
    %65 = arith.addf %60, %64 : vector<8x1152xf32>
    %66 = vector.extract_strided_slice %44 {offsets = [0, 4], sizes = [8, 1], strides = [1, 1]} : vector<8x5xf32> to vector<8x1xf32>
    %67 = vector.extract_strided_slice %43 {offsets = [0, 224], sizes = [8, 1152], strides = [1, 1]} : vector<8x1408xf32> to vector<8x1152xf32>
    %68 = vector.broadcast %66 : vector<8x1xf32> to vector<8x1152xf32>
    %69 = arith.mulf %68, %67 : vector<8x1152xf32>
    %70 = arith.addf %65, %69 : vector<8x1152xf32>
    %c0_35 = arith.constant 0 : index
    %c0_36 = arith.constant 0 : index
    %71 = vector.load %arg9[%c0_35, %c0_36] : memref<8x1xf32, #tpu.memory_space<vmem>>, vector<8x1xf32>
    %72 = vector.broadcast %71 : vector<8x1xf32> to vector<8x1152xf32>
    %73 = arith.addf %70, %72 : vector<8x1152xf32>
    %cst_37 = arith.constant 0.000000e+00 : f32
    %74 = vector.broadcast %cst_37 : f32 to vector<8x1152xf32>
    %75 = arith.maximumf %73, %74 : vector<8x1152xf32>
    %c0_38 = arith.constant 0 : index
    %c0_39 = arith.constant 0 : index
    %c0_40 = arith.constant 0 : index
    %76 = vector.load %arg14[%c0_38, %c0_39, %c0_40] : memref<1x8x1152xf32, #tpu.memory_space<vmem>>, vector<1x8x1152xf32>
    %77 = vector.shape_cast %76 : vector<1x8x1152xf32> to vector<8x1152xf32>
    %78 = vector.shape_cast %75 : vector<8x1152xf32> to vector<1x8x1152xf32>
    tpu.vector_store %arg14[%c0_38, %c0_39, %c0_40], %78 {strides = array<i32>} : memref<1x8x1152xf32, #tpu.memory_space<vmem>>, vector<1x8x1152xf32>,
    %c0_41 = arith.constant 0 : index
    %c0_42 = arith.constant 0 : index
    %c0_43 = arith.constant 0 : index
    %79 = vector.load %arg6[%c0_41, %c0_42, %c0_43] : memref<1x1x1152xf32, #tpu.memory_space<vmem>>, vector<1x1x1152xf32>
    %80 = vector.shape_cast %79 : vector<1x1x1152xf32> to vector<1x1152xf32>
    %cst_44 = arith.constant 5.000000e-01 : f32
    %81 = vector.broadcast %cst_44 : f32 to vector<1x1152xf32>
    %82 = arith.cmpf ogt, %80, %81 : vector<1x1152xf32>
    %cst_45 = arith.constant 0.000000e+00 : f32
    %83 = vector.shape_cast %82 : vector<1x1152xi1> to vector<1x1152xi1>
    %84 = vector.broadcast %83 : vector<1x1152xi1> to vector<8x1152xi1>
    %85 = vector.broadcast %cst_45 : f32 to vector<8x1152xf32>
    %86 = arith.select %84, %75, %85 : vector<8x1152xi1>, vector<8x1152xf32>
    %c0_i32 = arith.constant 0 : i32
    %87 = arith.cmpi eq, %arg1, %c0_i32 : i32
    %88 = arith.extui %87 : i1 to i32
    %c0_i32_46 = arith.constant 0 : i32
    %89 = arith.cmpi ne, %88, %c0_i32_46 : i32
    scf.if %89 {
      %cst_61 = arith.constant 0.000000e+00 : f32
      %107 = vector.broadcast %cst_61 : f32 to vector<1x8x1xf32>
      %c0_62 = arith.constant 0 : index
      %c0_63 = arith.constant 0 : index
      %c0_64 = arith.constant 0 : index
      %108 = vector.load %arg15[%c0_62, %c0_63, %c0_64] : memref<1x8x1xf32, #tpu.memory_space<vmem>>, vector<1x8x1xf32>
      tpu.vector_store %arg15[%c0_62, %c0_63, %c0_64], %107 {strides = array<i32>} : memref<1x8x1xf32, #tpu.memory_space<vmem>>, vector<1x8x1xf32>,
      %cst_65 = arith.constant 0.000000e+00 : f32
      %109 = vector.broadcast %cst_65 : f32 to vector<1x8x1xf32>
      %c0_66 = arith.constant 0 : index
      %c0_67 = arith.constant 0 : index
      %c0_68 = arith.constant 0 : index
      %110 = vector.load %arg16[%c0_66, %c0_67, %c0_68] : memref<1x8x1xf32, #tpu.memory_space<vmem>>, vector<1x8x1xf32>
      tpu.vector_store %arg16[%c0_66, %c0_67, %c0_68], %109 {strides = array<i32>} : memref<1x8x1xf32, #tpu.memory_space<vmem>>, vector<1x8x1xf32>,
    } else {
    }
    %c0_47 = arith.constant 0 : index
    %c0_48 = arith.constant 0 : index
    %c0_49 = arith.constant 0 : index
    %90 = vector.load %arg15[%c0_47, %c0_48, %c0_49] : memref<1x8x1xf32, #tpu.memory_space<vmem>>, vector<1x8x1xf32>
    %91 = vector.shape_cast %90 : vector<1x8x1xf32> to vector<8x1xf32>
    %cst_50 = arith.constant dense<0.000000e+00> : vector<8xf32>
    %92 = vector.multi_reduction <add>, %86, %cst_50 [1] : vector<8x1152xf32> to vector<8xf32>
    %93 = vector.shape_cast %92 : vector<8xf32> to vector<8x1xf32>
    %94 = arith.addf %91, %93 : vector<8x1xf32>
    %c0_51 = arith.constant 0 : index
    %c0_52 = arith.constant 0 : index
    %c0_53 = arith.constant 0 : index
    %95 = vector.load %arg15[%c0_51, %c0_52, %c0_53] : memref<1x8x1xf32, #tpu.memory_space<vmem>>, vector<1x8x1xf32>
    %96 = vector.shape_cast %95 : vector<1x8x1xf32> to vector<8x1xf32>
    %97 = vector.shape_cast %94 : vector<8x1xf32> to vector<1x8x1xf32>
    tpu.vector_store %arg15[%c0_51, %c0_52, %c0_53], %97 {strides = array<i32>} : memref<1x8x1xf32, #tpu.memory_space<vmem>>, vector<1x8x1xf32>,
    %c0_54 = arith.constant 0 : index
    %c0_55 = arith.constant 0 : index
    %c0_56 = arith.constant 0 : index
    %98 = vector.load %arg16[%c0_54, %c0_55, %c0_56] : memref<1x8x1xf32, #tpu.memory_space<vmem>>, vector<1x8x1xf32>
    %99 = vector.shape_cast %98 : vector<1x8x1xf32> to vector<8x1xf32>
    %100 = arith.mulf %86, %86 : vector<8x1152xf32>
    %cst_57 = arith.constant dense<0.000000e+00> : vector<8xf32>
    %101 = vector.multi_reduction <add>, %100, %cst_57 [1] : vector<8x1152xf32> to vector<8xf32>
    %102 = vector.shape_cast %101 : vector<8xf32> to vector<8x1xf32>
    %103 = arith.addf %99, %102 : vector<8x1xf32>
    %c0_58 = arith.constant 0 : index
    %c0_59 = arith.constant 0 : index
    %c0_60 = arith.constant 0 : index
    %104 = vector.load %arg16[%c0_58, %c0_59, %c0_60] : memref<1x8x1xf32, #tpu.memory_space<vmem>>, vector<1x8x1xf32>
    %105 = vector.shape_cast %104 : vector<1x8x1xf32> to vector<8x1xf32>
    %106 = vector.shape_cast %103 : vector<8x1xf32> to vector<1x8x1xf32>
    tpu.vector_store %arg16[%c0_58, %c0_59, %c0_60], %106 {strides = array<i32>} : memref<1x8x1xf32, #tpu.memory_space<vmem>>, vector<1x8x1xf32>,
    return
  }
  func.func @transform_0(%arg0: i32, %arg1: i32) -> (i32, i32, i32) {
    %c1_i32 = arith.constant 1 : i32
    %0 = arith.muli %arg0, %c1_i32 : i32
    %1 = arith.addi %0, %arg1 : i32
    %c1_i32_0 = arith.constant 1 : i32
    %2 = arith.subi %1, %c1_i32_0 : i32
    %c0_i32 = arith.constant 0 : i32
    %3 = arith.maxsi %2, %c0_i32 : i32
    %c0_i32_1 = arith.constant 0 : i32
    %c8_i32 = arith.constant 8 : i32
    %c0_i32_2 = arith.constant 0 : i32
    return %3, %c0_i32_1, %c8_i32 : i32, i32, i32
  }
  func.func @transform_1(%arg0: i32, %arg1: i32) -> (i32, i32, i32) {
    %c1_i32 = arith.constant 1 : i32
    %0 = arith.muli %arg0, %c1_i32 : i32
    %1 = arith.addi %0, %arg1 : i32
    %c0_i32 = arith.constant 0 : i32
    %c0_i32_0 = arith.constant 0 : i32
    %c0_i32_1 = arith.constant 0 : i32
    return %1, %c0_i32, %c0_i32_0 : i32, i32, i32
  }
  func.func @transform_2(%arg0: i32, %arg1: i32) -> (i32, i32, i32) {
    %c1_i32 = arith.constant 1 : i32
    %0 = arith.muli %arg0, %c1_i32 : i32
    %1 = arith.addi %0, %arg1 : i32
    %c1_i32_0 = arith.constant 1 : i32
    %2 = arith.addi %1, %c1_i32_0 : i32
    %c0_i32 = arith.constant 0 : i32
    %3 = arith.minsi %2, %c0_i32 : i32
    %c0_i32_1 = arith.constant 0 : i32
    %c0_i32_2 = arith.constant 0 : i32
    %c0_i32_3 = arith.constant 0 : i32
    return %3, %c0_i32_1, %c0_i32_2 : i32, i32, i32
  }
  func.func @transform_3(%arg0: i32, %arg1: i32) -> (i32, i32, i32) {
    %c1_i32 = arith.constant 1 : i32
    %0 = arith.muli %arg0, %c1_i32 : i32
    %1 = arith.addi %0, %arg1 : i32
    %c1_i32_0 = arith.constant 1 : i32
    %2 = arith.subi %1, %c1_i32_0 : i32
    %c0_i32 = arith.constant 0 : i32
    %3 = arith.maxsi %2, %c0_i32 : i32
    %c0_i32_1 = arith.constant 0 : i32
    %c8_i32 = arith.constant 8 : i32
    %c0_i32_2 = arith.constant 0 : i32
    return %3, %c0_i32_1, %c8_i32 : i32, i32, i32
  }
  func.func @transform_4(%arg0: i32, %arg1: i32) -> (i32, i32, i32) {
    %c1_i32 = arith.constant 1 : i32
    %0 = arith.muli %arg0, %c1_i32 : i32
    %1 = arith.addi %0, %arg1 : i32
    %c0_i32 = arith.constant 0 : i32
    %c0_i32_0 = arith.constant 0 : i32
    %c0_i32_1 = arith.constant 0 : i32
    return %1, %c0_i32, %c0_i32_0 : i32, i32, i32
  }
  func.func @transform_5(%arg0: i32, %arg1: i32) -> (i32, i32, i32) {
    %c1_i32 = arith.constant 1 : i32
    %0 = arith.muli %arg0, %c1_i32 : i32
    %1 = arith.addi %0, %arg1 : i32
    %c1_i32_0 = arith.constant 1 : i32
    %2 = arith.addi %1, %c1_i32_0 : i32
    %c0_i32 = arith.constant 0 : i32
    %3 = arith.minsi %2, %c0_i32 : i32
    %c0_i32_1 = arith.constant 0 : i32
    %c0_i32_2 = arith.constant 0 : i32
    %c0_i32_3 = arith.constant 0 : i32
    return %3, %c0_i32_1, %c0_i32_2 : i32, i32, i32
  }
  func.func @transform_6(%arg0: i32, %arg1: i32) -> (i32, i32) {
    %c0_i32 = arith.constant 0 : i32
    %c0_i32_0 = arith.constant 0 : i32
    %c0_i32_1 = arith.constant 0 : i32
    return %c0_i32, %c0_i32_0 : i32, i32
  }
  func.func @transform_7(%arg0: i32, %arg1: i32) -> (i32, i32) {
    %c0_i32 = arith.constant 0 : i32
    %c0_i32_0 = arith.constant 0 : i32
    %c0_i32_1 = arith.constant 0 : i32
    return %c0_i32, %c0_i32_0 : i32, i32
  }
  func.func @transform_8(%arg0: i32, %arg1: i32) -> (i32, i32, i32) {
    %c0_i32 = arith.constant 0 : i32
    %c0_i32_0 = arith.constant 0 : i32
    %c0_i32_1 = arith.constant 0 : i32
    %c0_i32_2 = arith.constant 0 : i32
    return %c0_i32, %c0_i32_0, %c0_i32_1 : i32, i32, i32
  }
  func.func @transform_9(%arg0: i32, %arg1: i32) -> (i32, i32, i32) {
    %c0_i32 = arith.constant 0 : i32
    %c0_i32_0 = arith.constant 0 : i32
    %c0_i32_1 = arith.constant 0 : i32
    %c0_i32_2 = arith.constant 0 : i32
    return %c0_i32, %c0_i32_0, %c0_i32_1 : i32, i32, i32
  }
  func.func @transform_10(%arg0: i32, %arg1: i32) -> (i32, i32) {
    %c0_i32 = arith.constant 0 : i32
    %c0_i32_0 = arith.constant 0 : i32
    %c0_i32_1 = arith.constant 0 : i32
    return %c0_i32, %c0_i32_0 : i32, i32
  }
  func.func @transform_11(%arg0: i32, %arg1: i32) -> (i32, i32) {
    %c0_i32 = arith.constant 0 : i32
    %c0_i32_0 = arith.constant 0 : i32
    %c0_i32_1 = arith.constant 0 : i32
    return %c0_i32, %c0_i32_0 : i32, i32
  }
  func.func @transform_12(%arg0: i32, %arg1: i32) -> (i32, i32, i32) {
    %c1_i32 = arith.constant 1 : i32
    %0 = arith.muli %arg0, %c1_i32 : i32
    %1 = arith.addi %0, %arg1 : i32
    %c0_i32 = arith.constant 0 : i32
    %c0_i32_0 = arith.constant 0 : i32
    %c0_i32_1 = arith.constant 0 : i32
    return %1, %c0_i32, %c0_i32_0 : i32, i32, i32
  }
  func.func @transform_13(%arg0: i32, %arg1: i32) -> (i32, i32, i32) {
    %c0_i32 = arith.constant 0 : i32
    %c0_i32_0 = arith.constant 0 : i32
    %c0_i32_1 = arith.constant 0 : i32
    return %arg0, %c0_i32, %c0_i32_0 : i32, i32, i32
  }
  func.func @transform_14(%arg0: i32, %arg1: i32) -> (i32, i32, i32) {
    %c0_i32 = arith.constant 0 : i32
    %c0_i32_0 = arith.constant 0 : i32
    %c0_i32_1 = arith.constant 0 : i32
    return %arg0, %c0_i32, %c0_i32_0 : i32, i32, i32
  }
}

module attributes {stable_mosaic.version = 11 : i64} {
  func.func @_dw_stage_kernel(%arg0: i32, %arg1: i32, %arg2: memref<1x8x128xf32, #tpu.memory_space<vmem>>, %arg3: memref<1x8x1152xf32, #tpu.memory_space<vmem>>, %arg4: memref<1x8x128xf32, #tpu.memory_space<vmem>>, %arg5: memref<1x1x128xf32, #tpu.memory_space<vmem>>, %arg6: memref<1x1x1152xf32, #tpu.memory_space<vmem>>, %arg7: memref<1x1x128xf32, #tpu.memory_space<vmem>>, %arg8: memref<8x3xf32, #tpu.memory_space<vmem>>, %arg9: memref<8x1xf32, #tpu.memory_space<vmem>>, %arg10: memref<1x8x1xf32, #tpu.memory_space<vmem>>, %arg11: memref<1x8x1xf32, #tpu.memory_space<vmem>>, %arg12: memref<8x1xf32, #tpu.memory_space<vmem>>, %arg13: memref<8x1xf32, #tpu.memory_space<vmem>>, %arg14: memref<1x8x1152xf32, #tpu.memory_space<vmem>>, %arg15: memref<1x8x1xf32, #tpu.memory_space<vmem>>, %arg16: memref<1x8x1xf32, #tpu.memory_space<vmem>>) attributes {dimension_semantics = [#tpu.dimension_semantics<parallel>, #tpu.dimension_semantics<arbitrary>], iteration_bounds = array<i64: 1, 1>, scalar_prefetch = 0 : i64, scratch_operands = 0 : i64, tpu.core_type = #tpu.core_type<tc>, window_params = [{transform_indices = @transform_0, window_bounds = array<i64: 1, 8, 128>}, {transform_indices = @transform_1, window_bounds = array<i64: 1, 8, 1152>}, {transform_indices = @transform_2, window_bounds = array<i64: 1, 8, 128>}, {transform_indices = @transform_3, window_bounds = array<i64: 1, 1, 128>}, {transform_indices = @transform_4, window_bounds = array<i64: 1, 1, 1152>}, {transform_indices = @transform_5, window_bounds = array<i64: 1, 1, 128>}, {pipeline_mode = #tpu.pipeline_mode<synchronous>, transform_indices = @transform_6, window_bounds = array<i64: 8, 3>}, {pipeline_mode = #tpu.pipeline_mode<synchronous>, transform_indices = @transform_7, window_bounds = array<i64: 8, 1>}, {pipeline_mode = #tpu.pipeline_mode<synchronous>, transform_indices = @transform_8, window_bounds = array<i64: 1, 8, 1>}, {pipeline_mode = #tpu.pipeline_mode<synchronous>, transform_indices = @transform_9, window_bounds = array<i64: 1, 8, 1>}, {pipeline_mode = #tpu.pipeline_mode<synchronous>, transform_indices = @transform_10, window_bounds = array<i64: 8, 1>}, {pipeline_mode = #tpu.pipeline_mode<synchronous>, transform_indices = @transform_11, window_bounds = array<i64: 8, 1>}, {transform_indices = @transform_12, window_bounds = array<i64: 1, 8, 1152>}, {transform_indices = @transform_13, window_bounds = array<i64: 1, 8, 1>}, {transform_indices = @transform_14, window_bounds = array<i64: 1, 8, 1>}]} {
    %c0 = arith.constant 0 : index
    %c0_0 = arith.constant 0 : index
    %c0_1 = arith.constant 0 : index
    %0 = vector.load %arg2[%c0, %c0_0, %c0_1] : memref<1x8x128xf32, #tpu.memory_space<vmem>>, vector<1x8x128xf32>
    %1 = vector.shape_cast %0 : vector<1x8x128xf32> to vector<8x128xf32>
    %c0_2 = arith.constant 0 : index
    %c0_3 = arith.constant 0 : index
    %c0_4 = arith.constant 0 : index
    %2 = vector.load %arg3[%c0_2, %c0_3, %c0_4] : memref<1x8x1152xf32, #tpu.memory_space<vmem>>, vector<1x8x1152xf32>
    %3 = vector.shape_cast %2 : vector<1x8x1152xf32> to vector<8x1152xf32>
    %c0_5 = arith.constant 0 : index
    %c0_6 = arith.constant 0 : index
    %c0_7 = arith.constant 0 : index
    %4 = vector.load %arg4[%c0_5, %c0_6, %c0_7] : memref<1x8x128xf32, #tpu.memory_space<vmem>>, vector<1x8x128xf32>
    %5 = vector.shape_cast %4 : vector<1x8x128xf32> to vector<8x128xf32>
    %6 = tpu.concatenate %1, %3, %5 in 1 : vector<8x128xf32>, vector<8x1152xf32>, vector<8x128xf32> -> vector<8x1408xf32>
    %c0_8 = arith.constant 0 : index
    %c0_9 = arith.constant 0 : index
    %c0_10 = arith.constant 0 : index
    %7 = vector.load %arg5[%c0_8, %c0_9, %c0_10] : memref<1x1x128xf32, #tpu.memory_space<vmem>>, vector<1x1x128xf32>
    %8 = vector.shape_cast %7 : vector<1x1x128xf32> to vector<1x128xf32>
    %c0_11 = arith.constant 0 : index
    %c0_12 = arith.constant 0 : index
    %c0_13 = arith.constant 0 : index
    %9 = vector.load %arg6[%c0_11, %c0_12, %c0_13] : memref<1x1x1152xf32, #tpu.memory_space<vmem>>, vector<1x1x1152xf32>
    %10 = vector.shape_cast %9 : vector<1x1x1152xf32> to vector<1x1152xf32>
    %c0_14 = arith.constant 0 : index
    %c0_15 = arith.constant 0 : index
    %c0_16 = arith.constant 0 : index
    %11 = vector.load %arg7[%c0_14, %c0_15, %c0_16] : memref<1x1x128xf32, #tpu.memory_space<vmem>>, vector<1x1x128xf32>
    %12 = vector.shape_cast %11 : vector<1x1x128xf32> to vector<1x128xf32>
    %13 = tpu.concatenate %8, %10, %12 in 1 : vector<1x128xf32>, vector<1x1152xf32>, vector<1x128xf32> -> vector<1x1408xf32>
    %cst = arith.constant 5.000000e-01 : f32
    %14 = vector.broadcast %cst : f32 to vector<1x1408xf32>
    %15 = arith.cmpf ogt, %13, %14 : vector<1x1408xf32>
    %cst_17 = arith.constant 0.000000e+00 : f32
    %16 = vector.shape_cast %15 : vector<1x1408xi1> to vector<1x1408xi1>
    %17 = vector.broadcast %16 : vector<1x1408xi1> to vector<8x1408xi1>
    %18 = vector.broadcast %cst_17 : f32 to vector<8x1408xf32>
    %19 = arith.select %17, %6, %18 : vector<8x1408xi1>, vector<8x1408xf32>
    %c0_18 = arith.constant 0 : index
    %c0_19 = arith.constant 0 : index
    %20 = vector.load %arg8[%c0_18, %c0_19] : memref<8x3xf32, #tpu.memory_space<vmem>>, vector<8x3xf32>
    %cst_20 = arith.constant 0.000000e+00 : f32
    %21 = vector.broadcast %cst_20 : f32 to vector<8x1152xf32>
    %22 = vector.extract_strided_slice %20 {offsets = [0, 0], sizes = [8, 1], strides = [1, 1]} : vector<8x3xf32> to vector<8x1xf32>
    %23 = vector.extract_strided_slice %19 {offsets = [0, 127], sizes = [8, 1152], strides = [1, 1]} : vector<8x1408xf32> to vector<8x1152xf32>
    %24 = vector.broadcast %22 : vector<8x1xf32> to vector<8x1152xf32>
    %25 = arith.mulf %24, %23 : vector<8x1152xf32>
    %26 = arith.addf %21, %25 : vector<8x1152xf32>
    %27 = vector.extract_strided_slice %20 {offsets = [0, 1], sizes = [8, 1], strides = [1, 1]} : vector<8x3xf32> to vector<8x1xf32>
    %28 = vector.extract_strided_slice %19 {offsets = [0, 128], sizes = [8, 1152], strides = [1, 1]} : vector<8x1408xf32> to vector<8x1152xf32>
    %29 = vector.broadcast %27 : vector<8x1xf32> to vector<8x1152xf32>
    %30 = arith.mulf %29, %28 : vector<8x1152xf32>
    %31 = arith.addf %26, %30 : vector<8x1152xf32>
    %32 = vector.extract_strided_slice %20 {offsets = [0, 2], sizes = [8, 1], strides = [1, 1]} : vector<8x3xf32> to vector<8x1xf32>
    %33 = vector.extract_strided_slice %19 {offsets = [0, 129], sizes = [8, 1152], strides = [1, 1]} : vector<8x1408xf32> to vector<8x1152xf32>
    %34 = vector.broadcast %32 : vector<8x1xf32> to vector<8x1152xf32>
    %35 = arith.mulf %34, %33 : vector<8x1152xf32>
    %36 = arith.addf %31, %35 : vector<8x1152xf32>
    %c0_21 = arith.constant 0 : index
    %c0_22 = arith.constant 0 : index
    %37 = vector.load %arg9[%c0_21, %c0_22] : memref<8x1xf32, #tpu.memory_space<vmem>>, vector<8x1xf32>
    %38 = vector.broadcast %37 : vector<8x1xf32> to vector<8x1152xf32>
    %39 = arith.addf %36, %38 : vector<8x1152xf32>
    %cst_23 = arith.constant 0.000000e+00 : f32
    %40 = vector.broadcast %cst_23 : f32 to vector<8x1152xf32>
    %41 = arith.maximumf %39, %40 : vector<8x1152xf32>
    %c0_24 = arith.constant 0 : index
    %c0_25 = arith.constant 0 : index
    %c0_26 = arith.constant 0 : index
    %42 = vector.load %arg14[%c0_24, %c0_25, %c0_26] : memref<1x8x1152xf32, #tpu.memory_space<vmem>>, vector<1x8x1152xf32>
    %43 = vector.shape_cast %42 : vector<1x8x1152xf32> to vector<8x1152xf32>
    %44 = vector.shape_cast %41 : vector<8x1152xf32> to vector<1x8x1152xf32>
    tpu.vector_store %arg14[%c0_24, %c0_25, %c0_26], %44 {strides = array<i32>} : memref<1x8x1152xf32, #tpu.memory_space<vmem>>, vector<1x8x1152xf32>,
    %c0_27 = arith.constant 0 : index
    %c0_28 = arith.constant 0 : index
    %c0_29 = arith.constant 0 : index
    %45 = vector.load %arg6[%c0_27, %c0_28, %c0_29] : memref<1x1x1152xf32, #tpu.memory_space<vmem>>, vector<1x1x1152xf32>
    %46 = vector.shape_cast %45 : vector<1x1x1152xf32> to vector<1x1152xf32>
    %cst_30 = arith.constant 5.000000e-01 : f32
    %47 = vector.broadcast %cst_30 : f32 to vector<1x1152xf32>
    %48 = arith.cmpf ogt, %46, %47 : vector<1x1152xf32>
    %cst_31 = arith.constant 0.000000e+00 : f32
    %49 = vector.shape_cast %48 : vector<1x1152xi1> to vector<1x1152xi1>
    %50 = vector.broadcast %49 : vector<1x1152xi1> to vector<8x1152xi1>
    %51 = vector.broadcast %cst_31 : f32 to vector<8x1152xf32>
    %52 = arith.select %50, %41, %51 : vector<8x1152xi1>, vector<8x1152xf32>
    %c0_i32 = arith.constant 0 : i32
    %53 = arith.cmpi eq, %arg1, %c0_i32 : i32
    %54 = arith.extui %53 : i1 to i32
    %c0_i32_32 = arith.constant 0 : i32
    %55 = arith.cmpi ne, %54, %c0_i32_32 : i32
    scf.if %55 {
      %cst_47 = arith.constant 0.000000e+00 : f32
      %73 = vector.broadcast %cst_47 : f32 to vector<1x8x1xf32>
      %c0_48 = arith.constant 0 : index
      %c0_49 = arith.constant 0 : index
      %c0_50 = arith.constant 0 : index
      %74 = vector.load %arg15[%c0_48, %c0_49, %c0_50] : memref<1x8x1xf32, #tpu.memory_space<vmem>>, vector<1x8x1xf32>
      tpu.vector_store %arg15[%c0_48, %c0_49, %c0_50], %73 {strides = array<i32>} : memref<1x8x1xf32, #tpu.memory_space<vmem>>, vector<1x8x1xf32>,
      %cst_51 = arith.constant 0.000000e+00 : f32
      %75 = vector.broadcast %cst_51 : f32 to vector<1x8x1xf32>
      %c0_52 = arith.constant 0 : index
      %c0_53 = arith.constant 0 : index
      %c0_54 = arith.constant 0 : index
      %76 = vector.load %arg16[%c0_52, %c0_53, %c0_54] : memref<1x8x1xf32, #tpu.memory_space<vmem>>, vector<1x8x1xf32>
      tpu.vector_store %arg16[%c0_52, %c0_53, %c0_54], %75 {strides = array<i32>} : memref<1x8x1xf32, #tpu.memory_space<vmem>>, vector<1x8x1xf32>,
    } else {
    }
    %c0_33 = arith.constant 0 : index
    %c0_34 = arith.constant 0 : index
    %c0_35 = arith.constant 0 : index
    %56 = vector.load %arg15[%c0_33, %c0_34, %c0_35] : memref<1x8x1xf32, #tpu.memory_space<vmem>>, vector<1x8x1xf32>
    %57 = vector.shape_cast %56 : vector<1x8x1xf32> to vector<8x1xf32>
    %cst_36 = arith.constant dense<0.000000e+00> : vector<8xf32>
    %58 = vector.multi_reduction <add>, %52, %cst_36 [1] : vector<8x1152xf32> to vector<8xf32>
    %59 = vector.shape_cast %58 : vector<8xf32> to vector<8x1xf32>
    %60 = arith.addf %57, %59 : vector<8x1xf32>
    %c0_37 = arith.constant 0 : index
    %c0_38 = arith.constant 0 : index
    %c0_39 = arith.constant 0 : index
    %61 = vector.load %arg15[%c0_37, %c0_38, %c0_39] : memref<1x8x1xf32, #tpu.memory_space<vmem>>, vector<1x8x1xf32>
    %62 = vector.shape_cast %61 : vector<1x8x1xf32> to vector<8x1xf32>
    %63 = vector.shape_cast %60 : vector<8x1xf32> to vector<1x8x1xf32>
    tpu.vector_store %arg15[%c0_37, %c0_38, %c0_39], %63 {strides = array<i32>} : memref<1x8x1xf32, #tpu.memory_space<vmem>>, vector<1x8x1xf32>,
    %c0_40 = arith.constant 0 : index
    %c0_41 = arith.constant 0 : index
    %c0_42 = arith.constant 0 : index
    %64 = vector.load %arg16[%c0_40, %c0_41, %c0_42] : memref<1x8x1xf32, #tpu.memory_space<vmem>>, vector<1x8x1xf32>
    %65 = vector.shape_cast %64 : vector<1x8x1xf32> to vector<8x1xf32>
    %66 = arith.mulf %52, %52 : vector<8x1152xf32>
    %cst_43 = arith.constant dense<0.000000e+00> : vector<8xf32>
    %67 = vector.multi_reduction <add>, %66, %cst_43 [1] : vector<8x1152xf32> to vector<8xf32>
    %68 = vector.shape_cast %67 : vector<8xf32> to vector<8x1xf32>
    %69 = arith.addf %65, %68 : vector<8x1xf32>
    %c0_44 = arith.constant 0 : index
    %c0_45 = arith.constant 0 : index
    %c0_46 = arith.constant 0 : index
    %70 = vector.load %arg16[%c0_44, %c0_45, %c0_46] : memref<1x8x1xf32, #tpu.memory_space<vmem>>, vector<1x8x1xf32>
    %71 = vector.shape_cast %70 : vector<1x8x1xf32> to vector<8x1xf32>
    %72 = vector.shape_cast %69 : vector<8x1xf32> to vector<1x8x1xf32>
    tpu.vector_store %arg16[%c0_44, %c0_45, %c0_46], %72 {strides = array<i32>} : memref<1x8x1xf32, #tpu.memory_space<vmem>>, vector<1x8x1xf32>,
    return
  }
  func.func @transform_0(%arg0: i32, %arg1: i32) -> (i32, i32, i32) {
    %c1_i32 = arith.constant 1 : i32
    %0 = arith.muli %arg0, %c1_i32 : i32
    %1 = arith.addi %0, %arg1 : i32
    %c1_i32_0 = arith.constant 1 : i32
    %2 = arith.subi %1, %c1_i32_0 : i32
    %c0_i32 = arith.constant 0 : i32
    %3 = arith.maxsi %2, %c0_i32 : i32
    %c0_i32_1 = arith.constant 0 : i32
    %c8_i32 = arith.constant 8 : i32
    %c0_i32_2 = arith.constant 0 : i32
    return %3, %c0_i32_1, %c8_i32 : i32, i32, i32
  }
  func.func @transform_1(%arg0: i32, %arg1: i32) -> (i32, i32, i32) {
    %c1_i32 = arith.constant 1 : i32
    %0 = arith.muli %arg0, %c1_i32 : i32
    %1 = arith.addi %0, %arg1 : i32
    %c0_i32 = arith.constant 0 : i32
    %c0_i32_0 = arith.constant 0 : i32
    %c0_i32_1 = arith.constant 0 : i32
    return %1, %c0_i32, %c0_i32_0 : i32, i32, i32
  }
  func.func @transform_2(%arg0: i32, %arg1: i32) -> (i32, i32, i32) {
    %c1_i32 = arith.constant 1 : i32
    %0 = arith.muli %arg0, %c1_i32 : i32
    %1 = arith.addi %0, %arg1 : i32
    %c1_i32_0 = arith.constant 1 : i32
    %2 = arith.addi %1, %c1_i32_0 : i32
    %c0_i32 = arith.constant 0 : i32
    %3 = arith.minsi %2, %c0_i32 : i32
    %c0_i32_1 = arith.constant 0 : i32
    %c0_i32_2 = arith.constant 0 : i32
    %c0_i32_3 = arith.constant 0 : i32
    return %3, %c0_i32_1, %c0_i32_2 : i32, i32, i32
  }
  func.func @transform_3(%arg0: i32, %arg1: i32) -> (i32, i32, i32) {
    %c1_i32 = arith.constant 1 : i32
    %0 = arith.muli %arg0, %c1_i32 : i32
    %1 = arith.addi %0, %arg1 : i32
    %c1_i32_0 = arith.constant 1 : i32
    %2 = arith.subi %1, %c1_i32_0 : i32
    %c0_i32 = arith.constant 0 : i32
    %3 = arith.maxsi %2, %c0_i32 : i32
    %c0_i32_1 = arith.constant 0 : i32
    %c8_i32 = arith.constant 8 : i32
    %c0_i32_2 = arith.constant 0 : i32
    return %3, %c0_i32_1, %c8_i32 : i32, i32, i32
  }
  func.func @transform_4(%arg0: i32, %arg1: i32) -> (i32, i32, i32) {
    %c1_i32 = arith.constant 1 : i32
    %0 = arith.muli %arg0, %c1_i32 : i32
    %1 = arith.addi %0, %arg1 : i32
    %c0_i32 = arith.constant 0 : i32
    %c0_i32_0 = arith.constant 0 : i32
    %c0_i32_1 = arith.constant 0 : i32
    return %1, %c0_i32, %c0_i32_0 : i32, i32, i32
  }
  func.func @transform_5(%arg0: i32, %arg1: i32) -> (i32, i32, i32) {
    %c1_i32 = arith.constant 1 : i32
    %0 = arith.muli %arg0, %c1_i32 : i32
    %1 = arith.addi %0, %arg1 : i32
    %c1_i32_0 = arith.constant 1 : i32
    %2 = arith.addi %1, %c1_i32_0 : i32
    %c0_i32 = arith.constant 0 : i32
    %3 = arith.minsi %2, %c0_i32 : i32
    %c0_i32_1 = arith.constant 0 : i32
    %c0_i32_2 = arith.constant 0 : i32
    %c0_i32_3 = arith.constant 0 : i32
    return %3, %c0_i32_1, %c0_i32_2 : i32, i32, i32
  }
  func.func @transform_6(%arg0: i32, %arg1: i32) -> (i32, i32) {
    %c0_i32 = arith.constant 0 : i32
    %c0_i32_0 = arith.constant 0 : i32
    %c0_i32_1 = arith.constant 0 : i32
    return %c0_i32, %c0_i32_0 : i32, i32
  }
  func.func @transform_7(%arg0: i32, %arg1: i32) -> (i32, i32) {
    %c0_i32 = arith.constant 0 : i32
    %c0_i32_0 = arith.constant 0 : i32
    %c0_i32_1 = arith.constant 0 : i32
    return %c0_i32, %c0_i32_0 : i32, i32
  }
  func.func @transform_8(%arg0: i32, %arg1: i32) -> (i32, i32, i32) {
    %c0_i32 = arith.constant 0 : i32
    %c0_i32_0 = arith.constant 0 : i32
    %c0_i32_1 = arith.constant 0 : i32
    %c0_i32_2 = arith.constant 0 : i32
    return %c0_i32, %c0_i32_0, %c0_i32_1 : i32, i32, i32
  }
  func.func @transform_9(%arg0: i32, %arg1: i32) -> (i32, i32, i32) {
    %c0_i32 = arith.constant 0 : i32
    %c0_i32_0 = arith.constant 0 : i32
    %c0_i32_1 = arith.constant 0 : i32
    %c0_i32_2 = arith.constant 0 : i32
    return %c0_i32, %c0_i32_0, %c0_i32_1 : i32, i32, i32
  }
  func.func @transform_10(%arg0: i32, %arg1: i32) -> (i32, i32) {
    %c0_i32 = arith.constant 0 : i32
    %c0_i32_0 = arith.constant 0 : i32
    %c0_i32_1 = arith.constant 0 : i32
    return %c0_i32, %c0_i32_0 : i32, i32
  }
  func.func @transform_11(%arg0: i32, %arg1: i32) -> (i32, i32) {
    %c0_i32 = arith.constant 0 : i32
    %c0_i32_0 = arith.constant 0 : i32
    %c0_i32_1 = arith.constant 0 : i32
    return %c0_i32, %c0_i32_0 : i32, i32
  }
  func.func @transform_12(%arg0: i32, %arg1: i32) -> (i32, i32, i32) {
    %c1_i32 = arith.constant 1 : i32
    %0 = arith.muli %arg0, %c1_i32 : i32
    %1 = arith.addi %0, %arg1 : i32
    %c0_i32 = arith.constant 0 : i32
    %c0_i32_0 = arith.constant 0 : i32
    %c0_i32_1 = arith.constant 0 : i32
    return %1, %c0_i32, %c0_i32_0 : i32, i32, i32
  }
  func.func @transform_13(%arg0: i32, %arg1: i32) -> (i32, i32, i32) {
    %c0_i32 = arith.constant 0 : i32
    %c0_i32_0 = arith.constant 0 : i32
    %c0_i32_1 = arith.constant 0 : i32
    return %arg0, %c0_i32, %c0_i32_0 : i32, i32, i32
  }
  func.func @transform_14(%arg0: i32, %arg1: i32) -> (i32, i32, i32) {
    %c0_i32 = arith.constant 0 : i32
    %c0_i32_0 = arith.constant 0 : i32
    %c0_i32_1 = arith.constant 0 : i32
    return %arg0, %c0_i32, %c0_i32_0 : i32, i32, i32
  }
}

module attributes {stable_mosaic.version = 11 : i64} {
  func.func @_dw_stage_kernel(%arg0: i32, %arg1: i32, %arg2: memref<1x8x128xf32, #tpu.memory_space<vmem>>, %arg3: memref<1x8x1152xf32, #tpu.memory_space<vmem>>, %arg4: memref<1x8x128xf32, #tpu.memory_space<vmem>>, %arg5: memref<1x1x128xf32, #tpu.memory_space<vmem>>, %arg6: memref<1x1x1152xf32, #tpu.memory_space<vmem>>, %arg7: memref<1x1x128xf32, #tpu.memory_space<vmem>>, %arg8: memref<8x3xf32, #tpu.memory_space<vmem>>, %arg9: memref<8x1xf32, #tpu.memory_space<vmem>>, %arg10: memref<1x8x1xf32, #tpu.memory_space<vmem>>, %arg11: memref<1x8x1xf32, #tpu.memory_space<vmem>>, %arg12: memref<8x1xf32, #tpu.memory_space<vmem>>, %arg13: memref<8x1xf32, #tpu.memory_space<vmem>>, %arg14: memref<1x8x1152xf32, #tpu.memory_space<vmem>>, %arg15: memref<1x8x1xf32, #tpu.memory_space<vmem>>, %arg16: memref<1x8x1xf32, #tpu.memory_space<vmem>>) attributes {dimension_semantics = [#tpu.dimension_semantics<parallel>, #tpu.dimension_semantics<arbitrary>], iteration_bounds = array<i64: 1, 1>, scalar_prefetch = 0 : i64, scratch_operands = 0 : i64, tpu.core_type = #tpu.core_type<tc>, window_params = [{transform_indices = @transform_0, window_bounds = array<i64: 1, 8, 128>}, {transform_indices = @transform_1, window_bounds = array<i64: 1, 8, 1152>}, {transform_indices = @transform_2, window_bounds = array<i64: 1, 8, 128>}, {transform_indices = @transform_3, window_bounds = array<i64: 1, 1, 128>}, {transform_indices = @transform_4, window_bounds = array<i64: 1, 1, 1152>}, {transform_indices = @transform_5, window_bounds = array<i64: 1, 1, 128>}, {pipeline_mode = #tpu.pipeline_mode<synchronous>, transform_indices = @transform_6, window_bounds = array<i64: 8, 3>}, {pipeline_mode = #tpu.pipeline_mode<synchronous>, transform_indices = @transform_7, window_bounds = array<i64: 8, 1>}, {pipeline_mode = #tpu.pipeline_mode<synchronous>, transform_indices = @transform_8, window_bounds = array<i64: 1, 8, 1>}, {pipeline_mode = #tpu.pipeline_mode<synchronous>, transform_indices = @transform_9, window_bounds = array<i64: 1, 8, 1>}, {pipeline_mode = #tpu.pipeline_mode<synchronous>, transform_indices = @transform_10, window_bounds = array<i64: 8, 1>}, {pipeline_mode = #tpu.pipeline_mode<synchronous>, transform_indices = @transform_11, window_bounds = array<i64: 8, 1>}, {transform_indices = @transform_12, window_bounds = array<i64: 1, 8, 1152>}, {transform_indices = @transform_13, window_bounds = array<i64: 1, 8, 1>}, {transform_indices = @transform_14, window_bounds = array<i64: 1, 8, 1>}]} {
    %c0 = arith.constant 0 : index
    %c0_0 = arith.constant 0 : index
    %c0_1 = arith.constant 0 : index
    %0 = vector.load %arg2[%c0, %c0_0, %c0_1] : memref<1x8x128xf32, #tpu.memory_space<vmem>>, vector<1x8x128xf32>
    %1 = vector.shape_cast %0 : vector<1x8x128xf32> to vector<8x128xf32>
    %c0_2 = arith.constant 0 : index
    %c0_3 = arith.constant 0 : index
    %c0_4 = arith.constant 0 : index
    %2 = vector.load %arg3[%c0_2, %c0_3, %c0_4] : memref<1x8x1152xf32, #tpu.memory_space<vmem>>, vector<1x8x1152xf32>
    %3 = vector.shape_cast %2 : vector<1x8x1152xf32> to vector<8x1152xf32>
    %c0_5 = arith.constant 0 : index
    %c0_6 = arith.constant 0 : index
    %c0_7 = arith.constant 0 : index
    %4 = vector.load %arg4[%c0_5, %c0_6, %c0_7] : memref<1x8x128xf32, #tpu.memory_space<vmem>>, vector<1x8x128xf32>
    %5 = vector.shape_cast %4 : vector<1x8x128xf32> to vector<8x128xf32>
    %6 = tpu.concatenate %1, %3, %5 in 1 : vector<8x128xf32>, vector<8x1152xf32>, vector<8x128xf32> -> vector<8x1408xf32>
    %c0_8 = arith.constant 0 : index
    %c0_9 = arith.constant 0 : index
    %c0_10 = arith.constant 0 : index
    %7 = vector.load %arg5[%c0_8, %c0_9, %c0_10] : memref<1x1x128xf32, #tpu.memory_space<vmem>>, vector<1x1x128xf32>
    %8 = vector.shape_cast %7 : vector<1x1x128xf32> to vector<1x128xf32>
    %c0_11 = arith.constant 0 : index
    %c0_12 = arith.constant 0 : index
    %c0_13 = arith.constant 0 : index
    %9 = vector.load %arg6[%c0_11, %c0_12, %c0_13] : memref<1x1x1152xf32, #tpu.memory_space<vmem>>, vector<1x1x1152xf32>
    %10 = vector.shape_cast %9 : vector<1x1x1152xf32> to vector<1x1152xf32>
    %c0_14 = arith.constant 0 : index
    %c0_15 = arith.constant 0 : index
    %c0_16 = arith.constant 0 : index
    %11 = vector.load %arg7[%c0_14, %c0_15, %c0_16] : memref<1x1x128xf32, #tpu.memory_space<vmem>>, vector<1x1x128xf32>
    %12 = vector.shape_cast %11 : vector<1x1x128xf32> to vector<1x128xf32>
    %13 = tpu.concatenate %8, %10, %12 in 1 : vector<1x128xf32>, vector<1x1152xf32>, vector<1x128xf32> -> vector<1x1408xf32>
    %c0_17 = arith.constant 0 : index
    %c0_18 = arith.constant 0 : index
    %c0_19 = arith.constant 0 : index
    %14 = vector.load %arg10[%c0_17, %c0_18, %c0_19] : memref<1x8x1xf32, #tpu.memory_space<vmem>>, vector<1x8x1xf32>
    %15 = vector.shape_cast %14 : vector<1x8x1xf32> to vector<8x1xf32>
    %c0_20 = arith.constant 0 : index
    %c0_21 = arith.constant 0 : index
    %c0_22 = arith.constant 0 : index
    %16 = vector.load %arg11[%c0_20, %c0_21, %c0_22] : memref<1x8x1xf32, #tpu.memory_space<vmem>>, vector<1x8x1xf32>
    %17 = vector.shape_cast %16 : vector<1x8x1xf32> to vector<8x1xf32>
    %cst = arith.constant 0.001953125 : f32
    %18 = vector.broadcast %cst : f32 to vector<8x1xf32>
    %19 = arith.mulf %15, %18 : vector<8x1xf32>
    %cst_23 = arith.constant 0.001953125 : f32
    %20 = vector.broadcast %cst_23 : f32 to vector<8x1xf32>
    %21 = arith.mulf %17, %20 : vector<8x1xf32>
    %22 = arith.mulf %19, %19 : vector<8x1xf32>
    %23 = arith.subf %21, %22 : vector<8x1xf32>
    %cst_24 = arith.constant 0.000000e+00 : f32
    %24 = vector.broadcast %cst_24 : f32 to vector<8x1xf32>
    %25 = arith.maximumf %23, %24 : vector<8x1xf32>
    %c0_25 = arith.constant 0 : index
    %c0_26 = arith.constant 0 : index
    %26 = vector.load %arg12[%c0_25, %c0_26] : memref<8x1xf32, #tpu.memory_space<vmem>>, vector<8x1xf32>
    %cst_27 = arith.constant 9.99999974E-6 : f32
    %27 = vector.broadcast %cst_27 : f32 to vector<8x1xf32>
    %28 = arith.addf %25, %27 : vector<8x1xf32>
    %29 = math.rsqrt %28 : vector<8x1xf32>
    %30 = arith.mulf %26, %29 : vector<8x1xf32>
    %c0_28 = arith.constant 0 : index
    %c0_29 = arith.constant 0 : index
    %31 = vector.load %arg13[%c0_28, %c0_29] : memref<8x1xf32, #tpu.memory_space<vmem>>, vector<8x1xf32>
    %32 = arith.mulf %19, %30 : vector<8x1xf32>
    %33 = arith.subf %31, %32 : vector<8x1xf32>
    %cst_30 = arith.constant 5.000000e-01 : f32
    %34 = vector.broadcast %cst_30 : f32 to vector<1x1408xf32>
    %35 = arith.cmpf ogt, %13, %34 : vector<1x1408xf32>
    %36 = vector.broadcast %30 : vector<8x1xf32> to vector<8x1408xf32>
    %37 = arith.mulf %6, %36 : vector<8x1408xf32>
    %38 = vector.broadcast %33 : vector<8x1xf32> to vector<8x1408xf32>
    %39 = arith.addf %37, %38 : vector<8x1408xf32>
    %cst_31 = arith.constant 0.000000e+00 : f32
    %40 = vector.shape_cast %35 : vector<1x1408xi1> to vector<1x1408xi1>
    %41 = vector.broadcast %40 : vector<1x1408xi1> to vector<8x1408xi1>
    %42 = vector.broadcast %cst_31 : f32 to vector<8x1408xf32>
    %43 = arith.select %41, %39, %42 : vector<8x1408xi1>, vector<8x1408xf32>
    %c0_32 = arith.constant 0 : index
    %c0_33 = arith.constant 0 : index
    %44 = vector.load %arg8[%c0_32, %c0_33] : memref<8x3xf32, #tpu.memory_space<vmem>>, vector<8x3xf32>
    %cst_34 = arith.constant 0.000000e+00 : f32
    %45 = vector.broadcast %cst_34 : f32 to vector<8x1152xf32>
    %46 = vector.extract_strided_slice %44 {offsets = [0, 0], sizes = [8, 1], strides = [1, 1]} : vector<8x3xf32> to vector<8x1xf32>
    %47 = vector.extract_strided_slice %43 {offsets = [0, 104], sizes = [8, 1152], strides = [1, 1]} : vector<8x1408xf32> to vector<8x1152xf32>
    %48 = vector.broadcast %46 : vector<8x1xf32> to vector<8x1152xf32>
    %49 = arith.mulf %48, %47 : vector<8x1152xf32>
    %50 = arith.addf %45, %49 : vector<8x1152xf32>
    %51 = vector.extract_strided_slice %44 {offsets = [0, 1], sizes = [8, 1], strides = [1, 1]} : vector<8x3xf32> to vector<8x1xf32>
    %52 = vector.extract_strided_slice %43 {offsets = [0, 128], sizes = [8, 1152], strides = [1, 1]} : vector<8x1408xf32> to vector<8x1152xf32>
    %53 = vector.broadcast %51 : vector<8x1xf32> to vector<8x1152xf32>
    %54 = arith.mulf %53, %52 : vector<8x1152xf32>
    %55 = arith.addf %50, %54 : vector<8x1152xf32>
    %56 = vector.extract_strided_slice %44 {offsets = [0, 2], sizes = [8, 1], strides = [1, 1]} : vector<8x3xf32> to vector<8x1xf32>
    %57 = vector.extract_strided_slice %43 {offsets = [0, 152], sizes = [8, 1152], strides = [1, 1]} : vector<8x1408xf32> to vector<8x1152xf32>
    %58 = vector.broadcast %56 : vector<8x1xf32> to vector<8x1152xf32>
    %59 = arith.mulf %58, %57 : vector<8x1152xf32>
    %60 = arith.addf %55, %59 : vector<8x1152xf32>
    %c0_35 = arith.constant 0 : index
    %c0_36 = arith.constant 0 : index
    %61 = vector.load %arg9[%c0_35, %c0_36] : memref<8x1xf32, #tpu.memory_space<vmem>>, vector<8x1xf32>
    %62 = vector.broadcast %61 : vector<8x1xf32> to vector<8x1152xf32>
    %63 = arith.addf %60, %62 : vector<8x1152xf32>
    %cst_37 = arith.constant 0.000000e+00 : f32
    %64 = vector.broadcast %cst_37 : f32 to vector<8x1152xf32>
    %65 = arith.maximumf %63, %64 : vector<8x1152xf32>
    %c0_38 = arith.constant 0 : index
    %c0_39 = arith.constant 0 : index
    %c0_40 = arith.constant 0 : index
    %66 = vector.load %arg14[%c0_38, %c0_39, %c0_40] : memref<1x8x1152xf32, #tpu.memory_space<vmem>>, vector<1x8x1152xf32>
    %67 = vector.shape_cast %66 : vector<1x8x1152xf32> to vector<8x1152xf32>
    %68 = vector.shape_cast %65 : vector<8x1152xf32> to vector<1x8x1152xf32>
    tpu.vector_store %arg14[%c0_38, %c0_39, %c0_40], %68 {strides = array<i32>} : memref<1x8x1152xf32, #tpu.memory_space<vmem>>, vector<1x8x1152xf32>,
    %c0_41 = arith.constant 0 : index
    %c0_42 = arith.constant 0 : index
    %c0_43 = arith.constant 0 : index
    %69 = vector.load %arg6[%c0_41, %c0_42, %c0_43] : memref<1x1x1152xf32, #tpu.memory_space<vmem>>, vector<1x1x1152xf32>
    %70 = vector.shape_cast %69 : vector<1x1x1152xf32> to vector<1x1152xf32>
    %cst_44 = arith.constant 5.000000e-01 : f32
    %71 = vector.broadcast %cst_44 : f32 to vector<1x1152xf32>
    %72 = arith.cmpf ogt, %70, %71 : vector<1x1152xf32>
    %cst_45 = arith.constant 0.000000e+00 : f32
    %73 = vector.shape_cast %72 : vector<1x1152xi1> to vector<1x1152xi1>
    %74 = vector.broadcast %73 : vector<1x1152xi1> to vector<8x1152xi1>
    %75 = vector.broadcast %cst_45 : f32 to vector<8x1152xf32>
    %76 = arith.select %74, %65, %75 : vector<8x1152xi1>, vector<8x1152xf32>
    %c0_i32 = arith.constant 0 : i32
    %77 = arith.cmpi eq, %arg1, %c0_i32 : i32
    %78 = arith.extui %77 : i1 to i32
    %c0_i32_46 = arith.constant 0 : i32
    %79 = arith.cmpi ne, %78, %c0_i32_46 : i32
    scf.if %79 {
      %cst_61 = arith.constant 0.000000e+00 : f32
      %97 = vector.broadcast %cst_61 : f32 to vector<1x8x1xf32>
      %c0_62 = arith.constant 0 : index
      %c0_63 = arith.constant 0 : index
      %c0_64 = arith.constant 0 : index
      %98 = vector.load %arg15[%c0_62, %c0_63, %c0_64] : memref<1x8x1xf32, #tpu.memory_space<vmem>>, vector<1x8x1xf32>
      tpu.vector_store %arg15[%c0_62, %c0_63, %c0_64], %97 {strides = array<i32>} : memref<1x8x1xf32, #tpu.memory_space<vmem>>, vector<1x8x1xf32>,
      %cst_65 = arith.constant 0.000000e+00 : f32
      %99 = vector.broadcast %cst_65 : f32 to vector<1x8x1xf32>
      %c0_66 = arith.constant 0 : index
      %c0_67 = arith.constant 0 : index
      %c0_68 = arith.constant 0 : index
      %100 = vector.load %arg16[%c0_66, %c0_67, %c0_68] : memref<1x8x1xf32, #tpu.memory_space<vmem>>, vector<1x8x1xf32>
      tpu.vector_store %arg16[%c0_66, %c0_67, %c0_68], %99 {strides = array<i32>} : memref<1x8x1xf32, #tpu.memory_space<vmem>>, vector<1x8x1xf32>,
    } else {
    }
    %c0_47 = arith.constant 0 : index
    %c0_48 = arith.constant 0 : index
    %c0_49 = arith.constant 0 : index
    %80 = vector.load %arg15[%c0_47, %c0_48, %c0_49] : memref<1x8x1xf32, #tpu.memory_space<vmem>>, vector<1x8x1xf32>
    %81 = vector.shape_cast %80 : vector<1x8x1xf32> to vector<8x1xf32>
    %cst_50 = arith.constant dense<0.000000e+00> : vector<8xf32>
    %82 = vector.multi_reduction <add>, %76, %cst_50 [1] : vector<8x1152xf32> to vector<8xf32>
    %83 = vector.shape_cast %82 : vector<8xf32> to vector<8x1xf32>
    %84 = arith.addf %81, %83 : vector<8x1xf32>
    %c0_51 = arith.constant 0 : index
    %c0_52 = arith.constant 0 : index
    %c0_53 = arith.constant 0 : index
    %85 = vector.load %arg15[%c0_51, %c0_52, %c0_53] : memref<1x8x1xf32, #tpu.memory_space<vmem>>, vector<1x8x1xf32>
    %86 = vector.shape_cast %85 : vector<1x8x1xf32> to vector<8x1xf32>
    %87 = vector.shape_cast %84 : vector<8x1xf32> to vector<1x8x1xf32>
    tpu.vector_store %arg15[%c0_51, %c0_52, %c0_53], %87 {strides = array<i32>} : memref<1x8x1xf32, #tpu.memory_space<vmem>>, vector<1x8x1xf32>,
    %c0_54 = arith.constant 0 : index
    %c0_55 = arith.constant 0 : index
    %c0_56 = arith.constant 0 : index
    %88 = vector.load %arg16[%c0_54, %c0_55, %c0_56] : memref<1x8x1xf32, #tpu.memory_space<vmem>>, vector<1x8x1xf32>
    %89 = vector.shape_cast %88 : vector<1x8x1xf32> to vector<8x1xf32>
    %90 = arith.mulf %76, %76 : vector<8x1152xf32>
    %cst_57 = arith.constant dense<0.000000e+00> : vector<8xf32>
    %91 = vector.multi_reduction <add>, %90, %cst_57 [1] : vector<8x1152xf32> to vector<8xf32>
    %92 = vector.shape_cast %91 : vector<8xf32> to vector<8x1xf32>
    %93 = arith.addf %89, %92 : vector<8x1xf32>
    %c0_58 = arith.constant 0 : index
    %c0_59 = arith.constant 0 : index
    %c0_60 = arith.constant 0 : index
    %94 = vector.load %arg16[%c0_58, %c0_59, %c0_60] : memref<1x8x1xf32, #tpu.memory_space<vmem>>, vector<1x8x1xf32>
    %95 = vector.shape_cast %94 : vector<1x8x1xf32> to vector<8x1xf32>
    %96 = vector.shape_cast %93 : vector<8x1xf32> to vector<1x8x1xf32>
    tpu.vector_store %arg16[%c0_58, %c0_59, %c0_60], %96 {strides = array<i32>} : memref<1x8x1xf32, #tpu.memory_space<vmem>>, vector<1x8x1xf32>,
    return
  }
  func.func @transform_0(%arg0: i32, %arg1: i32) -> (i32, i32, i32) {
    %c1_i32 = arith.constant 1 : i32
    %0 = arith.muli %arg0, %c1_i32 : i32
    %1 = arith.addi %0, %arg1 : i32
    %c1_i32_0 = arith.constant 1 : i32
    %2 = arith.subi %1, %c1_i32_0 : i32
    %c0_i32 = arith.constant 0 : i32
    %3 = arith.maxsi %2, %c0_i32 : i32
    %c0_i32_1 = arith.constant 0 : i32
    %c8_i32 = arith.constant 8 : i32
    %c0_i32_2 = arith.constant 0 : i32
    return %3, %c0_i32_1, %c8_i32 : i32, i32, i32
  }
  func.func @transform_1(%arg0: i32, %arg1: i32) -> (i32, i32, i32) {
    %c1_i32 = arith.constant 1 : i32
    %0 = arith.muli %arg0, %c1_i32 : i32
    %1 = arith.addi %0, %arg1 : i32
    %c0_i32 = arith.constant 0 : i32
    %c0_i32_0 = arith.constant 0 : i32
    %c0_i32_1 = arith.constant 0 : i32
    return %1, %c0_i32, %c0_i32_0 : i32, i32, i32
  }
  func.func @transform_2(%arg0: i32, %arg1: i32) -> (i32, i32, i32) {
    %c1_i32 = arith.constant 1 : i32
    %0 = arith.muli %arg0, %c1_i32 : i32
    %1 = arith.addi %0, %arg1 : i32
    %c1_i32_0 = arith.constant 1 : i32
    %2 = arith.addi %1, %c1_i32_0 : i32
    %c0_i32 = arith.constant 0 : i32
    %3 = arith.minsi %2, %c0_i32 : i32
    %c0_i32_1 = arith.constant 0 : i32
    %c0_i32_2 = arith.constant 0 : i32
    %c0_i32_3 = arith.constant 0 : i32
    return %3, %c0_i32_1, %c0_i32_2 : i32, i32, i32
  }
  func.func @transform_3(%arg0: i32, %arg1: i32) -> (i32, i32, i32) {
    %c1_i32 = arith.constant 1 : i32
    %0 = arith.muli %arg0, %c1_i32 : i32
    %1 = arith.addi %0, %arg1 : i32
    %c1_i32_0 = arith.constant 1 : i32
    %2 = arith.subi %1, %c1_i32_0 : i32
    %c0_i32 = arith.constant 0 : i32
    %3 = arith.maxsi %2, %c0_i32 : i32
    %c0_i32_1 = arith.constant 0 : i32
    %c8_i32 = arith.constant 8 : i32
    %c0_i32_2 = arith.constant 0 : i32
    return %3, %c0_i32_1, %c8_i32 : i32, i32, i32
  }
  func.func @transform_4(%arg0: i32, %arg1: i32) -> (i32, i32, i32) {
    %c1_i32 = arith.constant 1 : i32
    %0 = arith.muli %arg0, %c1_i32 : i32
    %1 = arith.addi %0, %arg1 : i32
    %c0_i32 = arith.constant 0 : i32
    %c0_i32_0 = arith.constant 0 : i32
    %c0_i32_1 = arith.constant 0 : i32
    return %1, %c0_i32, %c0_i32_0 : i32, i32, i32
  }
  func.func @transform_5(%arg0: i32, %arg1: i32) -> (i32, i32, i32) {
    %c1_i32 = arith.constant 1 : i32
    %0 = arith.muli %arg0, %c1_i32 : i32
    %1 = arith.addi %0, %arg1 : i32
    %c1_i32_0 = arith.constant 1 : i32
    %2 = arith.addi %1, %c1_i32_0 : i32
    %c0_i32 = arith.constant 0 : i32
    %3 = arith.minsi %2, %c0_i32 : i32
    %c0_i32_1 = arith.constant 0 : i32
    %c0_i32_2 = arith.constant 0 : i32
    %c0_i32_3 = arith.constant 0 : i32
    return %3, %c0_i32_1, %c0_i32_2 : i32, i32, i32
  }
  func.func @transform_6(%arg0: i32, %arg1: i32) -> (i32, i32) {
    %c0_i32 = arith.constant 0 : i32
    %c0_i32_0 = arith.constant 0 : i32
    %c0_i32_1 = arith.constant 0 : i32
    return %c0_i32, %c0_i32_0 : i32, i32
  }
  func.func @transform_7(%arg0: i32, %arg1: i32) -> (i32, i32) {
    %c0_i32 = arith.constant 0 : i32
    %c0_i32_0 = arith.constant 0 : i32
    %c0_i32_1 = arith.constant 0 : i32
    return %c0_i32, %c0_i32_0 : i32, i32
  }
  func.func @transform_8(%arg0: i32, %arg1: i32) -> (i32, i32, i32) {
    %c0_i32 = arith.constant 0 : i32
    %c0_i32_0 = arith.constant 0 : i32
    %c0_i32_1 = arith.constant 0 : i32
    %c0_i32_2 = arith.constant 0 : i32
    return %c0_i32, %c0_i32_0, %c0_i32_1 : i32, i32, i32
  }
  func.func @transform_9(%arg0: i32, %arg1: i32) -> (i32, i32, i32) {
    %c0_i32 = arith.constant 0 : i32
    %c0_i32_0 = arith.constant 0 : i32
    %c0_i32_1 = arith.constant 0 : i32
    %c0_i32_2 = arith.constant 0 : i32
    return %c0_i32, %c0_i32_0, %c0_i32_1 : i32, i32, i32
  }
  func.func @transform_10(%arg0: i32, %arg1: i32) -> (i32, i32) {
    %c0_i32 = arith.constant 0 : i32
    %c0_i32_0 = arith.constant 0 : i32
    %c0_i32_1 = arith.constant 0 : i32
    return %c0_i32, %c0_i32_0 : i32, i32
  }
  func.func @transform_11(%arg0: i32, %arg1: i32) -> (i32, i32) {
    %c0_i32 = arith.constant 0 : i32
    %c0_i32_0 = arith.constant 0 : i32
    %c0_i32_1 = arith.constant 0 : i32
    return %c0_i32, %c0_i32_0 : i32, i32
  }
  func.func @transform_12(%arg0: i32, %arg1: i32) -> (i32, i32, i32) {
    %c1_i32 = arith.constant 1 : i32
    %0 = arith.muli %arg0, %c1_i32 : i32
    %1 = arith.addi %0, %arg1 : i32
    %c0_i32 = arith.constant 0 : i32
    %c0_i32_0 = arith.constant 0 : i32
    %c0_i32_1 = arith.constant 0 : i32
    return %1, %c0_i32, %c0_i32_0 : i32, i32, i32
  }
  func.func @transform_13(%arg0: i32, %arg1: i32) -> (i32, i32, i32) {
    %c0_i32 = arith.constant 0 : i32
    %c0_i32_0 = arith.constant 0 : i32
    %c0_i32_1 = arith.constant 0 : i32
    return %arg0, %c0_i32, %c0_i32_0 : i32, i32, i32
  }
  func.func @transform_14(%arg0: i32, %arg1: i32) -> (i32, i32, i32) {
    %c0_i32 = arith.constant 0 : i32
    %c0_i32_0 = arith.constant 0 : i32
    %c0_i32_1 = arith.constant 0 : i32
    return %arg0, %c0_i32, %c0_i32_0 : i32, i32, i32
  }
}

module attributes {stable_mosaic.version = 11 : i64} {
  func.func @_dw_stage_kernel(%arg0: i32, %arg1: i32, %arg2: memref<1x8x128xf32, #tpu.memory_space<vmem>>, %arg3: memref<1x8x1152xf32, #tpu.memory_space<vmem>>, %arg4: memref<1x8x128xf32, #tpu.memory_space<vmem>>, %arg5: memref<1x1x128xf32, #tpu.memory_space<vmem>>, %arg6: memref<1x1x1152xf32, #tpu.memory_space<vmem>>, %arg7: memref<1x1x128xf32, #tpu.memory_space<vmem>>, %arg8: memref<8x5xf32, #tpu.memory_space<vmem>>, %arg9: memref<8x1xf32, #tpu.memory_space<vmem>>, %arg10: memref<1x8x1xf32, #tpu.memory_space<vmem>>, %arg11: memref<1x8x1xf32, #tpu.memory_space<vmem>>, %arg12: memref<8x1xf32, #tpu.memory_space<vmem>>, %arg13: memref<8x1xf32, #tpu.memory_space<vmem>>, %arg14: memref<1x8x1152xf32, #tpu.memory_space<vmem>>, %arg15: memref<1x8x1xf32, #tpu.memory_space<vmem>>, %arg16: memref<1x8x1xf32, #tpu.memory_space<vmem>>) attributes {dimension_semantics = [#tpu.dimension_semantics<parallel>, #tpu.dimension_semantics<arbitrary>], iteration_bounds = array<i64: 1, 1>, scalar_prefetch = 0 : i64, scratch_operands = 0 : i64, tpu.core_type = #tpu.core_type<tc>, window_params = [{transform_indices = @transform_0, window_bounds = array<i64: 1, 8, 128>}, {transform_indices = @transform_1, window_bounds = array<i64: 1, 8, 1152>}, {transform_indices = @transform_2, window_bounds = array<i64: 1, 8, 128>}, {transform_indices = @transform_3, window_bounds = array<i64: 1, 1, 128>}, {transform_indices = @transform_4, window_bounds = array<i64: 1, 1, 1152>}, {transform_indices = @transform_5, window_bounds = array<i64: 1, 1, 128>}, {pipeline_mode = #tpu.pipeline_mode<synchronous>, transform_indices = @transform_6, window_bounds = array<i64: 8, 5>}, {pipeline_mode = #tpu.pipeline_mode<synchronous>, transform_indices = @transform_7, window_bounds = array<i64: 8, 1>}, {pipeline_mode = #tpu.pipeline_mode<synchronous>, transform_indices = @transform_8, window_bounds = array<i64: 1, 8, 1>}, {pipeline_mode = #tpu.pipeline_mode<synchronous>, transform_indices = @transform_9, window_bounds = array<i64: 1, 8, 1>}, {pipeline_mode = #tpu.pipeline_mode<synchronous>, transform_indices = @transform_10, window_bounds = array<i64: 8, 1>}, {pipeline_mode = #tpu.pipeline_mode<synchronous>, transform_indices = @transform_11, window_bounds = array<i64: 8, 1>}, {transform_indices = @transform_12, window_bounds = array<i64: 1, 8, 1152>}, {transform_indices = @transform_13, window_bounds = array<i64: 1, 8, 1>}, {transform_indices = @transform_14, window_bounds = array<i64: 1, 8, 1>}]} {
    %c0 = arith.constant 0 : index
    %c0_0 = arith.constant 0 : index
    %c0_1 = arith.constant 0 : index
    %0 = vector.load %arg2[%c0, %c0_0, %c0_1] : memref<1x8x128xf32, #tpu.memory_space<vmem>>, vector<1x8x128xf32>
    %1 = vector.shape_cast %0 : vector<1x8x128xf32> to vector<8x128xf32>
    %c0_2 = arith.constant 0 : index
    %c0_3 = arith.constant 0 : index
    %c0_4 = arith.constant 0 : index
    %2 = vector.load %arg3[%c0_2, %c0_3, %c0_4] : memref<1x8x1152xf32, #tpu.memory_space<vmem>>, vector<1x8x1152xf32>
    %3 = vector.shape_cast %2 : vector<1x8x1152xf32> to vector<8x1152xf32>
    %c0_5 = arith.constant 0 : index
    %c0_6 = arith.constant 0 : index
    %c0_7 = arith.constant 0 : index
    %4 = vector.load %arg4[%c0_5, %c0_6, %c0_7] : memref<1x8x128xf32, #tpu.memory_space<vmem>>, vector<1x8x128xf32>
    %5 = vector.shape_cast %4 : vector<1x8x128xf32> to vector<8x128xf32>
    %6 = tpu.concatenate %1, %3, %5 in 1 : vector<8x128xf32>, vector<8x1152xf32>, vector<8x128xf32> -> vector<8x1408xf32>
    %c0_8 = arith.constant 0 : index
    %c0_9 = arith.constant 0 : index
    %c0_10 = arith.constant 0 : index
    %7 = vector.load %arg5[%c0_8, %c0_9, %c0_10] : memref<1x1x128xf32, #tpu.memory_space<vmem>>, vector<1x1x128xf32>
    %8 = vector.shape_cast %7 : vector<1x1x128xf32> to vector<1x128xf32>
    %c0_11 = arith.constant 0 : index
    %c0_12 = arith.constant 0 : index
    %c0_13 = arith.constant 0 : index
    %9 = vector.load %arg6[%c0_11, %c0_12, %c0_13] : memref<1x1x1152xf32, #tpu.memory_space<vmem>>, vector<1x1x1152xf32>
    %10 = vector.shape_cast %9 : vector<1x1x1152xf32> to vector<1x1152xf32>
    %c0_14 = arith.constant 0 : index
    %c0_15 = arith.constant 0 : index
    %c0_16 = arith.constant 0 : index
    %11 = vector.load %arg7[%c0_14, %c0_15, %c0_16] : memref<1x1x128xf32, #tpu.memory_space<vmem>>, vector<1x1x128xf32>
    %12 = vector.shape_cast %11 : vector<1x1x128xf32> to vector<1x128xf32>
    %13 = tpu.concatenate %8, %10, %12 in 1 : vector<1x128xf32>, vector<1x1152xf32>, vector<1x128xf32> -> vector<1x1408xf32>
    %c0_17 = arith.constant 0 : index
    %c0_18 = arith.constant 0 : index
    %c0_19 = arith.constant 0 : index
    %14 = vector.load %arg10[%c0_17, %c0_18, %c0_19] : memref<1x8x1xf32, #tpu.memory_space<vmem>>, vector<1x8x1xf32>
    %15 = vector.shape_cast %14 : vector<1x8x1xf32> to vector<8x1xf32>
    %c0_20 = arith.constant 0 : index
    %c0_21 = arith.constant 0 : index
    %c0_22 = arith.constant 0 : index
    %16 = vector.load %arg11[%c0_20, %c0_21, %c0_22] : memref<1x8x1xf32, #tpu.memory_space<vmem>>, vector<1x8x1xf32>
    %17 = vector.shape_cast %16 : vector<1x8x1xf32> to vector<8x1xf32>
    %cst = arith.constant 0.001953125 : f32
    %18 = vector.broadcast %cst : f32 to vector<8x1xf32>
    %19 = arith.mulf %15, %18 : vector<8x1xf32>
    %cst_23 = arith.constant 0.001953125 : f32
    %20 = vector.broadcast %cst_23 : f32 to vector<8x1xf32>
    %21 = arith.mulf %17, %20 : vector<8x1xf32>
    %22 = arith.mulf %19, %19 : vector<8x1xf32>
    %23 = arith.subf %21, %22 : vector<8x1xf32>
    %cst_24 = arith.constant 0.000000e+00 : f32
    %24 = vector.broadcast %cst_24 : f32 to vector<8x1xf32>
    %25 = arith.maximumf %23, %24 : vector<8x1xf32>
    %c0_25 = arith.constant 0 : index
    %c0_26 = arith.constant 0 : index
    %26 = vector.load %arg12[%c0_25, %c0_26] : memref<8x1xf32, #tpu.memory_space<vmem>>, vector<8x1xf32>
    %cst_27 = arith.constant 9.99999974E-6 : f32
    %27 = vector.broadcast %cst_27 : f32 to vector<8x1xf32>
    %28 = arith.addf %25, %27 : vector<8x1xf32>
    %29 = math.rsqrt %28 : vector<8x1xf32>
    %30 = arith.mulf %26, %29 : vector<8x1xf32>
    %c0_28 = arith.constant 0 : index
    %c0_29 = arith.constant 0 : index
    %31 = vector.load %arg13[%c0_28, %c0_29] : memref<8x1xf32, #tpu.memory_space<vmem>>, vector<8x1xf32>
    %32 = arith.mulf %19, %30 : vector<8x1xf32>
    %33 = arith.subf %31, %32 : vector<8x1xf32>
    %cst_30 = arith.constant 5.000000e-01 : f32
    %34 = vector.broadcast %cst_30 : f32 to vector<1x1408xf32>
    %35 = arith.cmpf ogt, %13, %34 : vector<1x1408xf32>
    %36 = vector.broadcast %30 : vector<8x1xf32> to vector<8x1408xf32>
    %37 = arith.mulf %6, %36 : vector<8x1408xf32>
    %38 = vector.broadcast %33 : vector<8x1xf32> to vector<8x1408xf32>
    %39 = arith.addf %37, %38 : vector<8x1408xf32>
    %cst_31 = arith.constant 0.000000e+00 : f32
    %40 = vector.shape_cast %35 : vector<1x1408xi1> to vector<1x1408xi1>
    %41 = vector.broadcast %40 : vector<1x1408xi1> to vector<8x1408xi1>
    %42 = vector.broadcast %cst_31 : f32 to vector<8x1408xf32>
    %43 = arith.select %41, %39, %42 : vector<8x1408xi1>, vector<8x1408xf32>
    %c0_32 = arith.constant 0 : index
    %c0_33 = arith.constant 0 : index
    %44 = vector.load %arg8[%c0_32, %c0_33] : memref<8x5xf32, #tpu.memory_space<vmem>>, vector<8x5xf32>
    %cst_34 = arith.constant 0.000000e+00 : f32
    %45 = vector.broadcast %cst_34 : f32 to vector<8x1152xf32>
    %46 = vector.extract_strided_slice %44 {offsets = [0, 0], sizes = [8, 1], strides = [1, 1]} : vector<8x5xf32> to vector<8x1xf32>
    %47 = vector.extract_strided_slice %43 {offsets = [0, 124], sizes = [8, 1152], strides = [1, 1]} : vector<8x1408xf32> to vector<8x1152xf32>
    %48 = vector.broadcast %46 : vector<8x1xf32> to vector<8x1152xf32>
    %49 = arith.mulf %48, %47 : vector<8x1152xf32>
    %50 = arith.addf %45, %49 : vector<8x1152xf32>
    %51 = vector.extract_strided_slice %44 {offsets = [0, 1], sizes = [8, 1], strides = [1, 1]} : vector<8x5xf32> to vector<8x1xf32>
    %52 = vector.extract_strided_slice %43 {offsets = [0, 126], sizes = [8, 1152], strides = [1, 1]} : vector<8x1408xf32> to vector<8x1152xf32>
    %53 = vector.broadcast %51 : vector<8x1xf32> to vector<8x1152xf32>
    %54 = arith.mulf %53, %52 : vector<8x1152xf32>
    %55 = arith.addf %50, %54 : vector<8x1152xf32>
    %56 = vector.extract_strided_slice %44 {offsets = [0, 2], sizes = [8, 1], strides = [1, 1]} : vector<8x5xf32> to vector<8x1xf32>
    %57 = vector.extract_strided_slice %43 {offsets = [0, 128], sizes = [8, 1152], strides = [1, 1]} : vector<8x1408xf32> to vector<8x1152xf32>
    %58 = vector.broadcast %56 : vector<8x1xf32> to vector<8x1152xf32>
    %59 = arith.mulf %58, %57 : vector<8x1152xf32>
    %60 = arith.addf %55, %59 : vector<8x1152xf32>
    %61 = vector.extract_strided_slice %44 {offsets = [0, 3], sizes = [8, 1], strides = [1, 1]} : vector<8x5xf32> to vector<8x1xf32>
    %62 = vector.extract_strided_slice %43 {offsets = [0, 130], sizes = [8, 1152], strides = [1, 1]} : vector<8x1408xf32> to vector<8x1152xf32>
    %63 = vector.broadcast %61 : vector<8x1xf32> to vector<8x1152xf32>
    %64 = arith.mulf %63, %62 : vector<8x1152xf32>
    %65 = arith.addf %60, %64 : vector<8x1152xf32>
    %66 = vector.extract_strided_slice %44 {offsets = [0, 4], sizes = [8, 1], strides = [1, 1]} : vector<8x5xf32> to vector<8x1xf32>
    %67 = vector.extract_strided_slice %43 {offsets = [0, 132], sizes = [8, 1152], strides = [1, 1]} : vector<8x1408xf32> to vector<8x1152xf32>
    %68 = vector.broadcast %66 : vector<8x1xf32> to vector<8x1152xf32>
    %69 = arith.mulf %68, %67 : vector<8x1152xf32>
    %70 = arith.addf %65, %69 : vector<8x1152xf32>
    %c0_35 = arith.constant 0 : index
    %c0_36 = arith.constant 0 : index
    %71 = vector.load %arg9[%c0_35, %c0_36] : memref<8x1xf32, #tpu.memory_space<vmem>>, vector<8x1xf32>
    %72 = vector.broadcast %71 : vector<8x1xf32> to vector<8x1152xf32>
    %73 = arith.addf %70, %72 : vector<8x1152xf32>
    %cst_37 = arith.constant 0.000000e+00 : f32
    %74 = vector.broadcast %cst_37 : f32 to vector<8x1152xf32>
    %75 = arith.maximumf %73, %74 : vector<8x1152xf32>
    %c0_38 = arith.constant 0 : index
    %c0_39 = arith.constant 0 : index
    %c0_40 = arith.constant 0 : index
    %76 = vector.load %arg14[%c0_38, %c0_39, %c0_40] : memref<1x8x1152xf32, #tpu.memory_space<vmem>>, vector<1x8x1152xf32>
    %77 = vector.shape_cast %76 : vector<1x8x1152xf32> to vector<8x1152xf32>
    %78 = vector.shape_cast %75 : vector<8x1152xf32> to vector<1x8x1152xf32>
    tpu.vector_store %arg14[%c0_38, %c0_39, %c0_40], %78 {strides = array<i32>} : memref<1x8x1152xf32, #tpu.memory_space<vmem>>, vector<1x8x1152xf32>,
    %c0_41 = arith.constant 0 : index
    %c0_42 = arith.constant 0 : index
    %c0_43 = arith.constant 0 : index
    %79 = vector.load %arg6[%c0_41, %c0_42, %c0_43] : memref<1x1x1152xf32, #tpu.memory_space<vmem>>, vector<1x1x1152xf32>
    %80 = vector.shape_cast %79 : vector<1x1x1152xf32> to vector<1x1152xf32>
    %cst_44 = arith.constant 5.000000e-01 : f32
    %81 = vector.broadcast %cst_44 : f32 to vector<1x1152xf32>
    %82 = arith.cmpf ogt, %80, %81 : vector<1x1152xf32>
    %cst_45 = arith.constant 0.000000e+00 : f32
    %83 = vector.shape_cast %82 : vector<1x1152xi1> to vector<1x1152xi1>
    %84 = vector.broadcast %83 : vector<1x1152xi1> to vector<8x1152xi1>
    %85 = vector.broadcast %cst_45 : f32 to vector<8x1152xf32>
    %86 = arith.select %84, %75, %85 : vector<8x1152xi1>, vector<8x1152xf32>
    %c0_i32 = arith.constant 0 : i32
    %87 = arith.cmpi eq, %arg1, %c0_i32 : i32
    %88 = arith.extui %87 : i1 to i32
    %c0_i32_46 = arith.constant 0 : i32
    %89 = arith.cmpi ne, %88, %c0_i32_46 : i32
    scf.if %89 {
      %cst_61 = arith.constant 0.000000e+00 : f32
      %107 = vector.broadcast %cst_61 : f32 to vector<1x8x1xf32>
      %c0_62 = arith.constant 0 : index
      %c0_63 = arith.constant 0 : index
      %c0_64 = arith.constant 0 : index
      %108 = vector.load %arg15[%c0_62, %c0_63, %c0_64] : memref<1x8x1xf32, #tpu.memory_space<vmem>>, vector<1x8x1xf32>
      tpu.vector_store %arg15[%c0_62, %c0_63, %c0_64], %107 {strides = array<i32>} : memref<1x8x1xf32, #tpu.memory_space<vmem>>, vector<1x8x1xf32>,
      %cst_65 = arith.constant 0.000000e+00 : f32
      %109 = vector.broadcast %cst_65 : f32 to vector<1x8x1xf32>
      %c0_66 = arith.constant 0 : index
      %c0_67 = arith.constant 0 : index
      %c0_68 = arith.constant 0 : index
      %110 = vector.load %arg16[%c0_66, %c0_67, %c0_68] : memref<1x8x1xf32, #tpu.memory_space<vmem>>, vector<1x8x1xf32>
      tpu.vector_store %arg16[%c0_66, %c0_67, %c0_68], %109 {strides = array<i32>} : memref<1x8x1xf32, #tpu.memory_space<vmem>>, vector<1x8x1xf32>,
    } else {
    }
    %c0_47 = arith.constant 0 : index
    %c0_48 = arith.constant 0 : index
    %c0_49 = arith.constant 0 : index
    %90 = vector.load %arg15[%c0_47, %c0_48, %c0_49] : memref<1x8x1xf32, #tpu.memory_space<vmem>>, vector<1x8x1xf32>
    %91 = vector.shape_cast %90 : vector<1x8x1xf32> to vector<8x1xf32>
    %cst_50 = arith.constant dense<0.000000e+00> : vector<8xf32>
    %92 = vector.multi_reduction <add>, %86, %cst_50 [1] : vector<8x1152xf32> to vector<8xf32>
    %93 = vector.shape_cast %92 : vector<8xf32> to vector<8x1xf32>
    %94 = arith.addf %91, %93 : vector<8x1xf32>
    %c0_51 = arith.constant 0 : index
    %c0_52 = arith.constant 0 : index
    %c0_53 = arith.constant 0 : index
    %95 = vector.load %arg15[%c0_51, %c0_52, %c0_53] : memref<1x8x1xf32, #tpu.memory_space<vmem>>, vector<1x8x1xf32>
    %96 = vector.shape_cast %95 : vector<1x8x1xf32> to vector<8x1xf32>
    %97 = vector.shape_cast %94 : vector<8x1xf32> to vector<1x8x1xf32>
    tpu.vector_store %arg15[%c0_51, %c0_52, %c0_53], %97 {strides = array<i32>} : memref<1x8x1xf32, #tpu.memory_space<vmem>>, vector<1x8x1xf32>,
    %c0_54 = arith.constant 0 : index
    %c0_55 = arith.constant 0 : index
    %c0_56 = arith.constant 0 : index
    %98 = vector.load %arg16[%c0_54, %c0_55, %c0_56] : memref<1x8x1xf32, #tpu.memory_space<vmem>>, vector<1x8x1xf32>
    %99 = vector.shape_cast %98 : vector<1x8x1xf32> to vector<8x1xf32>
    %100 = arith.mulf %86, %86 : vector<8x1152xf32>
    %cst_57 = arith.constant dense<0.000000e+00> : vector<8xf32>
    %101 = vector.multi_reduction <add>, %100, %cst_57 [1] : vector<8x1152xf32> to vector<8xf32>
    %102 = vector.shape_cast %101 : vector<8xf32> to vector<8x1xf32>
    %103 = arith.addf %99, %102 : vector<8x1xf32>
    %c0_58 = arith.constant 0 : index
    %c0_59 = arith.constant 0 : index
    %c0_60 = arith.constant 0 : index
    %104 = vector.load %arg16[%c0_58, %c0_59, %c0_60] : memref<1x8x1xf32, #tpu.memory_space<vmem>>, vector<1x8x1xf32>
    %105 = vector.shape_cast %104 : vector<1x8x1xf32> to vector<8x1xf32>
    %106 = vector.shape_cast %103 : vector<8x1xf32> to vector<1x8x1xf32>
    tpu.vector_store %arg16[%c0_58, %c0_59, %c0_60], %106 {strides = array<i32>} : memref<1x8x1xf32, #tpu.memory_space<vmem>>, vector<1x8x1xf32>,
    return
  }
  func.func @transform_0(%arg0: i32, %arg1: i32) -> (i32, i32, i32) {
    %c1_i32 = arith.constant 1 : i32
    %0 = arith.muli %arg0, %c1_i32 : i32
    %1 = arith.addi %0, %arg1 : i32
    %c1_i32_0 = arith.constant 1 : i32
    %2 = arith.subi %1, %c1_i32_0 : i32
    %c0_i32 = arith.constant 0 : i32
    %3 = arith.maxsi %2, %c0_i32 : i32
    %c0_i32_1 = arith.constant 0 : i32
    %c8_i32 = arith.constant 8 : i32
    %c0_i32_2 = arith.constant 0 : i32
    return %3, %c0_i32_1, %c8_i32 : i32, i32, i32
  }
  func.func @transform_1(%arg0: i32, %arg1: i32) -> (i32, i32, i32) {
    %c1_i32 = arith.constant 1 : i32
    %0 = arith.muli %arg0, %c1_i32 : i32
    %1 = arith.addi %0, %arg1 : i32
    %c0_i32 = arith.constant 0 : i32
    %c0_i32_0 = arith.constant 0 : i32
    %c0_i32_1 = arith.constant 0 : i32
    return %1, %c0_i32, %c0_i32_0 : i32, i32, i32
  }
  func.func @transform_2(%arg0: i32, %arg1: i32) -> (i32, i32, i32) {
    %c1_i32 = arith.constant 1 : i32
    %0 = arith.muli %arg0, %c1_i32 : i32
    %1 = arith.addi %0, %arg1 : i32
    %c1_i32_0 = arith.constant 1 : i32
    %2 = arith.addi %1, %c1_i32_0 : i32
    %c0_i32 = arith.constant 0 : i32
    %3 = arith.minsi %2, %c0_i32 : i32
    %c0_i32_1 = arith.constant 0 : i32
    %c0_i32_2 = arith.constant 0 : i32
    %c0_i32_3 = arith.constant 0 : i32
    return %3, %c0_i32_1, %c0_i32_2 : i32, i32, i32
  }
  func.func @transform_3(%arg0: i32, %arg1: i32) -> (i32, i32, i32) {
    %c1_i32 = arith.constant 1 : i32
    %0 = arith.muli %arg0, %c1_i32 : i32
    %1 = arith.addi %0, %arg1 : i32
    %c1_i32_0 = arith.constant 1 : i32
    %2 = arith.subi %1, %c1_i32_0 : i32
    %c0_i32 = arith.constant 0 : i32
    %3 = arith.maxsi %2, %c0_i32 : i32
    %c0_i32_1 = arith.constant 0 : i32
    %c8_i32 = arith.constant 8 : i32
    %c0_i32_2 = arith.constant 0 : i32
    return %3, %c0_i32_1, %c8_i32 : i32, i32, i32
  }
  func.func @transform_4(%arg0: i32, %arg1: i32) -> (i32, i32, i32) {
    %c1_i32 = arith.constant 1 : i32
    %0 = arith.muli %arg0, %c1_i32 : i32
    %1 = arith.addi %0, %arg1 : i32
    %c0_i32 = arith.constant 0 : i32
    %c0_i32_0 = arith.constant 0 : i32
    %c0_i32_1 = arith.constant 0 : i32
    return %1, %c0_i32, %c0_i32_0 : i32, i32, i32
  }
  func.func @transform_5(%arg0: i32, %arg1: i32) -> (i32, i32, i32) {
    %c1_i32 = arith.constant 1 : i32
    %0 = arith.muli %arg0, %c1_i32 : i32
    %1 = arith.addi %0, %arg1 : i32
    %c1_i32_0 = arith.constant 1 : i32
    %2 = arith.addi %1, %c1_i32_0 : i32
    %c0_i32 = arith.constant 0 : i32
    %3 = arith.minsi %2, %c0_i32 : i32
    %c0_i32_1 = arith.constant 0 : i32
    %c0_i32_2 = arith.constant 0 : i32
    %c0_i32_3 = arith.constant 0 : i32
    return %3, %c0_i32_1, %c0_i32_2 : i32, i32, i32
  }
  func.func @transform_6(%arg0: i32, %arg1: i32) -> (i32, i32) {
    %c0_i32 = arith.constant 0 : i32
    %c0_i32_0 = arith.constant 0 : i32
    %c0_i32_1 = arith.constant 0 : i32
    return %c0_i32, %c0_i32_0 : i32, i32
  }
  func.func @transform_7(%arg0: i32, %arg1: i32) -> (i32, i32) {
    %c0_i32 = arith.constant 0 : i32
    %c0_i32_0 = arith.constant 0 : i32
    %c0_i32_1 = arith.constant 0 : i32
    return %c0_i32, %c0_i32_0 : i32, i32
  }
  func.func @transform_8(%arg0: i32, %arg1: i32) -> (i32, i32, i32) {
    %c0_i32 = arith.constant 0 : i32
    %c0_i32_0 = arith.constant 0 : i32
    %c0_i32_1 = arith.constant 0 : i32
    %c0_i32_2 = arith.constant 0 : i32
    return %c0_i32, %c0_i32_0, %c0_i32_1 : i32, i32, i32
  }
  func.func @transform_9(%arg0: i32, %arg1: i32) -> (i32, i32, i32) {
    %c0_i32 = arith.constant 0 : i32
    %c0_i32_0 = arith.constant 0 : i32
    %c0_i32_1 = arith.constant 0 : i32
    %c0_i32_2 = arith.constant 0 : i32
    return %c0_i32, %c0_i32_0, %c0_i32_1 : i32, i32, i32
  }
  func.func @transform_10(%arg0: i32, %arg1: i32) -> (i32, i32) {
    %c0_i32 = arith.constant 0 : i32
    %c0_i32_0 = arith.constant 0 : i32
    %c0_i32_1 = arith.constant 0 : i32
    return %c0_i32, %c0_i32_0 : i32, i32
  }
  func.func @transform_11(%arg0: i32, %arg1: i32) -> (i32, i32) {
    %c0_i32 = arith.constant 0 : i32
    %c0_i32_0 = arith.constant 0 : i32
    %c0_i32_1 = arith.constant 0 : i32
    return %c0_i32, %c0_i32_0 : i32, i32
  }
  func.func @transform_12(%arg0: i32, %arg1: i32) -> (i32, i32, i32) {
    %c1_i32 = arith.constant 1 : i32
    %0 = arith.muli %arg0, %c1_i32 : i32
    %1 = arith.addi %0, %arg1 : i32
    %c0_i32 = arith.constant 0 : i32
    %c0_i32_0 = arith.constant 0 : i32
    %c0_i32_1 = arith.constant 0 : i32
    return %1, %c0_i32, %c0_i32_0 : i32, i32, i32
  }
  func.func @transform_13(%arg0: i32, %arg1: i32) -> (i32, i32, i32) {
    %c0_i32 = arith.constant 0 : i32
    %c0_i32_0 = arith.constant 0 : i32
    %c0_i32_1 = arith.constant 0 : i32
    return %arg0, %c0_i32, %c0_i32_0 : i32, i32, i32
  }
  func.func @transform_14(%arg0: i32, %arg1: i32) -> (i32, i32, i32) {
    %c0_i32 = arith.constant 0 : i32
    %c0_i32_0 = arith.constant 0 : i32
    %c0_i32_1 = arith.constant 0 : i32
    return %arg0, %c0_i32, %c0_i32_0 : i32, i32, i32
  }
}

module attributes {stable_mosaic.version = 11 : i64} {
  func.func @_mul_stage_kernel(%arg0: i32, %arg1: i32, %arg2: memref<1x8x1152xf32, #tpu.memory_space<vmem>>, %arg3: memref<1x8x1152xf32, #tpu.memory_space<vmem>>, %arg4: memref<1x8x1xf32, #tpu.memory_space<vmem>>, %arg5: memref<1x8x1xf32, #tpu.memory_space<vmem>>, %arg6: memref<8x1xf32, #tpu.memory_space<vmem>>, %arg7: memref<8x1xf32, #tpu.memory_space<vmem>>, %arg8: memref<8x1152xf32, #tpu.memory_space<vmem>>, %arg9: memref<1x8x1xf32, #tpu.memory_space<vmem>>, %arg10: memref<1x8x1xf32, #tpu.memory_space<vmem>>) attributes {dimension_semantics = [#tpu.dimension_semantics<parallel>, #tpu.dimension_semantics<arbitrary>], iteration_bounds = array<i64: 1, 1>, scalar_prefetch = 0 : i64, scratch_operands = 0 : i64, tpu.core_type = #tpu.core_type<tc>, window_params = [{transform_indices = @transform_0, window_bounds = array<i64: 1, 8, 1152>}, {transform_indices = @transform_1, window_bounds = array<i64: 1, 8, 1152>}, {pipeline_mode = #tpu.pipeline_mode<synchronous>, transform_indices = @transform_2, window_bounds = array<i64: 1, 8, 1>}, {pipeline_mode = #tpu.pipeline_mode<synchronous>, transform_indices = @transform_3, window_bounds = array<i64: 1, 8, 1>}, {pipeline_mode = #tpu.pipeline_mode<synchronous>, transform_indices = @transform_4, window_bounds = array<i64: 8, 1>}, {pipeline_mode = #tpu.pipeline_mode<synchronous>, transform_indices = @transform_5, window_bounds = array<i64: 8, 1>}, {transform_indices = @transform_6, window_bounds = array<i64: 8, 1152>}, {transform_indices = @transform_7, window_bounds = array<i64: 1, 8, 1>}, {transform_indices = @transform_8, window_bounds = array<i64: 1, 8, 1>}]} {
    %c0 = arith.constant 0 : index
    %c0_0 = arith.constant 0 : index
    %c0_1 = arith.constant 0 : index
    %0 = vector.load %arg4[%c0, %c0_0, %c0_1] : memref<1x8x1xf32, #tpu.memory_space<vmem>>, vector<1x8x1xf32>
    %1 = vector.shape_cast %0 : vector<1x8x1xf32> to vector<8x1xf32>
    %c0_2 = arith.constant 0 : index
    %c0_3 = arith.constant 0 : index
    %c0_4 = arith.constant 0 : index
    %2 = vector.load %arg5[%c0_2, %c0_3, %c0_4] : memref<1x8x1xf32, #tpu.memory_space<vmem>>, vector<1x8x1xf32>
    %3 = vector.shape_cast %2 : vector<1x8x1xf32> to vector<8x1xf32>
    %cst = arith.constant 0.001953125 : f32
    %4 = vector.broadcast %cst : f32 to vector<8x1xf32>
    %5 = arith.mulf %1, %4 : vector<8x1xf32>
    %cst_5 = arith.constant 0.001953125 : f32
    %6 = vector.broadcast %cst_5 : f32 to vector<8x1xf32>
    %7 = arith.mulf %3, %6 : vector<8x1xf32>
    %8 = arith.mulf %5, %5 : vector<8x1xf32>
    %9 = arith.subf %7, %8 : vector<8x1xf32>
    %cst_6 = arith.constant 0.000000e+00 : f32
    %10 = vector.broadcast %cst_6 : f32 to vector<8x1xf32>
    %11 = arith.maximumf %9, %10 : vector<8x1xf32>
    %c0_7 = arith.constant 0 : index
    %c0_8 = arith.constant 0 : index
    %12 = vector.load %arg6[%c0_7, %c0_8] : memref<8x1xf32, #tpu.memory_space<vmem>>, vector<8x1xf32>
    %cst_9 = arith.constant 9.99999974E-6 : f32
    %13 = vector.broadcast %cst_9 : f32 to vector<8x1xf32>
    %14 = arith.addf %11, %13 : vector<8x1xf32>
    %15 = math.rsqrt %14 : vector<8x1xf32>
    %16 = arith.mulf %12, %15 : vector<8x1xf32>
    %c0_10 = arith.constant 0 : index
    %c0_11 = arith.constant 0 : index
    %17 = vector.load %arg7[%c0_10, %c0_11] : memref<8x1xf32, #tpu.memory_space<vmem>>, vector<8x1xf32>
    %18 = arith.mulf %5, %16 : vector<8x1xf32>
    %19 = arith.subf %17, %18 : vector<8x1xf32>
    %c0_12 = arith.constant 0 : index
    %c0_13 = arith.constant 0 : index
    %c0_14 = arith.constant 0 : index
    %20 = vector.load %arg3[%c0_12, %c0_13, %c0_14] : memref<1x8x1152xf32, #tpu.memory_space<vmem>>, vector<1x8x1152xf32>
    %21 = vector.shape_cast %20 : vector<1x8x1152xf32> to vector<8x1152xf32>
    %22 = vector.broadcast %16 : vector<8x1xf32> to vector<8x1152xf32>
    %23 = arith.mulf %21, %22 : vector<8x1152xf32>
    %24 = vector.broadcast %19 : vector<8x1xf32> to vector<8x1152xf32>
    %25 = arith.addf %23, %24 : vector<8x1152xf32>
    %c0_15 = arith.constant 0 : index
    %c0_16 = arith.constant 0 : index
    %c0_17 = arith.constant 0 : index
    %26 = vector.load %arg2[%c0_15, %c0_16, %c0_17] : memref<1x8x1152xf32, #tpu.memory_space<vmem>>, vector<1x8x1152xf32>
    %27 = vector.shape_cast %26 : vector<1x8x1152xf32> to vector<8x1152xf32>
    %28 = arith.mulf %27, %25 : vector<8x1152xf32>
    %cst_18 = arith.constant 0.000000e+00 : f32
    %29 = vector.broadcast %cst_18 : f32 to vector<8x1152xf32>
    %30 = arith.maximumf %28, %29 : vector<8x1152xf32>
    %c0_19 = arith.constant 0 : index
    %c0_20 = arith.constant 0 : index
    %31 = vector.load %arg8[%c0_19, %c0_20] : memref<8x1152xf32, #tpu.memory_space<vmem>>, vector<8x1152xf32>
    tpu.vector_store %arg8[%c0_19, %c0_20], %30 {strides = array<i32>} : memref<8x1152xf32, #tpu.memory_space<vmem>>, vector<8x1152xf32>,
    %c0_i32 = arith.constant 0 : i32
    %32 = arith.cmpi eq, %arg1, %c0_i32 : i32
    %33 = arith.extui %32 : i1 to i32
    %c0_i32_21 = arith.constant 0 : i32
    %34 = arith.cmpi ne, %33, %c0_i32_21 : i32
    scf.if %34 {
      %cst_36 = arith.constant 0.000000e+00 : f32
      %52 = vector.broadcast %cst_36 : f32 to vector<1x8x1xf32>
      %c0_37 = arith.constant 0 : index
      %c0_38 = arith.constant 0 : index
      %c0_39 = arith.constant 0 : index
      %53 = vector.load %arg9[%c0_37, %c0_38, %c0_39] : memref<1x8x1xf32, #tpu.memory_space<vmem>>, vector<1x8x1xf32>
      tpu.vector_store %arg9[%c0_37, %c0_38, %c0_39], %52 {strides = array<i32>} : memref<1x8x1xf32, #tpu.memory_space<vmem>>, vector<1x8x1xf32>,
      %cst_40 = arith.constant 0.000000e+00 : f32
      %54 = vector.broadcast %cst_40 : f32 to vector<1x8x1xf32>
      %c0_41 = arith.constant 0 : index
      %c0_42 = arith.constant 0 : index
      %c0_43 = arith.constant 0 : index
      %55 = vector.load %arg10[%c0_41, %c0_42, %c0_43] : memref<1x8x1xf32, #tpu.memory_space<vmem>>, vector<1x8x1xf32>
      tpu.vector_store %arg10[%c0_41, %c0_42, %c0_43], %54 {strides = array<i32>} : memref<1x8x1xf32, #tpu.memory_space<vmem>>, vector<1x8x1xf32>,
    } else {
    }
    %c0_22 = arith.constant 0 : index
    %c0_23 = arith.constant 0 : index
    %c0_24 = arith.constant 0 : index
    %35 = vector.load %arg9[%c0_22, %c0_23, %c0_24] : memref<1x8x1xf32, #tpu.memory_space<vmem>>, vector<1x8x1xf32>
    %36 = vector.shape_cast %35 : vector<1x8x1xf32> to vector<8x1xf32>
    %cst_25 = arith.constant dense<0.000000e+00> : vector<8xf32>
    %37 = vector.multi_reduction <add>, %30, %cst_25 [1] : vector<8x1152xf32> to vector<8xf32>
    %38 = vector.shape_cast %37 : vector<8xf32> to vector<8x1xf32>
    %39 = arith.addf %36, %38 : vector<8x1xf32>
    %c0_26 = arith.constant 0 : index
    %c0_27 = arith.constant 0 : index
    %c0_28 = arith.constant 0 : index
    %40 = vector.load %arg9[%c0_26, %c0_27, %c0_28] : memref<1x8x1xf32, #tpu.memory_space<vmem>>, vector<1x8x1xf32>
    %41 = vector.shape_cast %40 : vector<1x8x1xf32> to vector<8x1xf32>
    %42 = vector.shape_cast %39 : vector<8x1xf32> to vector<1x8x1xf32>
    tpu.vector_store %arg9[%c0_26, %c0_27, %c0_28], %42 {strides = array<i32>} : memref<1x8x1xf32, #tpu.memory_space<vmem>>, vector<1x8x1xf32>,
    %c0_29 = arith.constant 0 : index
    %c0_30 = arith.constant 0 : index
    %c0_31 = arith.constant 0 : index
    %43 = vector.load %arg10[%c0_29, %c0_30, %c0_31] : memref<1x8x1xf32, #tpu.memory_space<vmem>>, vector<1x8x1xf32>
    %44 = vector.shape_cast %43 : vector<1x8x1xf32> to vector<8x1xf32>
    %45 = arith.mulf %30, %30 : vector<8x1152xf32>
    %cst_32 = arith.constant dense<0.000000e+00> : vector<8xf32>
    %46 = vector.multi_reduction <add>, %45, %cst_32 [1] : vector<8x1152xf32> to vector<8xf32>
    %47 = vector.shape_cast %46 : vector<8xf32> to vector<8x1xf32>
    %48 = arith.addf %44, %47 : vector<8x1xf32>
    %c0_33 = arith.constant 0 : index
    %c0_34 = arith.constant 0 : index
    %c0_35 = arith.constant 0 : index
    %49 = vector.load %arg10[%c0_33, %c0_34, %c0_35] : memref<1x8x1xf32, #tpu.memory_space<vmem>>, vector<1x8x1xf32>
    %50 = vector.shape_cast %49 : vector<1x8x1xf32> to vector<8x1xf32>
    %51 = vector.shape_cast %48 : vector<8x1xf32> to vector<1x8x1xf32>
    tpu.vector_store %arg10[%c0_33, %c0_34, %c0_35], %51 {strides = array<i32>} : memref<1x8x1xf32, #tpu.memory_space<vmem>>, vector<1x8x1xf32>,
    return
  }
  func.func @transform_0(%arg0: i32, %arg1: i32) -> (i32, i32, i32) {
    %c1_i32 = arith.constant 1 : i32
    %0 = arith.muli %arg0, %c1_i32 : i32
    %1 = arith.addi %0, %arg1 : i32
    %c0_i32 = arith.constant 0 : i32
    %c0_i32_0 = arith.constant 0 : i32
    %c0_i32_1 = arith.constant 0 : i32
    return %1, %c0_i32, %c0_i32_0 : i32, i32, i32
  }
  func.func @transform_1(%arg0: i32, %arg1: i32) -> (i32, i32, i32) {
    %c1_i32 = arith.constant 1 : i32
    %0 = arith.muli %arg0, %c1_i32 : i32
    %1 = arith.addi %0, %arg1 : i32
    %c0_i32 = arith.constant 0 : i32
    %c0_i32_0 = arith.constant 0 : i32
    %c0_i32_1 = arith.constant 0 : i32
    return %1, %c0_i32, %c0_i32_0 : i32, i32, i32
  }
  func.func @transform_2(%arg0: i32, %arg1: i32) -> (i32, i32, i32) {
    %c0_i32 = arith.constant 0 : i32
    %c0_i32_0 = arith.constant 0 : i32
    %c0_i32_1 = arith.constant 0 : i32
    %c0_i32_2 = arith.constant 0 : i32
    return %c0_i32, %c0_i32_0, %c0_i32_1 : i32, i32, i32
  }
  func.func @transform_3(%arg0: i32, %arg1: i32) -> (i32, i32, i32) {
    %c0_i32 = arith.constant 0 : i32
    %c0_i32_0 = arith.constant 0 : i32
    %c0_i32_1 = arith.constant 0 : i32
    %c0_i32_2 = arith.constant 0 : i32
    return %c0_i32, %c0_i32_0, %c0_i32_1 : i32, i32, i32
  }
  func.func @transform_4(%arg0: i32, %arg1: i32) -> (i32, i32) {
    %c0_i32 = arith.constant 0 : i32
    %c0_i32_0 = arith.constant 0 : i32
    %c0_i32_1 = arith.constant 0 : i32
    return %c0_i32, %c0_i32_0 : i32, i32
  }
  func.func @transform_5(%arg0: i32, %arg1: i32) -> (i32, i32) {
    %c0_i32 = arith.constant 0 : i32
    %c0_i32_0 = arith.constant 0 : i32
    %c0_i32_1 = arith.constant 0 : i32
    return %c0_i32, %c0_i32_0 : i32, i32
  }
  func.func @transform_6(%arg0: i32, %arg1: i32) -> (i32, i32) {
    %c1_i32 = arith.constant 1 : i32
    %0 = arith.muli %arg0, %c1_i32 : i32
    %1 = arith.addi %0, %arg1 : i32
    %c0_i32 = arith.constant 0 : i32
    %c0_i32_0 = arith.constant 0 : i32
    return %c0_i32, %1 : i32, i32
  }
  func.func @transform_7(%arg0: i32, %arg1: i32) -> (i32, i32, i32) {
    %c0_i32 = arith.constant 0 : i32
    %c0_i32_0 = arith.constant 0 : i32
    %c0_i32_1 = arith.constant 0 : i32
    return %arg0, %c0_i32, %c0_i32_0 : i32, i32, i32
  }
  func.func @transform_8(%arg0: i32, %arg1: i32) -> (i32, i32, i32) {
    %c0_i32 = arith.constant 0 : i32
    %c0_i32_0 = arith.constant 0 : i32
    %c0_i32_1 = arith.constant 0 : i32
    return %arg0, %c0_i32, %c0_i32_0 : i32, i32, i32
  }
}

module attributes {stable_mosaic.version = 11 : i64} {
  func.func @_pw_stage_kernel(%arg0: i32, %arg1: i32, %arg2: memref<1x8x1152xf32, #tpu.memory_space<vmem>>, %arg3: memref<1x1x1152xf32, #tpu.memory_space<vmem>>, %arg4: memref<8x8xf32, #tpu.memory_space<vmem>>, %arg5: memref<8x1xf32, #tpu.memory_space<vmem>>, %arg6: memref<1x8x1xf32, #tpu.memory_space<vmem>>, %arg7: memref<1x8x1xf32, #tpu.memory_space<vmem>>, %arg8: memref<8x1xf32, #tpu.memory_space<vmem>>, %arg9: memref<8x1xf32, #tpu.memory_space<vmem>>, %arg10: memref<1x8x1152xf32, #tpu.memory_space<vmem>>, %arg11: memref<1x8x1xf32, #tpu.memory_space<vmem>>, %arg12: memref<1x8x1xf32, #tpu.memory_space<vmem>>) attributes {dimension_semantics = [#tpu.dimension_semantics<parallel>, #tpu.dimension_semantics<arbitrary>], iteration_bounds = array<i64: 1, 1>, scalar_prefetch = 0 : i64, scratch_operands = 0 : i64, tpu.core_type = #tpu.core_type<tc>, window_params = [{transform_indices = @transform_0, window_bounds = array<i64: 1, 8, 1152>}, {transform_indices = @transform_1, window_bounds = array<i64: 1, 1, 1152>}, {pipeline_mode = #tpu.pipeline_mode<synchronous>, transform_indices = @transform_2, window_bounds = array<i64: 8, 8>}, {pipeline_mode = #tpu.pipeline_mode<synchronous>, transform_indices = @transform_3, window_bounds = array<i64: 8, 1>}, {pipeline_mode = #tpu.pipeline_mode<synchronous>, transform_indices = @transform_4, window_bounds = array<i64: 1, 8, 1>}, {pipeline_mode = #tpu.pipeline_mode<synchronous>, transform_indices = @transform_5, window_bounds = array<i64: 1, 8, 1>}, {pipeline_mode = #tpu.pipeline_mode<synchronous>, transform_indices = @transform_6, window_bounds = array<i64: 8, 1>}, {pipeline_mode = #tpu.pipeline_mode<synchronous>, transform_indices = @transform_7, window_bounds = array<i64: 8, 1>}, {transform_indices = @transform_8, window_bounds = array<i64: 1, 8, 1152>}, {transform_indices = @transform_9, window_bounds = array<i64: 1, 8, 1>}, {transform_indices = @transform_10, window_bounds = array<i64: 1, 8, 1>}]} {
    %c0 = arith.constant 0 : index
    %c0_0 = arith.constant 0 : index
    %c0_1 = arith.constant 0 : index
    %0 = vector.load %arg6[%c0, %c0_0, %c0_1] : memref<1x8x1xf32, #tpu.memory_space<vmem>>, vector<1x8x1xf32>
    %1 = vector.shape_cast %0 : vector<1x8x1xf32> to vector<8x1xf32>
    %c0_2 = arith.constant 0 : index
    %c0_3 = arith.constant 0 : index
    %c0_4 = arith.constant 0 : index
    %2 = vector.load %arg7[%c0_2, %c0_3, %c0_4] : memref<1x8x1xf32, #tpu.memory_space<vmem>>, vector<1x8x1xf32>
    %3 = vector.shape_cast %2 : vector<1x8x1xf32> to vector<8x1xf32>
    %cst = arith.constant 0.001953125 : f32
    %4 = vector.broadcast %cst : f32 to vector<8x1xf32>
    %5 = arith.mulf %1, %4 : vector<8x1xf32>
    %cst_5 = arith.constant 0.001953125 : f32
    %6 = vector.broadcast %cst_5 : f32 to vector<8x1xf32>
    %7 = arith.mulf %3, %6 : vector<8x1xf32>
    %8 = arith.mulf %5, %5 : vector<8x1xf32>
    %9 = arith.subf %7, %8 : vector<8x1xf32>
    %cst_6 = arith.constant 0.000000e+00 : f32
    %10 = vector.broadcast %cst_6 : f32 to vector<8x1xf32>
    %11 = arith.maximumf %9, %10 : vector<8x1xf32>
    %c0_7 = arith.constant 0 : index
    %c0_8 = arith.constant 0 : index
    %12 = vector.load %arg8[%c0_7, %c0_8] : memref<8x1xf32, #tpu.memory_space<vmem>>, vector<8x1xf32>
    %cst_9 = arith.constant 9.99999974E-6 : f32
    %13 = vector.broadcast %cst_9 : f32 to vector<8x1xf32>
    %14 = arith.addf %11, %13 : vector<8x1xf32>
    %15 = math.rsqrt %14 : vector<8x1xf32>
    %16 = arith.mulf %12, %15 : vector<8x1xf32>
    %c0_10 = arith.constant 0 : index
    %c0_11 = arith.constant 0 : index
    %17 = vector.load %arg9[%c0_10, %c0_11] : memref<8x1xf32, #tpu.memory_space<vmem>>, vector<8x1xf32>
    %18 = arith.mulf %5, %16 : vector<8x1xf32>
    %19 = arith.subf %17, %18 : vector<8x1xf32>
    %c0_12 = arith.constant 0 : index
    %c0_13 = arith.constant 0 : index
    %c0_14 = arith.constant 0 : index
    %20 = vector.load %arg3[%c0_12, %c0_13, %c0_14] : memref<1x1x1152xf32, #tpu.memory_space<vmem>>, vector<1x1x1152xf32>
    %21 = vector.shape_cast %20 : vector<1x1x1152xf32> to vector<1x1152xf32>
    %cst_15 = arith.constant 5.000000e-01 : f32
    %22 = vector.broadcast %cst_15 : f32 to vector<1x1152xf32>
    %23 = arith.cmpf ogt, %21, %22 : vector<1x1152xf32>
    %c0_16 = arith.constant 0 : index
    %c0_17 = arith.constant 0 : index
    %c0_18 = arith.constant 0 : index
    %24 = vector.load %arg2[%c0_16, %c0_17, %c0_18] : memref<1x8x1152xf32, #tpu.memory_space<vmem>>, vector<1x8x1152xf32>
    %25 = vector.shape_cast %24 : vector<1x8x1152xf32> to vector<8x1152xf32>
    %26 = vector.broadcast %16 : vector<8x1xf32> to vector<8x1152xf32>
    %27 = arith.mulf %25, %26 : vector<8x1152xf32>
    %28 = vector.broadcast %19 : vector<8x1xf32> to vector<8x1152xf32>
    %29 = arith.addf %27, %28 : vector<8x1152xf32>
    %cst_19 = arith.constant 0.000000e+00 : f32
    %30 = vector.shape_cast %23 : vector<1x1152xi1> to vector<1x1152xi1>
    %31 = vector.broadcast %30 : vector<1x1152xi1> to vector<8x1152xi1>
    %32 = vector.broadcast %cst_19 : f32 to vector<8x1152xf32>
    %33 = arith.select %31, %29, %32 : vector<8x1152xi1>, vector<8x1152xf32>
    %c0_20 = arith.constant 0 : index
    %c0_21 = arith.constant 0 : index
    %34 = vector.load %arg4[%c0_20, %c0_21] : memref<8x8xf32, #tpu.memory_space<vmem>>, vector<8x8xf32>
    %cst_22 = arith.constant 0.000000e+00 : f32
    %35 = vector.broadcast %cst_22 : f32 to vector<8x1152xf32>
    %36 = vector.extract_strided_slice %34 {offsets = [0, 0], sizes = [8, 1], strides = [1, 1]} : vector<8x8xf32> to vector<8x1xf32>
    %37 = vector.extract_strided_slice %33 {offsets = [0, 0], sizes = [1, 1152], strides = [1, 1]} : vector<8x1152xf32> to vector<1x1152xf32>
    %38 = vector.broadcast %36 : vector<8x1xf32> to vector<8x1152xf32>
    %39 = vector.broadcast %37 : vector<1x1152xf32> to vector<8x1152xf32>
    %40 = arith.mulf %38, %39 : vector<8x1152xf32>
    %41 = arith.addf %35, %40 : vector<8x1152xf32>
    %42 = vector.extract_strided_slice %34 {offsets = [0, 1], sizes = [8, 1], strides = [1, 1]} : vector<8x8xf32> to vector<8x1xf32>
    %43 = vector.extract_strided_slice %33 {offsets = [1, 0], sizes = [1, 1152], strides = [1, 1]} : vector<8x1152xf32> to vector<1x1152xf32>
    %44 = vector.broadcast %42 : vector<8x1xf32> to vector<8x1152xf32>
    %45 = vector.broadcast %43 : vector<1x1152xf32> to vector<8x1152xf32>
    %46 = arith.mulf %44, %45 : vector<8x1152xf32>
    %47 = arith.addf %41, %46 : vector<8x1152xf32>
    %48 = vector.extract_strided_slice %34 {offsets = [0, 2], sizes = [8, 1], strides = [1, 1]} : vector<8x8xf32> to vector<8x1xf32>
    %49 = vector.extract_strided_slice %33 {offsets = [2, 0], sizes = [1, 1152], strides = [1, 1]} : vector<8x1152xf32> to vector<1x1152xf32>
    %50 = vector.broadcast %48 : vector<8x1xf32> to vector<8x1152xf32>
    %51 = vector.broadcast %49 : vector<1x1152xf32> to vector<8x1152xf32>
    %52 = arith.mulf %50, %51 : vector<8x1152xf32>
    %53 = arith.addf %47, %52 : vector<8x1152xf32>
    %54 = vector.extract_strided_slice %34 {offsets = [0, 3], sizes = [8, 1], strides = [1, 1]} : vector<8x8xf32> to vector<8x1xf32>
    %55 = vector.extract_strided_slice %33 {offsets = [3, 0], sizes = [1, 1152], strides = [1, 1]} : vector<8x1152xf32> to vector<1x1152xf32>
    %56 = vector.broadcast %54 : vector<8x1xf32> to vector<8x1152xf32>
    %57 = vector.broadcast %55 : vector<1x1152xf32> to vector<8x1152xf32>
    %58 = arith.mulf %56, %57 : vector<8x1152xf32>
    %59 = arith.addf %53, %58 : vector<8x1152xf32>
    %60 = vector.extract_strided_slice %34 {offsets = [0, 4], sizes = [8, 1], strides = [1, 1]} : vector<8x8xf32> to vector<8x1xf32>
    %61 = vector.extract_strided_slice %33 {offsets = [4, 0], sizes = [1, 1152], strides = [1, 1]} : vector<8x1152xf32> to vector<1x1152xf32>
    %62 = vector.broadcast %60 : vector<8x1xf32> to vector<8x1152xf32>
    %63 = vector.broadcast %61 : vector<1x1152xf32> to vector<8x1152xf32>
    %64 = arith.mulf %62, %63 : vector<8x1152xf32>
    %65 = arith.addf %59, %64 : vector<8x1152xf32>
    %66 = vector.extract_strided_slice %34 {offsets = [0, 5], sizes = [8, 1], strides = [1, 1]} : vector<8x8xf32> to vector<8x1xf32>
    %67 = vector.extract_strided_slice %33 {offsets = [5, 0], sizes = [1, 1152], strides = [1, 1]} : vector<8x1152xf32> to vector<1x1152xf32>
    %68 = vector.broadcast %66 : vector<8x1xf32> to vector<8x1152xf32>
    %69 = vector.broadcast %67 : vector<1x1152xf32> to vector<8x1152xf32>
    %70 = arith.mulf %68, %69 : vector<8x1152xf32>
    %71 = arith.addf %65, %70 : vector<8x1152xf32>
    %72 = vector.extract_strided_slice %34 {offsets = [0, 6], sizes = [8, 1], strides = [1, 1]} : vector<8x8xf32> to vector<8x1xf32>
    %73 = vector.extract_strided_slice %33 {offsets = [6, 0], sizes = [1, 1152], strides = [1, 1]} : vector<8x1152xf32> to vector<1x1152xf32>
    %74 = vector.broadcast %72 : vector<8x1xf32> to vector<8x1152xf32>
    %75 = vector.broadcast %73 : vector<1x1152xf32> to vector<8x1152xf32>
    %76 = arith.mulf %74, %75 : vector<8x1152xf32>
    %77 = arith.addf %71, %76 : vector<8x1152xf32>
    %78 = vector.extract_strided_slice %34 {offsets = [0, 7], sizes = [8, 1], strides = [1, 1]} : vector<8x8xf32> to vector<8x1xf32>
    %79 = vector.extract_strided_slice %33 {offsets = [7, 0], sizes = [1, 1152], strides = [1, 1]} : vector<8x1152xf32> to vector<1x1152xf32>
    %80 = vector.broadcast %78 : vector<8x1xf32> to vector<8x1152xf32>
    %81 = vector.broadcast %79 : vector<1x1152xf32> to vector<8x1152xf32>
    %82 = arith.mulf %80, %81 : vector<8x1152xf32>
    %83 = arith.addf %77, %82 : vector<8x1152xf32>
    %c0_23 = arith.constant 0 : index
    %c0_24 = arith.constant 0 : index
    %84 = vector.load %arg5[%c0_23, %c0_24] : memref<8x1xf32, #tpu.memory_space<vmem>>, vector<8x1xf32>
    %85 = vector.broadcast %84 : vector<8x1xf32> to vector<8x1152xf32>
    %86 = arith.addf %83, %85 : vector<8x1152xf32>
    %cst_25 = arith.constant 0.000000e+00 : f32
    %87 = vector.broadcast %cst_25 : f32 to vector<8x1152xf32>
    %88 = arith.maximumf %86, %87 : vector<8x1152xf32>
    %c0_26 = arith.constant 0 : index
    %c0_27 = arith.constant 0 : index
    %c0_28 = arith.constant 0 : index
    %89 = vector.load %arg10[%c0_26, %c0_27, %c0_28] : memref<1x8x1152xf32, #tpu.memory_space<vmem>>, vector<1x8x1152xf32>
    %90 = vector.shape_cast %89 : vector<1x8x1152xf32> to vector<8x1152xf32>
    %91 = vector.shape_cast %88 : vector<8x1152xf32> to vector<1x8x1152xf32>
    tpu.vector_store %arg10[%c0_26, %c0_27, %c0_28], %91 {strides = array<i32>} : memref<1x8x1152xf32, #tpu.memory_space<vmem>>, vector<1x8x1152xf32>,
    %cst_29 = arith.constant 5.000000e-01 : f32
    %92 = vector.broadcast %cst_29 : f32 to vector<1x1152xf32>
    %93 = arith.cmpf ogt, %21, %92 : vector<1x1152xf32>
    %cst_30 = arith.constant 0.000000e+00 : f32
    %94 = vector.shape_cast %93 : vector<1x1152xi1> to vector<1x1152xi1>
    %95 = vector.broadcast %94 : vector<1x1152xi1> to vector<8x1152xi1>
    %96 = vector.broadcast %cst_30 : f32 to vector<8x1152xf32>
    %97 = arith.select %95, %88, %96 : vector<8x1152xi1>, vector<8x1152xf32>
    %c0_i32 = arith.constant 0 : i32
    %98 = arith.cmpi eq, %arg1, %c0_i32 : i32
    %99 = arith.extui %98 : i1 to i32
    %c0_i32_31 = arith.constant 0 : i32
    %100 = arith.cmpi ne, %99, %c0_i32_31 : i32
    scf.if %100 {
      %cst_46 = arith.constant 0.000000e+00 : f32
      %118 = vector.broadcast %cst_46 : f32 to vector<1x8x1xf32>
      %c0_47 = arith.constant 0 : index
      %c0_48 = arith.constant 0 : index
      %c0_49 = arith.constant 0 : index
      %119 = vector.load %arg11[%c0_47, %c0_48, %c0_49] : memref<1x8x1xf32, #tpu.memory_space<vmem>>, vector<1x8x1xf32>
      tpu.vector_store %arg11[%c0_47, %c0_48, %c0_49], %118 {strides = array<i32>} : memref<1x8x1xf32, #tpu.memory_space<vmem>>, vector<1x8x1xf32>,
      %cst_50 = arith.constant 0.000000e+00 : f32
      %120 = vector.broadcast %cst_50 : f32 to vector<1x8x1xf32>
      %c0_51 = arith.constant 0 : index
      %c0_52 = arith.constant 0 : index
      %c0_53 = arith.constant 0 : index
      %121 = vector.load %arg12[%c0_51, %c0_52, %c0_53] : memref<1x8x1xf32, #tpu.memory_space<vmem>>, vector<1x8x1xf32>
      tpu.vector_store %arg12[%c0_51, %c0_52, %c0_53], %120 {strides = array<i32>} : memref<1x8x1xf32, #tpu.memory_space<vmem>>, vector<1x8x1xf32>,
    } else {
    }
    %c0_32 = arith.constant 0 : index
    %c0_33 = arith.constant 0 : index
    %c0_34 = arith.constant 0 : index
    %101 = vector.load %arg11[%c0_32, %c0_33, %c0_34] : memref<1x8x1xf32, #tpu.memory_space<vmem>>, vector<1x8x1xf32>
    %102 = vector.shape_cast %101 : vector<1x8x1xf32> to vector<8x1xf32>
    %cst_35 = arith.constant dense<0.000000e+00> : vector<8xf32>
    %103 = vector.multi_reduction <add>, %97, %cst_35 [1] : vector<8x1152xf32> to vector<8xf32>
    %104 = vector.shape_cast %103 : vector<8xf32> to vector<8x1xf32>
    %105 = arith.addf %102, %104 : vector<8x1xf32>
    %c0_36 = arith.constant 0 : index
    %c0_37 = arith.constant 0 : index
    %c0_38 = arith.constant 0 : index
    %106 = vector.load %arg11[%c0_36, %c0_37, %c0_38] : memref<1x8x1xf32, #tpu.memory_space<vmem>>, vector<1x8x1xf32>
    %107 = vector.shape_cast %106 : vector<1x8x1xf32> to vector<8x1xf32>
    %108 = vector.shape_cast %105 : vector<8x1xf32> to vector<1x8x1xf32>
    tpu.vector_store %arg11[%c0_36, %c0_37, %c0_38], %108 {strides = array<i32>} : memref<1x8x1xf32, #tpu.memory_space<vmem>>, vector<1x8x1xf32>,
    %c0_39 = arith.constant 0 : index
    %c0_40 = arith.constant 0 : index
    %c0_41 = arith.constant 0 : index
    %109 = vector.load %arg12[%c0_39, %c0_40, %c0_41] : memref<1x8x1xf32, #tpu.memory_space<vmem>>, vector<1x8x1xf32>
    %110 = vector.shape_cast %109 : vector<1x8x1xf32> to vector<8x1xf32>
    %111 = arith.mulf %97, %97 : vector<8x1152xf32>
    %cst_42 = arith.constant dense<0.000000e+00> : vector<8xf32>
    %112 = vector.multi_reduction <add>, %111, %cst_42 [1] : vector<8x1152xf32> to vector<8xf32>
    %113 = vector.shape_cast %112 : vector<8xf32> to vector<8x1xf32>
    %114 = arith.addf %110, %113 : vector<8x1xf32>
    %c0_43 = arith.constant 0 : index
    %c0_44 = arith.constant 0 : index
    %c0_45 = arith.constant 0 : index
    %115 = vector.load %arg12[%c0_43, %c0_44, %c0_45] : memref<1x8x1xf32, #tpu.memory_space<vmem>>, vector<1x8x1xf32>
    %116 = vector.shape_cast %115 : vector<1x8x1xf32> to vector<8x1xf32>
    %117 = vector.shape_cast %114 : vector<8x1xf32> to vector<1x8x1xf32>
    tpu.vector_store %arg12[%c0_43, %c0_44, %c0_45], %117 {strides = array<i32>} : memref<1x8x1xf32, #tpu.memory_space<vmem>>, vector<1x8x1xf32>,
    return
  }
  func.func @transform_0(%arg0: i32, %arg1: i32) -> (i32, i32, i32) {
    %c1_i32 = arith.constant 1 : i32
    %0 = arith.muli %arg0, %c1_i32 : i32
    %1 = arith.addi %0, %arg1 : i32
    %c0_i32 = arith.constant 0 : i32
    %c0_i32_0 = arith.constant 0 : i32
    %c0_i32_1 = arith.constant 0 : i32
    return %1, %c0_i32, %c0_i32_0 : i32, i32, i32
  }
  func.func @transform_1(%arg0: i32, %arg1: i32) -> (i32, i32, i32) {
    %c1_i32 = arith.constant 1 : i32
    %0 = arith.muli %arg0, %c1_i32 : i32
    %1 = arith.addi %0, %arg1 : i32
    %c0_i32 = arith.constant 0 : i32
    %c0_i32_0 = arith.constant 0 : i32
    %c0_i32_1 = arith.constant 0 : i32
    return %1, %c0_i32, %c0_i32_0 : i32, i32, i32
  }
  func.func @transform_2(%arg0: i32, %arg1: i32) -> (i32, i32) {
    %c0_i32 = arith.constant 0 : i32
    %c0_i32_0 = arith.constant 0 : i32
    %c0_i32_1 = arith.constant 0 : i32
    return %c0_i32, %c0_i32_0 : i32, i32
  }
  func.func @transform_3(%arg0: i32, %arg1: i32) -> (i32, i32) {
    %c0_i32 = arith.constant 0 : i32
    %c0_i32_0 = arith.constant 0 : i32
    %c0_i32_1 = arith.constant 0 : i32
    return %c0_i32, %c0_i32_0 : i32, i32
  }
  func.func @transform_4(%arg0: i32, %arg1: i32) -> (i32, i32, i32) {
    %c0_i32 = arith.constant 0 : i32
    %c0_i32_0 = arith.constant 0 : i32
    %c0_i32_1 = arith.constant 0 : i32
    %c0_i32_2 = arith.constant 0 : i32
    return %c0_i32, %c0_i32_0, %c0_i32_1 : i32, i32, i32
  }
  func.func @transform_5(%arg0: i32, %arg1: i32) -> (i32, i32, i32) {
    %c0_i32 = arith.constant 0 : i32
    %c0_i32_0 = arith.constant 0 : i32
    %c0_i32_1 = arith.constant 0 : i32
    %c0_i32_2 = arith.constant 0 : i32
    return %c0_i32, %c0_i32_0, %c0_i32_1 : i32, i32, i32
  }
  func.func @transform_6(%arg0: i32, %arg1: i32) -> (i32, i32) {
    %c0_i32 = arith.constant 0 : i32
    %c0_i32_0 = arith.constant 0 : i32
    %c0_i32_1 = arith.constant 0 : i32
    return %c0_i32, %c0_i32_0 : i32, i32
  }
  func.func @transform_7(%arg0: i32, %arg1: i32) -> (i32, i32) {
    %c0_i32 = arith.constant 0 : i32
    %c0_i32_0 = arith.constant 0 : i32
    %c0_i32_1 = arith.constant 0 : i32
    return %c0_i32, %c0_i32_0 : i32, i32
  }
  func.func @transform_8(%arg0: i32, %arg1: i32) -> (i32, i32, i32) {
    %c1_i32 = arith.constant 1 : i32
    %0 = arith.muli %arg0, %c1_i32 : i32
    %1 = arith.addi %0, %arg1 : i32
    %c0_i32 = arith.constant 0 : i32
    %c0_i32_0 = arith.constant 0 : i32
    %c0_i32_1 = arith.constant 0 : i32
    return %1, %c0_i32, %c0_i32_0 : i32, i32, i32
  }
  func.func @transform_9(%arg0: i32, %arg1: i32) -> (i32, i32, i32) {
    %c0_i32 = arith.constant 0 : i32
    %c0_i32_0 = arith.constant 0 : i32
    %c0_i32_1 = arith.constant 0 : i32
    return %arg0, %c0_i32, %c0_i32_0 : i32, i32, i32
  }
  func.func @transform_10(%arg0: i32, %arg1: i32) -> (i32, i32, i32) {
    %c0_i32 = arith.constant 0 : i32
    %c0_i32_0 = arith.constant 0 : i32
    %c0_i32_1 = arith.constant 0 : i32
    return %arg0, %c0_i32, %c0_i32_0 : i32, i32, i32
  }
}

</mosaic_0001>

<bundles_post_ra>
// kernel: lska11_forward.6
= control target key start
LH: loop header
LB: loop body
LE: loop exit
PB: predicated region body
PF: predicated region fallthrough
CT: control target
= control target key end

     0   :  { %v830_v0 = vmov 1   ;;  %v831_v2 = vmov 0   ;;  %v832_v4 = vmov 2   ;;  %v251_v5 = vlaneseq  ;;  %s833_s19 = smov 127   ;;  %s834_s22 = smov 126   ;;  %s1244_s6 = inlined_call_operand.vmem [shape: f32[8,3], index: 6, kind: input, shape index: {}]   ;;  %s1245_s7 = inlined_call_operand.vmem [shape: f32[8,1], index: 7, kind: input, shape index: {}]   ;;  %s1246_s8 = inlined_call_operand.vmem [shape: f32[1,8,1], index: 8, kind: input, shape index: {}, may-alias: {8,9}]   ;;  %s1247_s9 = inlined_call_operand.vmem [shape: f32[1,8,1], index: 9, kind: input, shape index: {}, may-alias: {8,9}]   ;;  %s1248_s10 = inlined_call_operand.vmem [shape: f32[8,1], index: 10, kind: input, shape index: {}]   ;;  %s1249_s11 = inlined_call_operand.vmem [shape: f32[8,1], index: 11, kind: input, shape index: {}]   ;;  %s1250_s4 = inlined_call_operand.vmem [shape: f32[1,1,1152], index: 4, kind: input, shape index: {}, may-alias: {3,4,5}]   ;;  %s1251_s1 = inlined_call_operand.vmem [shape: f32[1,8,1152], index: 1, kind: input, shape index: {}, may-alias: {0,1,2}]   ;;  %s1252_s5 = inlined_call_operand.vmem [shape: f32[1,1,1152], index: 5, kind: input, shape index: {}, may-alias: {3,4,5}]   ;;  %s1253_s2 = inlined_call_operand.vmem [shape: f32[1,8,1152], index: 2, kind: input, shape index: {}, may-alias: {0,1,2}]   ;;  %s1254_s3 = inlined_call_operand.vmem [shape: f32[1,1,1152], index: 3, kind: input, shape index: {}, may-alias: {3,4,5}]   ;;  %s1255_s0 = inlined_call_operand.vmem [shape: f32[1,8,1152], index: 0, kind: input, shape index: {}, may-alias: {0,1,2}]   ;;  %s1256_s13 = inlined_call_operand.vmem [shape: f32[1,8,1], index: 13, kind: output, shape index: {1}]   ;;  %s1257_s12 = inlined_call_operand.vmem [shape: f32[1,8,1152], index: 12, kind: output, shape index: {0}]   ;;  %s1258_s14 = inlined_call_operand.vmem [shape: f32[1,8,1], index: 14, kind: output, shape index: {2}]  }
   0x1   :  { %826 = vset.pattern.permute.xlu0 %v830_v0  ;;  %v384_v1 = vld [vmem:[%s1244_s6] sm:$0xff]  ;;  %828 = vset.pattern.permute.xlu1 %v831_v2  ;;  %v236_v25 = vld [vmem:[%s1251_s1 + $0x8] sm:$0xff]  ;;  %v238_v33 = vld [vmem:[%s1251_s1 + $0x18] sm:$0xff] }
   0x2   :  { %411 = vperm.xlu0 %826, %v384_v1   ;;  %387 = vperm.xlu1 %828, %v384_v1   ;;  %v553_v3 = vld [vmem:[%s1245_s7] sm:$0xff]  ;;  %v920_v6 = vshrl.u32 %v251_v5, 7  ;;  %v237_v34 = vld [vmem:[%s1251_s1 + $0x10] sm:$0xff]  ;;  %v818_v55 = vld [vmem:[%s1250_s4 + $0x8] ss:$0 sm:$0xff] }
   0x3   :  { %v929_v9 = vld [vmem:[%s1250_s4] sm:$0xff]  ;;  %v240_v56 = vld [vmem:[%s1251_s1 + $0x28] sm:$0xff]  ;;  %vm305_vm14 = vcmp.gt.f32.partialorder %v818_v55, 0.5  ;;  %v241_v62 = vld [vmem:[%s1251_s1 + $0x30] sm:$0xff] }
   0x4   :  { %v923_v7 = vsub.s32 0, %v920_v6  ;;  %v257_v8 = vsub.s32 1, %v920_v6  ;;  %v265_v12 = vsub.s32 3, %v920_v6  ;;  %v261_v13 = vsub.s32 2, %v920_v6  ;;  %v235_v26 = vld [vmem:[%s1251_s1] sm:$0xff] }
   0x5   :  { %v269_v18 = vsub.s32 4, %v920_v6  ;;  %v273_v24 = vsub.s32 5, %v920_v6  ;;  %v277_v30 = vsub.s32 6, %v920_v6  ;;  %v281_v37 = vsub.s32 7, %v920_v6  ;;  %v239_v51 = vld [vmem:[%s1251_s1 + $0x20] sm:$0xff] }
   0x6   :  { %827 = vset.pattern.permute.xlu0 %v832_v4  ;;  %556 = vperm.xlu1 %828, %v553_v3   ;;  %v258_v10 = vrot.slane %v929_v9, %v257_v8  ;;  %v254_v11 = vrot.slane %v929_v9, %v923_v7  ;;  %v266_v14 = vrot.slane %v929_v9, %v265_v12  ;;  %v316_v0 = vsel %vm305_vm14, 1, %v831_v2  ;;  %v248_v5 = vld [vmem:[%s1252_s5] sm:$0x1] }
   0x7   :  { %480 = vperm.xlu0 %827, %v384_v1   ;;  %v262_v15 = vrot.slane %v929_v9, %v261_v13  ;;  %v270_v23 = vrot.slane %v929_v9, %v269_v18  ;;  %v274_v29 = vrot.slane %v929_v9, %v273_v24  ;;  %v278_v40 = vrot.slane %v929_v9, %v277_v30 }
   0x8   :  { %vm298_vm0 = vcmp.gt.f32.partialorder %v258_v10, 0.5  ;;  %vm297_vm1 = vcmp.gt.f32.partialorder %v254_v11, 0.5  ;;  %vm300_vm2 = vcmp.gt.f32.partialorder %v266_v14, 0.5  ;;  %v282_v48 = vrot.slane %v929_v9, %v281_v37  ;;  %v242_v10 = vld [vmem:[%s1251_s1 + $0x38] sm:$0xff] }
   0x9   :  { %v309_v16 = vsel %vm298_vm0, 1, %v831_v2  ;;  %v308_v17 = vsel %vm297_vm1, 1, %v831_v2  ;;  %vm299_vm3 = vcmp.gt.f32.partialorder %v262_v15, 0.5  ;;  %v311_v21 = vsel %vm300_vm2, 1, %v831_v2 }
   0xa   :  { %v329_v19 = vrot.slane %v309_v16, %v923_v7  ;;  %v325_v20 = vrot.slane %v308_v17, %v923_v7  ;;  %v310_v22 = vsel %vm299_vm3, 1, %v831_v2  ;;  %v337_v27 = vrot.slane %v311_v21, %v923_v7  ;;  %v243_v17 = vld [vmem:[%s1251_s1 + $0x40] sm:$0xff] }
   0xb   :  { %829 = vset.pattern.permute.xlu0 %v831_v2  ;;  %v333_v28 = vrot.slane %v310_v22, %v923_v7  ;;  %vm301_vm6 = vcmp.gt.f32.partialorder %v270_v23, 0.5  ;;  %vm302_vm9 = vcmp.gt.f32.partialorder %v274_v29, 0.5  ;;  %vm303_vm10 = vcmp.gt.f32.partialorder %v278_v40, 0.5 }
   0xc   :  { %vm364_vm4 = vcmp.eq.s32.totalorder %v329_v19, 1  ;;  %vm363_vm5 = vcmp.eq.s32.totalorder %v325_v20, 1  ;;  %vm366_vm7 = vcmp.eq.s32.totalorder %v337_v27, 1  ;;  %v312_v36 = vsel %vm301_vm6, 1, %v831_v2  ;;  %v244_v27 = vld [vmem:[%s1253_s2] sm:$0xff] }
   0xd   :  { %v967_v31 = vsel %vm364_vm4, %v236_v25, 0.0  ;;  %v969_v32 = vsel %vm363_vm5, %v235_v26, 0.0  ;;  %vm365_vm8 = vcmp.eq.s32.totalorder %v333_v28, 1  ;;  %v988_v41 = vsel %vm366_vm7, %v238_v33, 0.0 }
   0xe   :  { %v990_v42 = vsel %vm365_vm8, %v237_v34, 0.0  ;;  %v341_v43 = vrot.slane %v312_v36, %v923_v7  ;;  %v313_v44 = vsel %vm302_vm9, 1, %v831_v2  ;;  %v314_v53 = vsel %vm303_vm10, 1, %v831_v2 }
   0xf   :  { %v345_v52 = vrot.slane %v313_v44, %v923_v7  ;;  %vm304_vm12 = vcmp.gt.f32.partialorder %v282_v48, 0.5  ;;  %v349_v57 = vrot.slane %v314_v53, %v923_v7  ;;  %v357_v11 = vrot.slane %v316_v0, %v923_v7 }
  0x10   :  { %vm367_vm11 = vcmp.eq.s32.totalorder %v341_v43, 1  ;;  %v315_v58 = vsel %vm304_vm12, 1, %v831_v2  ;;  %vm306_vm1 = vcmp.gt.f32.partialorder %v248_v5, 0.5  ;;  %v816_v43 = vld [vmem:[%s1255_s0 + $0x40] sm:$0xff]  ;;  %vm450_vm6 = vcmask 1039360   ;;  %s835_s0 = smov 1  }
  0x11   :  { %v1016_v54 = vsel %vm367_vm11, %v239_v51, 0.0  ;;  %vm368_vm13 = vcmp.eq.s32.totalorder %v345_v52, 1  ;;  %vm369_vm15 = vcmp.eq.s32.totalorder %v349_v57, 1  ;;  %v353_v63 = vrot.slane %v315_v58, %v923_v7 }
  0x12   :  { %v1032_v61 = vsel %vm368_vm13, %v240_v56, 0.0  ;;  %v1045_v4 = vsel %vm369_vm15, %v241_v62, 0.0  ;;  %vm371_vm2 = vcmp.eq.s32.totalorder %v357_v11, 1  ;;  %v317_v19 = vsel %vm306_vm1, 1, %v831_v2 }
  0x13   :  { %vm370_vm0 = vcmp.eq.s32.totalorder %v353_v63, 1  ;;  %v1072_v22 = vsel %vm371_vm2, %v243_v17, 0.0  ;;  %v361_v23 = vrot.slane %v317_v19, %v923_v7  ;;  %vm523_vm7 = vcmask 1031168  }
  0x14   :  { %v1060_v16 = vsel %vm370_vm0, %v242_v10, 0.0  ;;  %vm609_vm8 = vcmask 7168   ;;  %vm639_vm9 = vcmp.gt.f32.partialorder %v929_v9, 0.5 }
  0x15   :  { %vm372_vm3 = vcmp.eq.s32.totalorder %v361_v23, 1 }
  0x16   :  { %v383_v33 = vsel %vm372_vm3, %v244_v27, 0.0 }
  0x81   :  { %v977_v35 = vpop.permute.xlu0 %411  ;;  %v1097_v36 = vpop.permute.xlu1 %387 }
  0x82   :  { %v415_v38 = vmul.f32 %v977_v35, %v967_v31  ;;  %v414_v39 = vmul.f32 %v977_v35, %v969_v32  ;;  %v417_v45 = vmul.f32 %v977_v35, %v988_v41  ;;  %v416_v46 = vmul.f32 %v977_v35, %v990_v42 }
  0x83   :  { %v418_v59 = vmul.f32 %v977_v35, %v1016_v54  ;;  %v419_v1 = vmul.f32 %v977_v35, %v1032_v61  ;;  %v420_v14 = vmul.f32 %v977_v35, %v1045_v4  ;;  %v421_v20 = vmul.f32 %v977_v35, %v1060_v16 }
  0x84   :  { %434 = vrot.lane.b32.xlu0 %v415_v38, %s833_s19  ;;  %432 = vrot.lane.b32.xlu1 %v414_v39, %s833_s19  ;;  %v422_v25 = vmul.f32 %v977_v35, %v1072_v22  ;;  %v817_v35 = vld [vmem:[%s1254_s3 + $0x8] sm:$0x1]  ;;  %v391_v51 = vmul.f32 %v1097_v36, %v969_v32 }
  0x85   :  { %vm296_vm4 = vcmp.gt.f32.partialorder %v817_v35, 0.5  ;;  %v1101_v40 = vpop.permute.xlu1 %556 }
  0x86   :  { %v1000_v47 = vpop.permute.xlu0 %480  ;;  %v307_v38 = vsel %vm296_vm4, 1, %v831_v2 }
  0x87   :  { %v484_v49 = vmul.f32 %v1000_v47, %v967_v31  ;;  %v483_v50 = vmul.f32 %v1000_v47, %v969_v32  ;;  %v485_v60 = vmul.f32 %v1000_v47, %v990_v42  ;;  %v486_v3 = vmul.f32 %v1000_v47, %v988_v41 }
  0x88   :  { %438 = vrot.lane.b32.xlu0 %v417_v45, %s833_s19  ;;  %436 = vrot.lane.b32.xlu1 %v416_v46, %s833_s19  ;;  %v487_v15 = vmul.f32 %v1000_v47, %v1016_v54  ;;  %v488_v21 = vmul.f32 %v1000_v47, %v1032_v61  ;;  %v489_v26 = vmul.f32 %v1000_v47, %v1045_v4 }
  0x89   :  { %v491_v28 = vmul.f32 %v1000_v47, %v1072_v22  ;;  %v490_v29 = vmul.f32 %v1000_v47, %v1060_v16  ;;  %v492_v34 = vmul.f32 %v1000_v47, %v383_v33  ;;  %v321_v39 = vrot.slane %v307_v38, %v923_v7 }
  0x8b   :  { %vm362_vm5 = vcmp.eq.s32.totalorder %v321_v39, 1  ;;  %v395_v39 = vmul.f32 %v1097_v36, %v1016_v54 }
  0x8c   :  { %505 = vrot.lane.b32.xlu0 %v484_v49, %s834_s22  ;;  %503 = vrot.lane.b32.xlu1 %v483_v50, %s834_s22  ;;  %v373_v46 = vsel %vm362_vm5, %v816_v43, 0.0 }
  0x8d   :  { %v390_v49 = vmul.f32 %v1097_v36, %v373_v46 }
  0x90   :  { %440 = vrot.lane.b32.xlu0 %v418_v59, %s833_s19  ;;  %507 = vrot.lane.b32.xlu1 %v485_v60, %s834_s22  ;;  %v392_v60 = vmul.f32 %v1097_v36, %v967_v31 }
  0x94   :  { %442 = vrot.lane.b32.xlu0 %v419_v1, %s833_s19  ;;  %509 = vrot.lane.b32.xlu1 %v486_v3, %s834_s22 }
  0x98   :  { %444 = vrot.lane.b32.xlu0 %v420_v14, %s833_s19  ;;  %511 = vrot.lane.b32.xlu1 %v487_v15, %s834_s22  ;;  %v393_v14 = vmul.f32 %v1097_v36, %v990_v42 }
  0x9c   :  { %446 = vrot.lane.b32.xlu0 %v421_v20, %s833_s19  ;;  %513 = vrot.lane.b32.xlu1 %v488_v21, %s834_s22 }
  0xa0   :  { %448 = vrot.lane.b32.xlu0 %v422_v25, %s833_s19  ;;  %515 = vrot.lane.b32.xlu1 %v489_v26, %s834_s22  ;;  %v394_v26 = vmul.f32 %v1097_v36, %v988_v41 }
  0xa4   :  { %519 = vrot.lane.b32.xlu0 %v491_v28, %s834_s22  ;;  %517 = vrot.lane.b32.xlu1 %v490_v29, %s834_s22 }
  0xa8   :  { %521 = vrot.lane.b32.xlu1 %v492_v34, %s834_s22 }
  0xf6   :  { %v435_v44 = vpop.permute.xlu0 %434  ;;  %v433_v45 = vpop.permute.xlu1 %432 }
  0xf7   :  { %v451_v50 = vsel %vm450_vm6, %v433_v45, %v435_v44  ;;  %v469_v52 = vadd.f32 %v433_v45, %v390_v49 }
  0xf8   :  { %v470_v53 = vadd.f32 %v451_v50, %v391_v51  ;;  %v396_v50 = vmul.f32 %v1097_v36, %v1032_v61  ;;  %v398_v61 = vmul.f32 %v1097_v36, %v1060_v16 }
  0xfa   :  { %v439_v47 = vpop.permute.xlu0 %438  ;;  %v437_v48 = vpop.permute.xlu1 %436 }
  0xfb   :  { %v452_v57 = vsel %vm450_vm6, %v435_v44, %v437_v48  ;;  %v453_v5 = vsel %vm450_vm6, %v437_v48, %v439_v47 }
  0xfc   :  { %v471_v0 = vadd.f32 %v452_v57, %v392_v60  ;;  %v472_v31 = vadd.f32 %v453_v5, %v393_v14  ;;  %v397_v60 = vmul.f32 %v1097_v36, %v1045_v4  ;;  %v399_v4 = vmul.f32 %v1097_v36, %v1072_v22 }
  0xfe   :  { %v506_v55 = vpop.permute.xlu0 %505  ;;  %v504_v56 = vpop.permute.xlu1 %503 }
  0xff   :  { %v524_v58 = vsel %vm523_vm7, %v504_v56, %v506_v55  ;;  %v543_v59 = vadd.f32 %v504_v56, %v469_v52 }
 0x100   :  { %v544_v62 = vadd.f32 %v524_v58, %v470_v53 }
 0x101   :  { %v559_v63 = vadd.f32 %v1101_v40, %v543_v59 }
 0x102   :  { %v441_v1 = vpop.permute.xlu0 %440  ;;  %v508_v3 = vpop.permute.xlu1 %507  ;;  %v560_v32 = vadd.f32 %v1101_v40, %v544_v62 }
 0x103   :  { %v525_v10 = vsel %vm523_vm7, %v506_v55, %v508_v3  ;;  %v569_v11 = vmax.f32 %v559_v63, 0.0  ;;  %v454_v23 = vsel %vm450_vm6, %v439_v47, %v441_v1 }
 0x104   :  { %v545_v15 = vadd.f32 %v525_v10, %v471_v0  ;;  %v570_v17 = vmax.f32 %v560_v32, 0.0  ;;  %v473_v28 = vadd.f32 %v454_v23, %v394_v26 }
 0x105   :  { %589 = vrot.lane.b32.xlu0 %v569_v11, %s835_s0 }
 0x106   :  { %v443_v19 = vpop.permute.xlu0 %442  ;;  %v510_v20 = vpop.permute.xlu1 %509  ;;  %591 = vrot.lane.b32.xlu1 %v570_v17, %s835_s0  ;;  %v561_v21 = vadd.f32 %v1101_v40, %v545_v15 }
 0x107   :  { %v526_v25 = vsel %vm523_vm7, %v508_v3, %v510_v20  ;;  %v455_v35 = vsel %vm450_vm6, %v441_v1, %v443_v19 }
 0x108   :  { %v546_v42 = vadd.f32 %v526_v25, %v472_v31  ;;  %v571_v27 = vmax.f32 %v561_v21, 0.0  ;;  %v474_v45 = vadd.f32 %v455_v35, %v395_v39 }
 0x10a   :  { %v445_v29 = vpop.permute.xlu0 %444  ;;  %v512_v33 = vpop.permute.xlu1 %511  ;;  %593 = vrot.lane.b32.xlu0 %v571_v27, %s835_s0  ;;  %v562_v34 = vadd.f32 %v1101_v40, %v546_v42  ;;  %v836_v42 = vmov 0.0  }
 0x10b   :  { %v527_v38 = vsel %vm523_vm7, %v510_v20, %v512_v33  ;;  %v456_v48 = vsel %vm450_vm6, %v443_v19, %v445_v29  ;;  %701 = vst.msk [vmem:[%s1256_s13] sm:$0xff] %vm609_vm8, %v836_v42  ;;  %702 = vst.msk [vmem:[%s1258_s14] sm:$0xff] %vm609_vm8, %v836_v42 }
 0x10c   :  { %v547_v43 = vadd.f32 %v527_v38, %v473_v28  ;;  %v572_v44 = vmax.f32 %v562_v34, 0.0  ;;  %v475_v53 = vadd.f32 %v456_v48, %v396_v50 }
 0x10e   :  { %v447_v41 = vpop.permute.xlu0 %446  ;;  %v514_v46 = vpop.permute.xlu1 %513  ;;  %595 = vrot.lane.b32.xlu1 %v572_v44, %s835_s0  ;;  %v563_v47 = vadd.f32 %v1101_v40, %v547_v43 }
 0x10f   :  { %v528_v49 = vsel %vm523_vm7, %v512_v33, %v514_v46  ;;  %v457_v57 = vsel %vm450_vm6, %v445_v29, %v447_v41  ;;  %v641_v33 = vsel %vm639_vm9, 1, %v831_v2 }
 0x110   :  { %v548_v51 = vadd.f32 %v528_v49, %v474_v45  ;;  %v573_v52 = vmax.f32 %v563_v47, 0.0  ;;  %v476_v0 = vadd.f32 %v457_v57, %v397_v60  ;;  %v650_v35 = vrot.slane %v641_v33, %v257_v8 }
 0x111   :  { %v646_v9 = vrot.slane %v641_v33, %v923_v7  ;;  %v654_v38 = vrot.slane %v641_v33, %v261_v13  ;;  %v658_v44 = vrot.slane %v641_v33, %v265_v12  ;;  %v662_v8 = vrot.slane %v641_v33, %v269_v18 }
 0x112   :  { %v449_v54 = vpop.permute.xlu0 %448  ;;  %v516_v55 = vpop.permute.xlu1 %515  ;;  %597 = vrot.lane.b32.xlu0 %v573_v52, %s835_s0  ;;  %v564_v56 = vadd.f32 %v1101_v40, %v548_v51  ;;  %vm680_vm10 = vcmp.eq.s32.totalorder %v650_v35, 1  ;;  %v666_v18 = vrot.slane %v641_v33, %v273_v24  ;;  %v674_v57 = vrot.slane %v641_v33, %v281_v37 }
 0x113   :  { %v458_v58 = vsel %vm450_vm6, %v447_v41, %v449_v54  ;;  %v529_v59 = vsel %vm523_vm7, %v514_v46, %v516_v55  ;;  %v478_v17 = vadd.f32 %v449_v54, %v399_v4  ;;  %vm679_vm11 = vcmp.eq.s32.totalorder %v646_v9, 1  ;;  %v638_v46 = vld [vmem:[%s1250_s4 + $0x8] sm:$0x1] }
 0x114   :  { %v549_v62 = vadd.f32 %v529_v59, %v475_v53  ;;  %v574_v63 = vmax.f32 %v564_v56, 0.0  ;;  %v477_v1 = vadd.f32 %v458_v58, %v398_v61  ;;  %vm681_vm12 = vcmp.eq.s32.totalorder %v654_v38, 1 }
 0x115   :  { %vm682_vm13 = vcmp.eq.s32.totalorder %v658_v44, 1  ;;  %vm683_vm14 = vcmp.eq.s32.totalorder %v662_v8, 1  ;;  %vm640_vm15 = vcmp.gt.f32.partialorder %v638_v46, 0.5  ;;  %v670_v56 = vrot.slane %v641_v33, %v277_v30 }
 0x116   :  { %v520_v3 = vpop.permute.xlu0 %519  ;;  %v518_v32 = vpop.permute.xlu1 %517  ;;  %599 = vrot.lane.b32.xlu1 %v574_v63, %s835_s0  ;;  %v565_v5 = vadd.f32 %v1101_v40, %v549_v62  ;;  %vm684_vm0 = vcmp.eq.s32.totalorder %v666_v18, 1  ;;  %v642_v61 = vsel %vm640_vm15, 1, %v831_v2  ;;  %vm686_vm2 = vcmp.eq.s32.totalorder %v674_v57, 1 }
 0x117   :  { %v530_v10 = vsel %vm523_vm7, %v516_v55, %v518_v32  ;;  %v531_v11 = vsel %vm523_vm7, %v518_v32, %v520_v3  ;;  %vm685_vm1 = vcmp.eq.s32.totalorder %v670_v56, 1  ;;  %v678_v32 = vrot.slane %v642_v61, %v923_v7 }
 0x118   :  { %v550_v14 = vadd.f32 %v530_v10, %v476_v0  ;;  %v551_v15 = vadd.f32 %v531_v11, %v477_v1  ;;  %v575_v16 = vmax.f32 %v565_v5, 0.0 }
 0x119   :  { %vm687_vm3 = vcmp.eq.s32.totalorder %v678_v32, 1 }
 0x11a   :  { %v522_v31 = vpop.permute.xlu1 %521  ;;  %601 = vrot.lane.b32.xlu0 %v575_v16, %s835_s0  ;;  %v566_v19 = vadd.f32 %v1101_v40, %v550_v14  ;;  %v567_v20 = vadd.f32 %v1101_v40, %v551_v15 }
 0x11b   :  { %v532_v21 = vsel %vm523_vm7, %v520_v3, %v522_v31 }
 0x11c   :  { %v552_v23 = vadd.f32 %v532_v21, %v478_v17  ;;  %v576_v25 = vmax.f32 %v566_v19, 0.0  ;;  %v577_v26 = vmax.f32 %v567_v20, 0.0 }
 0x11e   :  { %603 = vrot.lane.b32.xlu1 %v576_v25, %s835_s0  ;;  %605 = vrot.lane.b32.xlu0 %v577_v26, %s835_s0  ;;  %v568_v22 = vadd.f32 %v1101_v40, %v552_v23 }
 0x120   :  { %v578_v36 = vmax.f32 %v568_v22, 0.0 }
 0x122   :  { %607 = vrot.lane.b32.xlu1 %v578_v36, %s835_s0 }
 0x177   :  { %v590_v27 = vpop.permute.xlu0 %589 }
 0x178   :  { %v592_v28 = vpop.permute.xlu1 %591 }
 0x179   :  { %v610_v29 = vsel %vm609_vm8, %v590_v27, %v592_v28 }
 0x17a   :  { %628 = vst [vmem:[%s1257_s12] sm:$0xff] %v610_v29  ;;  %v688_v47 = vsel %vm679_vm11, %v610_v29, 0.0  ;;  %v703_v29 = vld [vmem:[%s1256_s13] sm:$0xff] }
 0x17b   :  { %v717_v51 = vmul.f32 %v688_v47, %v688_v47 }
 0x17c   :  { %v594_v34 = vpop.permute.xlu0 %593 }
 0x17d   :  { %v611_v40 = vsel %vm609_vm8, %v592_v28, %v594_v34 }
 0x17e   :  { %629 = vst [vmem:[%s1257_s12 + $0x8] sm:$0xff] %v611_v40  ;;  %v689_v45 = vsel %vm680_vm10, %v611_v40, 0.0 }
 0x17f   :  { %v718_v48 = vmul.f32 %v689_v45, %v689_v45  ;;  %v704_v52 = vadd.f32 %v689_v45, %v688_v47 }
 0x180   :  { %v596_v39 = vpop.permute.xlu1 %595 }
 0x181   :  { %v612_v43 = vsel %vm609_vm8, %v594_v34, %v596_v39  ;;  %v726_v24 = vadd.f32 %v718_v48, %v717_v51  ;;  %v716_v34 = vld [vmem:[%s1258_s14] sm:$0xff] }
 0x182   :  { %630 = vst [vmem:[%s1257_s12 + $0x10] sm:$0xff] %v612_v43  ;;  %v690_v12 = vsel %vm681_vm12, %v612_v43, 0.0 }
 0x183   :  { %v719_v53 = vmul.f32 %v690_v12, %v690_v12  ;;  %v705_v58 = vadd.f32 %v704_v52, %v690_v12 }
 0x184   :  { %v598_v41 = vpop.permute.xlu0 %597 }
 0x185   :  { %v613_v13 = vsel %vm609_vm8, %v596_v39, %v598_v41  ;;  %v727_v62 = vadd.f32 %v726_v24, %v719_v53 }
 0x186   :  { %631 = vst [vmem:[%s1257_s12 + $0x18] sm:$0xff] %v613_v13  ;;  %v691_v49 = vsel %vm682_vm13, %v613_v13, 0.0 }
 0x187   :  { %v720_v59 = vmul.f32 %v691_v49, %v691_v49  ;;  %v706_v63 = vadd.f32 %v705_v58, %v691_v49 }
 0x188   :  { %v600_v50 = vpop.permute.xlu1 %599 }
 0x189   :  { %v614_v54 = vsel %vm609_vm8, %v598_v41, %v600_v50  ;;  %v728_v6 = vadd.f32 %v727_v62, %v720_v59 }
 0x18a   :  { %632 = vst [vmem:[%s1257_s12 + $0x20] sm:$0xff] %v614_v54  ;;  %v692_v55 = vsel %vm683_vm14, %v614_v54, 0.0 }
 0x18b   :  { %v721_v0 = vmul.f32 %v692_v55, %v692_v55  ;;  %v707_v37 = vadd.f32 %v706_v63, %v692_v55 }
 0x18c   :  { %v602_v60 = vpop.permute.xlu0 %601 }
 0x18d   :  { %v615_v1 = vsel %vm609_vm8, %v600_v50, %v602_v60  ;;  %v729_v2 = vadd.f32 %v728_v6, %v721_v0 }
 0x18e   :  { %633 = vst [vmem:[%s1257_s12 + $0x28] sm:$0xff] %v615_v1  ;;  %v693_v30 = vsel %vm684_vm0, %v615_v1, 0.0 }
 0x18f   :  { %v722_v3 = vmul.f32 %v693_v30, %v693_v30  ;;  %v708_v11 = vadd.f32 %v707_v37, %v693_v30 }
 0x190   :  { %v604_v5 = vpop.permute.xlu1 %603  ;;  %v606_v10 = vpop.permute.xlu0 %605 }
 0x191   :  { %v616_v4 = vsel %vm609_vm8, %v602_v60, %v604_v5  ;;  %v617_v14 = vsel %vm609_vm8, %v604_v5, %v606_v10  ;;  %v730_v17 = vadd.f32 %v729_v2, %v722_v3 }
 0x192   :  { %634 = vst [vmem:[%s1257_s12 + $0x30] sm:$0xff] %v616_v4  ;;  %v694_v15 = vsel %vm685_vm1, %v616_v4, 0.0  ;;  %635 = vst [vmem:[%s1257_s12 + $0x38] sm:$0xff] %v617_v14  ;;  %v695_v16 = vsel %vm686_vm2, %v617_v14, 0.0 }
 0x193   :  { %v709_v7 = vadd.f32 %v708_v11, %v694_v15  ;;  %v723_v31 = vmul.f32 %v694_v15, %v694_v15  ;;  %v724_v20 = vmul.f32 %v695_v16, %v695_v16 }
 0x194   :  { %v608_v19 = vpop.permute.xlu1 %607 }
 0x195   :  { %v618_v21 = vsel %vm609_vm8, %v606_v10, %v608_v19  ;;  %v710_v23 = vadd.f32 %v709_v7, %v695_v16  ;;  %v731_v25 = vadd.f32 %v730_v17, %v723_v31 }
 0x196   :  { %636 = vst [vmem:[%s1257_s12 + $0x40] sm:$0xff] %v618_v21  ;;  %v696_v26 = vsel %vm687_vm3, %v618_v21, 0.0 }
 0x197   :  { %v711_v22 = vadd.f32 %v710_v23, %v696_v26  ;;  %v725_v36 = vmul.f32 %v696_v26, %v696_v26  ;;  %v732_v27 = vadd.f32 %v731_v25, %v724_v20 }
 0x199   :  { %712 = vadd.xlane.f32.xlu0 %v711_v22  ;;  %v733_v28 = vadd.f32 %v732_v27, %v725_v36 }
 0x19b   :  { %734 = vadd.xlane.f32.xlu1 %v733_v28 }
 0x226   :  { %v713_v33 = vpop.xlane.xlu0 %712 }
 0x227   :  { %v714_v35 = vadd.f32 %v713_v33, %v703_v29 }
 0x228   :  { %v735_v40 = vpop.xlane.xlu1 %734 }
 0x229   :  { %715 = vst.msk [vmem:[%s1256_s13] sm:$0xff] %vm609_vm8, %v714_v35  ;;  %v736_v9 = vadd.f32 %v735_v40, %v716_v34 }
 0x22b   :  { %737 = vst.msk [vmem:[%s1258_s14] sm:$0xff] %vm609_vm8, %v736_v9 }

// kernel: lska11_forward.9
= control target key start
LH: loop header
LB: loop body
LE: loop exit
PB: predicated region body
PF: predicated region fallthrough
CT: control target
= control target key end

     0   :  { %v1035_v0 = vmov 1   ;;  %v1036_v2 = vmov 0   ;;  %v1037_v8 = vmov 2   ;;  %v1038_v12 = vmov 4   ;;  %s1040_s15 = smov 80   ;;  %s1042_s19 = smov 112   ;;  %s1603_s6 = inlined_call_operand.vmem [shape: f32[8,5], index: 6, kind: input, shape index: {}]   ;;  %s1604_s8 = inlined_call_operand.vmem [shape: f32[1,8,1], index: 8, kind: input, shape index: {}]   ;;  %s1605_s9 = inlined_call_operand.vmem [shape: f32[1,8,1], index: 9, kind: input, shape index: {}]   ;;  %s1606_s10 = inlined_call_operand.vmem [shape: f32[8,1], index: 10, kind: input, shape index: {}]   ;;  %s1607_s11 = inlined_call_operand.vmem [shape: f32[8,1], index: 11, kind: input, shape index: {}]   ;;  %s1608_s7 = inlined_call_operand.vmem [shape: f32[8,1], index: 7, kind: input, shape index: {}]   ;;  %s1609_s4 = inlined_call_operand.vmem [shape: f32[1,1,1152], index: 4, kind: input, shape index: {}, may-alias: {3,4,5}]   ;;  %s1610_s3 = inlined_call_operand.vmem [shape: f32[1,1,1152], index: 3, kind: input, shape index: {}, may-alias: {3,4,5}]   ;;  %s1611_s1 = inlined_call_operand.vmem [shape: f32[1,8,1152], index: 1, kind: input, shape index: {}, may-alias: {0,1,2}]   ;;  %s1612_s0 = inlined_call_operand.vmem [shape: f32[1,8,1152], index: 0, kind: input, shape index: {}, may-alias: {0,1,2}]   ;;  %s1613_s2 = inlined_call_operand.vmem [shape: f32[1,8,1152], index: 2, kind: input, shape index: {}, may-alias: {0,1,2}]   ;;  %s1614_s5 = inlined_call_operand.vmem [shape: f32[1,1,1152], index: 5, kind: input, shape index: {}, may-alias: {3,4,5}]   ;;  %s1615_s13 = inlined_call_operand.vmem [shape: f32[1,8,1], index: 13, kind: output, shape index: {1}]   ;;  %s1616_s12 = inlined_call_operand.vmem [shape: f32[1,8,1152], index: 12, kind: output, shape index: {0}]   ;;  %s1617_s14 = inlined_call_operand.vmem [shape: f32[1,8,1], index: 14, kind: output, shape index: {2}]  }
   0x1   :  { %1026 = vset.pattern.permute.xlu1 %v1035_v0  ;;  %v430_v1 = vld [vmem:[%s1603_s6] sm:$0xff]  ;;  %1028 = vset.pattern.permute.xlu0 %v1036_v2  ;;  %v1039_v19 = vmov 3   ;;  %v251_v21 = vlaneseq  ;;  %v1013_v28 = vld [vmem:[%s1610_s3 + $0x8] sm:$0x1]  ;;  %v237_v42 = vld [vmem:[%s1611_s1 + $0x10] sm:$0xff] }
   0x2   :  { %v296_v3 = vld [vmem:[%s1604_s8] sm:$0xff]  ;;  %457 = vperm.xlu1 %1026, %v430_v1   ;;  %vm310_vm1 = vcmp.gt.f32.partialorder %v1013_v28, 0.5  ;;  %v236_v43 = vld [vmem:[%s1611_s1 + $0x8] sm:$0xff]  ;;  %v238_v53 = vld [vmem:[%s1611_s1 + $0x18] sm:$0xff] }
   0x3   :  { %v297_v4 = vld [vmem:[%s1605_s9] sm:$0xff]  ;;  %v298_v5 = vmul.f32 0.001953125, %v296_v3  ;;  %v1142_v22 = vshrl.u32 %v251_v21, 7  ;;  %v353_v34 = vsel %vm310_vm1, 1, %v1036_v2 }
   0x4   :  { %v299_v6 = vmul.f32 0.001953125, %v297_v4  ;;  %v303_v13 = vld [vmem:[%s1606_s10] sm:$0xff]  ;;  %s1043_s10 = smov 64  }
   0x5   :  { %v300_v7 = vmul.f32 %v298_v5, %v298_v5  ;;  %v307_v16 = vld [vmem:[%s1607_s11] sm:$0xff]  ;;  %v1145_v23 = vsub.s32 0, %v1142_v22  ;;  %v261_v25 = vsub.s32 2, %v1142_v22  ;;  %v257_v26 = vsub.s32 1, %v1142_v22 }
   0x6   :  { %1027 = vset.pattern.permute.xlu1 %v1037_v8  ;;  %v747_v20 = vld [vmem:[%s1608_s7] sm:$0xff]  ;;  %v265_v29 = vsub.s32 3, %v1142_v22  ;;  %v269_v44 = vsub.s32 4, %v1142_v22  ;;  %v273_v3 = vsub.s32 5, %v1142_v22 }
   0x7   :  { %v301_v9 = vsub.f32 %v299_v6, %v300_v7  ;;  %531 = vperm.xlu1 %1027, %v430_v1   ;;  %v1150_v24 = vld [vmem:[%s1609_s4] sm:$0xff]  ;;  %v367_v41 = vrot.slane %v353_v34, %v1145_v23 }
   0x8   :  { %v254_v27 = vrot.slane %v1150_v24, %v1145_v23  ;;  %v262_v30 = vrot.slane %v1150_v24, %v261_v25  ;;  %v258_v31 = vrot.slane %v1150_v24, %v257_v26  ;;  %v266_v32 = vrot.slane %v1150_v24, %v265_v29  ;;  %v235_v35 = vld [vmem:[%s1611_s1] sm:$0xff] }
   0x9   :  { %v302_v10 = vmax.f32 %v301_v9, 0.0  ;;  %v1012_v40 = vld [vmem:[%s1612_s0 + $0x40] sm:$0xff]  ;;  %vm408_vm6 = vcmp.eq.s32.totalorder %v367_v41, 1  ;;  %v270_v54 = vrot.slane %v1150_v24, %v269_v44 }
   0xa   :  { %vm311_vm0 = vcmp.gt.f32.partialorder %v254_v27, 0.5  ;;  %vm313_vm2 = vcmp.gt.f32.partialorder %v262_v30, 0.5  ;;  %vm312_vm3 = vcmp.gt.f32.partialorder %v258_v31, 0.5  ;;  %vm314_vm4 = vcmp.gt.f32.partialorder %v266_v32, 0.5  ;;  %v244_v8 = vld [vmem:[%s1613_s2] sm:$0xff]  ;;  %s1041_s2 = smov 32  }
   0xb   :  { %v304_v11 = vadd.f32 1e-05, %v302_v10  ;;  %1030 = vset.pattern.permute.xlu1 %v1038_v12  ;;  %v354_v33 = vsel %vm311_vm0, 1, %v1036_v2  ;;  %v356_v36 = vsel %vm313_vm2, 1, %v1036_v2  ;;  %v355_v37 = vsel %vm312_vm3, 1, %v1036_v2  ;;  %v240_v31 = vld [vmem:[%s1611_s1 + $0x28] sm:$0xff] }
   0xc   :  { %674 = vperm.xlu1 %1030, %v430_v1   ;;  %v371_v39 = vrot.slane %v354_v33, %v1145_v23  ;;  %v379_v45 = vrot.slane %v356_v36, %v1145_v23  ;;  %v375_v46 = vrot.slane %v355_v37, %v1145_v23  ;;  %v357_v47 = vsel %vm314_vm4, 1, %v1036_v2 }
   0xd   :  { %1033 = vrsqrt.f32 %v304_v11  ;;  %v383_v59 = vrot.slane %v357_v47, %v1145_v23  ;;  %vm315_vm9 = vcmp.gt.f32.partialorder %v270_v54, 0.5  ;;  %v239_v11 = vld [vmem:[%s1611_s1 + $0x20] sm:$0xff]  ;;  %v274_v12 = vrot.slane %v1150_v24, %v273_v3 }
   0xe   :  { %vm409_vm5 = vcmp.eq.s32.totalorder %v371_v39, 1  ;;  %vm411_vm7 = vcmp.eq.s32.totalorder %v379_v45, 1  ;;  %vm410_vm8 = vcmp.eq.s32.totalorder %v375_v46, 1  ;;  %v358_v7 = vsel %vm315_vm9, 1, %v1036_v2 }
   0xf   :  { %vm412_vm10 = vcmp.eq.s32.totalorder %v383_v59, 1  ;;  %vm316_vm11 = vcmp.gt.f32.partialorder %v274_v12, 0.5  ;;  %vm717_vm9 = vcmask 523264  }
  0x10   :  { %1031 = vset.pattern.permute.xlu1 %v1036_v2  ;;  %v359_v27 = vsel %vm316_vm11, 1, %v1036_v2  ;;  %vm803_vm11 = vcmask 785408  }
  0x11   :  { %433 = vperm.xlu1 %1031, %v430_v1   ;;  %v391_v34 = vrot.slane %v359_v27, %v1145_v23 }
  0x13   :  { %vm414_vm13 = vcmp.eq.s32.totalorder %v391_v34, 1 }
  0x17   :  { %v1034_v14 = vpop.eup %1033 }
  0x18   :  { %v306_v15 = vmul.f32 %v1034_v14, %v303_v13  ;;  %v387_v14 = vrot.slane %v358_v7, %v1145_v23 }
  0x1a   :  { %323 = vperm.xlu0 %1028, %v306_v15   ;;  %v308_v17 = vmul.f32 %v306_v15, %v298_v5  ;;  %vm413_vm12 = vcmp.eq.s32.totalorder %v387_v14, 1 }
  0x1c   :  { %v309_v18 = vsub.f32 %v307_v16, %v308_v17 }
  0x1e   :  { %339 = vperm.xlu0 %1028, %v309_v18  }
  0x22   :  { %1029 = vset.pattern.permute.xlu0 %v1039_v19 }
  0x23   :  { %600 = vperm.xlu0 %1029, %v430_v1  }
  0x27   :  { %1032 = vset.pattern.permute.xlu0 %v1036_v2 }
  0x28   :  { %750 = vperm.xlu0 %1032, %v747_v20  }
  0x81   :  { %v1210_v60 = vpop.permute.xlu1 %457 }
  0x86   :  { %v1249_v16 = vpop.permute.xlu1 %531 }
  0x99   :  { %v1176_v38 = vpop.permute.xlu0 %323 }
  0x9a   :  { %v327_v48 = vmul.f32 %v1176_v38, %v235_v35  ;;  %v326_v49 = vmul.f32 %v1012_v40, %v1176_v38  ;;  %v329_v50 = vmul.f32 %v1176_v38, %v237_v42  ;;  %v328_v51 = vmul.f32 %v1176_v38, %v236_v43 }
  0x9b   :  { %v330_v63 = vmul.f32 %v1176_v38, %v238_v53  ;;  %v336_v15 = vmul.f32 %v1176_v38, %v244_v8  ;;  %v331_v17 = vmul.f32 %v1176_v38, %v239_v11  ;;  %v332_v35 = vmul.f32 %v1176_v38, %v240_v31  ;;  %v1014_v11 = vld [vmem:[%s1609_s4 + $0x8] ss:$0 sm:$0xff] }
  0x9c   :  { %v277_v42 = vsub.s32 6, %v1142_v22  ;;  %vm319_vm1 = vcmp.gt.f32.partialorder %v1014_v11, 0.5 }
  0x9d   :  { %v1197_v52 = vpop.permute.xlu0 %339 }
  0x9e   :  { %v343_v55 = vadd.f32 %v1197_v52, %v327_v48  ;;  %v342_v56 = vadd.f32 %v1197_v52, %v326_v49  ;;  %v345_v57 = vadd.f32 %v1197_v52, %v329_v50  ;;  %v344_v58 = vadd.f32 %v1197_v52, %v328_v51  ;;  %v1310_v51 = vpop.permute.xlu1 %674 }
  0x9f   :  { %v346_v6 = vadd.f32 %v1197_v52, %v330_v63  ;;  %v1257_v20 = vadd.f32 %v1197_v52, %v336_v15  ;;  %v347_v21 = vadd.f32 %v1197_v52, %v331_v17  ;;  %v348_v39 = vadd.f32 %v1197_v52, %v332_v35  ;;  %v248_v35 = vld [vmem:[%s1614_s5] sm:$0x1] }
  0xa0   :  { %v1212_v61 = vsel %vm409_vm5, %v343_v55, 0.0  ;;  %v1214_v62 = vsel %vm408_vm6, %v342_v56, 0.0  ;;  %v1222_v4 = vsel %vm411_vm7, %v345_v57, 0.0  ;;  %v1224_v5 = vsel %vm410_vm8, %v344_v58, 0.0  ;;  %v241_v56 = vld [vmem:[%s1611_s1 + $0x30] sm:$0xff] }
  0xa1   :  { %v461_v0 = vmul.f32 %v1210_v60, %v1212_v61  ;;  %v460_v1 = vmul.f32 %v1210_v60, %v1214_v62  ;;  %v463_v9 = vmul.f32 %v1210_v60, %v1222_v4  ;;  %v462_v10 = vmul.f32 %v1210_v60, %v1224_v5 }
  0xa2   :  { %v1243_v13 = vsel %vm412_vm10, %v346_v6, 0.0  ;;  %v534_v18 = vmul.f32 %v1249_v16, %v1212_v61  ;;  %v536_v28 = vmul.f32 %v1249_v16, %v1222_v4  ;;  %v535_v30 = vmul.f32 %v1249_v16, %v1224_v5  ;;  %v1270_v32 = vpop.permute.xlu0 %600 }
  0xa3   :  { %482 = vrot.lane.b32.xlu1 %v461_v0, %s1040_s15  ;;  %480 = vrot.lane.b32.xlu0 %v460_v1, %s1040_s15  ;;  %v464_v19 = vmul.f32 %v1210_v60, %v1243_v13  ;;  %v1272_v33 = vsel %vm413_vm12, %v347_v21, 0.0  ;;  %v603_v37 = vmul.f32 %v1270_v32, %v1212_v61  ;;  %v537_v40 = vmul.f32 %v1249_v16, %v1243_v13 }
  0xa4   :  { %v465_v36 = vmul.f32 %v1210_v60, %v1272_v33  ;;  %v605_v41 = vmul.f32 %v1270_v32, %v1222_v4  ;;  %v1290_v43 = vsel %vm414_vm13, %v348_v39, 0.0  ;;  %v604_v45 = vmul.f32 %v1270_v32, %v1224_v5 }
  0xa5   :  { %v466_v46 = vmul.f32 %v1210_v60, %v1290_v43  ;;  %v278_v47 = vrot.slane %v1150_v24, %v277_v42  ;;  %v606_v48 = vmul.f32 %v1270_v32, %v1243_v13  ;;  %v607_v49 = vmul.f32 %v1270_v32, %v1272_v33 }
  0xa6   :  { %v281_v50 = vsub.s32 7, %v1142_v22  ;;  %v538_v54 = vmul.f32 %v1249_v16, %v1272_v33  ;;  %v678_v55 = vmul.f32 %v1310_v51, %v1224_v5  ;;  %v333_v59 = vmul.f32 %v1176_v38, %v241_v56 }
  0xa7   :  { %486 = vrot.lane.b32.xlu1 %v463_v9, %s1040_s15  ;;  %484 = vrot.lane.b32.xlu0 %v462_v10, %s1040_s15  ;;  %vm317_vm14 = vcmp.gt.f32.partialorder %v278_v47, 0.5  ;;  %v677_v63 = vmul.f32 %v1310_v51, %v1212_v61  ;;  %v680_v0 = vmul.f32 %v1310_v51, %v1243_v13  ;;  %v679_v7 = vmul.f32 %v1310_v51, %v1222_v4  ;;  %v242_v9 = vld [vmem:[%s1611_s1 + $0x38] sm:$0xff] }
  0xa8   :  { %v360_v53 = vsel %vm317_vm14, 1, %v1036_v2  ;;  %v282_v57 = vrot.slane %v1150_v24, %v281_v50  ;;  %v349_v1 = vadd.f32 %v1197_v52, %v333_v59  ;;  %v539_v8 = vmul.f32 %v1249_v16, %v1290_v43 }
  0xa9   :  { %v395_v58 = vrot.slane %v360_v53, %v1145_v23  ;;  %v334_v14 = vmul.f32 %v1176_v38, %v242_v9  ;;  %v681_v17 = vmul.f32 %v1310_v51, %v1272_v33  ;;  %v608_v21 = vmul.f32 %v1270_v32, %v1290_v43 }
  0xaa   :  { %vm318_vm15 = vcmp.gt.f32.partialorder %v282_v57, 0.5  ;;  %vm320_vm4 = vcmp.gt.f32.partialorder %v248_v35, 0.5  ;;  %vm500_vm6 = vcmask 654336   ;;  %vm643_vm7 = vcmask 916480  }
  0xab   :  { %552 = vrot.lane.b32.xlu1 %v534_v18, %s1041_s2  ;;  %488 = vrot.lane.b32.xlu0 %v464_v19, %s1040_s15  ;;  %vm415_vm0 = vcmp.eq.s32.totalorder %v395_v58, 1  ;;  %v361_v6 = vsel %vm318_vm15, 1, %v1036_v2  ;;  %v350_v18 = vadd.f32 %v1197_v52, %v334_v14  ;;  %v362_v19 = vsel %vm319_vm1, 1, %v1036_v2 }
  0xac   :  { %v1342_v10 = vsel %vm415_vm0, %v349_v1, 0.0  ;;  %v399_v12 = vrot.slane %v361_v6, %v1145_v23  ;;  %v403_v31 = vrot.slane %v362_v19, %v1145_v23  ;;  %vm570_vm8 = vcmask 261120  }
  0xad   :  { %v467_v15 = vmul.f32 %v1210_v60, %v1342_v10  ;;  %v540_v27 = vmul.f32 %v1249_v16, %v1342_v10  ;;  %vm895_vm10 = vcmask 7168   ;;  %vm833_vm12 = vcmp.gt.f32.partialorder %v1150_v24, 0.5 }
  0xae   :  { %vm416_vm2 = vcmp.eq.s32.totalorder %v399_v12, 1  ;;  %vm417_vm3 = vcmp.eq.s32.totalorder %v403_v31, 1 }
  0xaf   :  { %556 = vrot.lane.b32.xlu1 %v536_v28, %s1041_s2  ;;  %554 = vrot.lane.b32.xlu0 %v535_v30, %s1041_s2  ;;  %v243_v28 = vld [vmem:[%s1611_s1 + $0x40] sm:$0xff]  ;;  %v1366_v30 = vsel %vm416_vm2, %v350_v18, 0.0  ;;  %s1044_s1 = smov 96  }
  0xb0   :  { %v335_v34 = vmul.f32 %v1176_v38, %v243_v28  ;;  %v609_v38 = vmul.f32 %v1270_v32, %v1342_v10 }
  0xb2   :  { %v351_v39 = vadd.f32 %v1197_v52, %v335_v34 }
  0xb3   :  { %490 = vrot.lane.b32.xlu1 %v465_v36, %s1040_s15  ;;  %623 = vrot.lane.b32.xlu0 %v603_v37, %s1042_s19  ;;  %v468_v36 = vmul.f32 %v1210_v60, %v1366_v30  ;;  %v682_v37 = vmul.f32 %v1310_v51, %v1290_v43 }
  0xb7   :  { %558 = vrot.lane.b32.xlu1 %v537_v40, %s1041_s2  ;;  %627 = vrot.lane.b32.xlu0 %v605_v41, %s1042_s19  ;;  %v541_v40 = vmul.f32 %v1249_v16, %v1366_v30  ;;  %v1386_v41 = vsel %vm417_vm3, %v351_v39, 0.0 }
  0xb8   :  { %v469_v52 = vmul.f32 %v1210_v60, %v1386_v41  ;;  %v542_v53 = vmul.f32 %v1249_v16, %v1386_v41  ;;  %v1418_v16 = vpop.permute.xlu0 %750 }
  0xbb   :  { %625 = vrot.lane.b32.xlu1 %v604_v45, %s1042_s19  ;;  %492 = vrot.lane.b32.xlu0 %v466_v46, %s1040_s15  ;;  %v363_v45 = vsel %vm320_vm4, 1, %v1036_v2  ;;  %v683_v46 = vmul.f32 %v1310_v51, %v1342_v10 }
  0xbc   :  { %v407_v47 = vrot.slane %v363_v45, %v1145_v23 }
  0xbe   :  { %vm418_vm5 = vcmp.eq.s32.totalorder %v407_v47, 1 }
  0xbf   :  { %629 = vrot.lane.b32.xlu1 %v606_v48, %s1042_s19  ;;  %631 = vrot.lane.b32.xlu0 %v607_v49, %s1042_s19  ;;  %v610_v48 = vmul.f32 %v1270_v32, %v1366_v30  ;;  %v611_v49 = vmul.f32 %v1270_v32, %v1386_v41  ;;  %v429_v60 = vsel %vm418_vm5, %v1257_v20, 0.0  ;;  %v685_v20 = vmul.f32 %v1310_v51, %v1386_v41 }
  0xc0   :  { %v686_v56 = vmul.f32 %v1310_v51, %v429_v60 }
  0xc3   :  { %560 = vrot.lane.b32.xlu1 %v538_v54, %s1041_s2  ;;  %699 = vrot.lane.b32.xlu0 %v678_v55, %s1043_s10  ;;  %v612_v54 = vmul.f32 %v1270_v32, %v429_v60  ;;  %v684_v55 = vmul.f32 %v1310_v51, %v1366_v30  ;;  %v1420_v32 = vpop.permute.xlu1 %433 }
  0xc4   :  { %v436_v19 = vmul.f32 %v1420_v32, %v1214_v62  ;;  %v439_v60 = vmul.f32 %v1420_v32, %v1222_v4 }
  0xc7   :  { %697 = vrot.lane.b32.xlu1 %v677_v63, %s1043_s10  ;;  %703 = vrot.lane.b32.xlu0 %v680_v0, %s1043_s10 }
  0xcb   :  { %701 = vrot.lane.b32.xlu1 %v679_v7, %s1043_s10  ;;  %562 = vrot.lane.b32.xlu0 %v539_v8, %s1041_s2 }
  0xcf   :  { %494 = vrot.lane.b32.xlu1 %v467_v15, %s1040_s15  ;;  %705 = vrot.lane.b32.xlu0 %v681_v17, %s1043_s10 }
  0xd3   :  { %633 = vrot.lane.b32.xlu1 %v608_v21, %s1042_s19  ;;  %564 = vrot.lane.b32.xlu0 %v540_v27, %s1041_s2 }
  0xd7   :  { %496 = vrot.lane.b32.xlu1 %v468_v36, %s1040_s15  ;;  %707 = vrot.lane.b32.xlu0 %v682_v37, %s1043_s10  ;;  %v437_v36 = vmul.f32 %v1420_v32, %v1212_v61  ;;  %v438_v37 = vmul.f32 %v1420_v32, %v1224_v5 }
  0xdb   :  { %635 = vrot.lane.b32.xlu1 %v609_v38, %s1042_s19  ;;  %566 = vrot.lane.b32.xlu0 %v541_v40, %s1041_s2 }
  0xdf   :  { %498 = vrot.lane.b32.xlu1 %v469_v52, %s1040_s15  ;;  %709 = vrot.lane.b32.xlu0 %v683_v46, %s1043_s10 }
  0xe3   :  { %637 = vrot.lane.b32.xlu1 %v610_v48, %s1042_s19  ;;  %639 = vrot.lane.b32.xlu0 %v611_v49, %s1042_s19 }
  0xe7   :  { %568 = vrot.lane.b32.xlu1 %v542_v53, %s1041_s2  ;;  %641 = vrot.lane.b32.xlu0 %v612_v54, %s1042_s19 }
  0xeb   :  { %711 = vrot.lane.b32.xlu1 %v684_v55, %s1043_s10  ;;  %715 = vrot.lane.b32.xlu0 %v686_v56, %s1043_s10 }
  0xef   :  { %713 = vrot.lane.b32.xlu1 %v685_v20, %s1043_s10 }
 0x115   :  { %v483_v57 = vpop.permute.xlu1 %482  ;;  %v481_v58 = vpop.permute.xlu0 %480 }
 0x116   :  { %v501_v18 = vsel %vm500_vm6, %v481_v58, %v483_v57 }
 0x117   :  { %v520_v21 = vadd.f32 %v501_v18, %v436_v19 }
 0x119   :  { %v487_v59 = vpop.permute.xlu1 %486  ;;  %v485_v63 = vpop.permute.xlu0 %484 }
 0x11a   :  { %v502_v31 = vsel %vm500_vm6, %v483_v57, %v485_v63  ;;  %v503_v34 = vsel %vm500_vm6, %v485_v63, %v487_v59 }
 0x11b   :  { %v521_v40 = vadd.f32 %v502_v31, %v437_v36  ;;  %v522_v45 = vadd.f32 %v503_v34, %v438_v37  ;;  %v440_v36 = vmul.f32 %v1420_v32, %v1243_v13 }
 0x11d   :  { %v553_v0 = vpop.permute.xlu1 %552  ;;  %v1422_v1 = vpop.permute.xlu0 %488 }
 0x11e   :  { %v589_v39 = vadd.f32 %v553_v0, %v520_v21  ;;  %v504_v48 = vsel %vm500_vm6, %v487_v59, %v1422_v1 }
 0x11f   :  { %v523_v20 = vadd.f32 %v504_v48, %v439_v60  ;;  %v441_v60 = vmul.f32 %v1420_v32, %v1272_v33 }
 0x121   :  { %v557_v6 = vpop.permute.xlu1 %556  ;;  %v555_v7 = vpop.permute.xlu0 %554 }
 0x122   :  { %v571_v62 = vsel %vm570_vm8, %v553_v0, %v555_v7  ;;  %v572_v38 = vsel %vm570_vm8, %v555_v7, %v557_v6 }
 0x123   :  { %v590_v53 = vadd.f32 %v571_v62, %v521_v40  ;;  %v591_v54 = vadd.f32 %v572_v38, %v522_v45 }
 0x125   :  { %v1424_v8 = vpop.permute.xlu1 %490  ;;  %v624_v9 = vpop.permute.xlu0 %623 }
 0x129   :  { %v1426_v11 = vpop.permute.xlu1 %558  ;;  %v628_v51 = vpop.permute.xlu0 %627 }
 0x12a   :  { %v573_v56 = vsel %vm570_vm8, %v557_v6, %v1426_v11 }
 0x12d   :  { %v626_v12 = vpop.permute.xlu1 %625  ;;  %v1428_v14 = vpop.permute.xlu0 %492 }
 0x12e   :  { %v644_v35 = vsel %vm643_vm7, %v624_v9, %v626_v12  ;;  %v645_v49 = vsel %vm643_vm7, %v626_v12, %v628_v51 }
 0x12f   :  { %v663_v52 = vadd.f32 %v644_v35, %v589_v39  ;;  %v664_v57 = vadd.f32 %v645_v49, %v590_v53 }
 0x131   :  { %v630_v15 = vpop.permute.xlu1 %629  ;;  %v1430_v17 = vpop.permute.xlu0 %631 }
 0x132   :  { %v646_v61 = vsel %vm643_vm7, %v628_v51, %v630_v15  ;;  %v647_v7 = vsel %vm643_vm7, %v630_v15, %v1430_v17  ;;  %v592_v51 = vadd.f32 %v573_v56, %v523_v20  ;;  %v505_v15 = vsel %vm500_vm6, %v1422_v1, %v1424_v8 }
 0x133   :  { %v665_v58 = vadd.f32 %v646_v61, %v591_v54  ;;  %v524_v40 = vadd.f32 %v505_v15, %v440_v36  ;;  %v444_v15 = vmul.f32 %v1420_v32, %v1366_v30 }
 0x134   :  { %v666_v21 = vadd.f32 %v647_v7, %v592_v51 }
 0x135   :  { %v1435_v27 = vpop.permute.xlu1 %560  ;;  %v700_v28 = vpop.permute.xlu0 %699 }
 0x136   :  { %v574_v38 = vsel %vm570_vm8, %v1426_v11, %v1435_v27  ;;  %v506_v11 = vsel %vm500_vm6, %v1424_v8, %v1428_v14 }
 0x137   :  { %v593_v13 = vadd.f32 %v574_v38, %v524_v40  ;;  %v525_v54 = vadd.f32 %v506_v11, %v441_v60 }
 0x139   :  { %v698_v46 = vpop.permute.xlu1 %697  ;;  %v704_v47 = vpop.permute.xlu0 %703 }
 0x13a   :  { %v718_v5 = vsel %vm717_vm9, %v698_v46, %v700_v28 }
 0x13b   :  { %v737_v55 = vadd.f32 %v718_v5, %v663_v52 }
 0x13d   :  { %v702_v63 = vpop.permute.xlu1 %701  ;;  %v563_v59 = vpop.permute.xlu0 %562  ;;  %v753_v0 = vadd.f32 %v1418_v16, %v737_v55 }
 0x13e   :  { %v719_v9 = vsel %vm717_vm9, %v700_v28, %v702_v63  ;;  %v720_v4 = vsel %vm717_vm9, %v702_v63, %v704_v47 }
 0x13f   :  { %v738_v12 = vadd.f32 %v719_v9, %v664_v57  ;;  %v739_v18 = vadd.f32 %v720_v4, %v665_v58  ;;  %v763_v19 = vmax.f32 %v753_v0, 0.0 }
 0x141   :  { %v495_v6 = vpop.permute.xlu1 %494  ;;  %v706_v31 = vpop.permute.xlu0 %705  ;;  %783 = vrot.lane.b32.xlu1 %v763_v19, %s1044_s1  ;;  %v754_v34 = vadd.f32 %v1418_v16, %v738_v12  ;;  %v755_v35 = vadd.f32 %v1418_v16, %v739_v18  ;;  %v442_v18 = vmul.f32 %v1420_v32, %v1290_v43  ;;  %v445_v19 = vmul.f32 %v1420_v32, %v1386_v41 }
 0x142   :  { %v721_v28 = vsel %vm717_vm9, %v704_v47, %v706_v31  ;;  %v507_v12 = vsel %vm500_vm6, %v1428_v14, %v495_v6 }
 0x143   :  { %v740_v37 = vadd.f32 %v721_v28, %v666_v21  ;;  %v764_v39 = vmax.f32 %v754_v34, 0.0  ;;  %v765_v62 = vmax.f32 %v755_v35, 0.0  ;;  %v526_v35 = vadd.f32 %v507_v12, %v442_v18 }
 0x145   :  { %v634_v45 = vpop.permute.xlu1 %633  ;;  %785 = vrot.lane.b32.xlu0 %v764_v39, %s1044_s1  ;;  %v565_v52 = vpop.permute.xlu0 %564  ;;  %787 = vrot.lane.b32.xlu1 %v765_v62, %s1044_s1  ;;  %v756_v1 = vadd.f32 %v1418_v16, %v740_v37 }
 0x146   :  { %v648_v46 = vsel %vm643_vm7, %v1430_v17, %v634_v45  ;;  %v575_v17 = vsel %vm570_vm8, %v1435_v27, %v563_v59 }
 0x147   :  { %v766_v47 = vmax.f32 %v756_v1, 0.0  ;;  %v667_v48 = vadd.f32 %v648_v46, %v593_v13  ;;  %v594_v58 = vadd.f32 %v575_v17, %v525_v54 }
 0x149   :  { %v497_v49 = vpop.permute.xlu1 %496  ;;  %789 = vrot.lane.b32.xlu0 %v766_v47, %s1044_s1  ;;  %v708_v61 = vpop.permute.xlu0 %707 }
 0x14a   :  { %v722_v5 = vsel %vm717_vm9, %v706_v31, %v708_v61  ;;  %v576_v31 = vsel %vm570_vm8, %v563_v59, %v565_v52  ;;  %v508_v14 = vsel %vm500_vm6, %v495_v6, %v497_v49  ;;  %v443_v59 = vmul.f32 %v1420_v32, %v1342_v10 }
 0x14b   :  { %v741_v53 = vadd.f32 %v722_v5, %v667_v48  ;;  %v595_v39 = vadd.f32 %v576_v31, %v526_v35 }
 0x14c   :  { %v527_v30 = vadd.f32 %v508_v14, %v443_v59 }
 0x14d   :  { %v636_v55 = vpop.permute.xlu1 %635  ;;  %v567_v56 = vpop.permute.xlu0 %566  ;;  %v757_v20 = vadd.f32 %v1418_v16, %v741_v53 }
 0x14e   :  { %v649_v57 = vsel %vm643_vm7, %v634_v45, %v636_v55  ;;  %v577_v40 = vsel %vm570_vm8, %v565_v52, %v567_v56 }
 0x14f   :  { %v767_v63 = vmax.f32 %v757_v20, 0.0  ;;  %v668_v0 = vadd.f32 %v649_v57, %v594_v58  ;;  %v596_v47 = vadd.f32 %v577_v40, %v527_v30 }
 0x151   :  { %v499_v8 = vpop.permute.xlu1 %498  ;;  %v710_v7 = vpop.permute.xlu0 %709  ;;  %791 = vrot.lane.b32.xlu1 %v767_v63, %s1044_s1 }
 0x152   :  { %v723_v33 = vsel %vm717_vm9, %v708_v61, %v710_v7  ;;  %v509_v34 = vsel %vm500_vm6, %v497_v49, %v499_v8  ;;  %v529_v28 = vadd.f32 %v499_v8, %v445_v19  ;;  %v1045_v8 = vmov 0.0  }
 0x153   :  { %v742_v9 = vadd.f32 %v723_v33, %v668_v0  ;;  %v528_v62 = vadd.f32 %v509_v34, %v444_v15  ;;  %896 = vst.msk [vmem:[%s1615_s13] sm:$0xff] %vm895_vm10, %v1045_v8  ;;  %897 = vst.msk [vmem:[%s1617_s14] sm:$0xff] %vm895_vm10, %v1045_v8 }
 0x155   :  { %v638_v4 = vpop.permute.xlu1 %637  ;;  %v640_v51 = vpop.permute.xlu0 %639  ;;  %v758_v27 = vadd.f32 %v1418_v16, %v742_v9 }
 0x156   :  { %v650_v43 = vsel %vm643_vm7, %v636_v55, %v638_v4  ;;  %v651_v13 = vsel %vm643_vm7, %v638_v4, %v640_v51 }
 0x157   :  { %v768_v21 = vmax.f32 %v758_v27, 0.0  ;;  %v669_v45 = vadd.f32 %v650_v43, %v595_v39  ;;  %v670_v5 = vadd.f32 %v651_v13, %v596_v47  ;;  %v832_v43 = vld [vmem:[%s1609_s4 + $0x8] sm:$0x1] }
 0x158   :  { %vm834_vm2 = vcmp.gt.f32.partialorder %v832_v43, 0.5 }
 0x159   :  { %v569_v36 = vpop.permute.xlu1 %568  ;;  %793 = vrot.lane.b32.xlu0 %v768_v21, %s1044_s1  ;;  %v642_v41 = vpop.permute.xlu0 %641  ;;  %v835_v21 = vsel %vm833_vm12, 1, %v1036_v2  ;;  %v836_v13 = vsel %vm834_vm2, 1, %v1036_v2 }
 0x15a   :  { %v578_v37 = vsel %vm570_vm8, %v567_v56, %v569_v36  ;;  %v598_v38 = vadd.f32 %v569_v36, %v529_v28  ;;  %v652_v61 = vsel %vm643_vm7, %v640_v51, %v642_v41  ;;  %v840_v31 = vrot.slane %v835_v21, %v1145_v23 }
 0x15b   :  { %v597_v1 = vadd.f32 %v578_v37, %v528_v62  ;;  %v844_v34 = vrot.slane %v835_v21, %v257_v26  ;;  %v848_v35 = vrot.slane %v835_v21, %v261_v25  ;;  %v852_v24 = vrot.slane %v835_v21, %v265_v29 }
 0x15c   :  { %v672_v48 = vadd.f32 %v642_v41, %v598_v38  ;;  %vm873_vm13 = vcmp.eq.s32.totalorder %v840_v31, 1  ;;  %v856_v36 = vrot.slane %v835_v21, %v269_v44  ;;  %v860_v41 = vrot.slane %v835_v21, %v273_v3 }
 0x15d   :  { %v712_v46 = vpop.permute.xlu1 %711  ;;  %v716_v11 = vpop.permute.xlu0 %715  ;;  %v671_v10 = vadd.f32 %v652_v61, %v597_v1  ;;  %vm874_vm14 = vcmp.eq.s32.totalorder %v844_v34, 1  ;;  %vm875_vm15 = vcmp.eq.s32.totalorder %v848_v35, 1  ;;  %vm876_vm0 = vcmp.eq.s32.totalorder %v852_v24, 1 }
 0x15e   :  { %v724_v6 = vsel %vm717_vm9, %v710_v7, %v712_v46  ;;  %v746_v17 = vadd.f32 %v716_v11, %v672_v48  ;;  %vm877_vm1 = vcmp.eq.s32.totalorder %v856_v36, 1  ;;  %v864_v44 = vrot.slane %v835_v21, %v277_v42 }
 0x15f   :  { %v743_v49 = vadd.f32 %v724_v6, %v669_v45  ;;  %v868_v40 = vrot.slane %v835_v21, %v281_v50  ;;  %vm878_vm3 = vcmp.eq.s32.totalorder %v860_v41, 1  ;;  %v872_v61 = vrot.slane %v836_v13, %v1145_v23 }
 0x160   :  { %v762_v58 = vadd.f32 %v1418_v16, %v746_v17  ;;  %vm879_vm4 = vcmp.eq.s32.totalorder %v864_v44, 1 }
 0x161   :  { %v714_v32 = vpop.permute.xlu1 %713  ;;  %v759_v60 = vadd.f32 %v1418_v16, %v743_v49  ;;  %vm880_vm5 = vcmp.eq.s32.totalorder %v868_v40, 1  ;;  %vm881_vm6 = vcmp.eq.s32.totalorder %v872_v61, 1 }
 0x162   :  { %v725_v52 = vsel %vm717_vm9, %v712_v46, %v714_v32  ;;  %v726_v53 = vsel %vm717_vm9, %v714_v32, %v716_v11  ;;  %v772_v7 = vmax.f32 %v762_v58, 0.0 }
 0x163   :  { %v744_v54 = vadd.f32 %v725_v52, %v670_v5  ;;  %v745_v55 = vadd.f32 %v726_v53, %v671_v10  ;;  %v769_v56 = vmax.f32 %v759_v60, 0.0 }
 0x165   :  { %795 = vrot.lane.b32.xlu1 %v769_v56, %s1044_s1  ;;  %v760_v20 = vadd.f32 %v1418_v16, %v744_v54  ;;  %v761_v57 = vadd.f32 %v1418_v16, %v745_v55 }
 0x167   :  { %v770_v63 = vmax.f32 %v760_v20, 0.0  ;;  %v771_v0 = vmax.f32 %v761_v57, 0.0 }
 0x169   :  { %797 = vrot.lane.b32.xlu0 %v770_v63, %s1044_s1  ;;  %799 = vrot.lane.b32.xlu1 %v771_v0, %s1044_s1 }
 0x16d   :  { %801 = vrot.lane.b32.xlu0 %v772_v7, %s1044_s1 }
 0x1b3   :  { %v784_v33 = vpop.permute.xlu1 %783 }
 0x1b7   :  { %v786_v9 = vpop.permute.xlu0 %785  ;;  %v788_v16 = vpop.permute.xlu1 %787 }
 0x1b8   :  { %v804_v4 = vsel %vm803_vm11, %v784_v33, %v786_v9  ;;  %v805_v51 = vsel %vm803_vm11, %v786_v9, %v788_v16 }
 0x1b9   :  { %822 = vst [vmem:[%s1616_s12] sm:$0xff] %v804_v4  ;;  %823 = vst [vmem:[%s1616_s12 + $0x8] sm:$0xff] %v805_v51  ;;  %v882_v26 = vsel %vm873_vm13, %v804_v4, 0.0  ;;  %v883_v14 = vsel %vm874_vm14, %v805_v51, 0.0  ;;  %v912_v51 = vld [vmem:[%s1617_s14] sm:$0xff] }
 0x1ba   :  { %v913_v37 = vmul.f32 %v882_v26, %v882_v26  ;;  %v914_v29 = vmul.f32 %v883_v14, %v883_v14  ;;  %v899_v59 = vadd.f32 %v883_v14, %v882_v26 }
 0x1bb   :  { %v790_v27 = vpop.permute.xlu0 %789 }
 0x1bc   :  { %v806_v12 = vsel %vm803_vm11, %v788_v16, %v790_v27  ;;  %v922_v30 = vadd.f32 %v914_v29, %v913_v37  ;;  %v898_v16 = vld [vmem:[%s1615_s13] sm:$0xff] }
 0x1bd   :  { %824 = vst [vmem:[%s1616_s12 + $0x10] sm:$0xff] %v806_v12  ;;  %v884_v25 = vsel %vm875_vm15, %v806_v12, 0.0 }
 0x1be   :  { %v915_v62 = vmul.f32 %v884_v25, %v884_v25  ;;  %v900_v45 = vadd.f32 %v899_v59, %v884_v25 }
 0x1c0   :  { %v923_v6 = vadd.f32 %v922_v30, %v915_v62 }
 0x1c3   :  { %v792_v18 = vpop.permute.xlu1 %791 }
 0x1c4   :  { %v807_v19 = vsel %vm803_vm11, %v790_v27, %v792_v18 }
 0x1c5   :  { %825 = vst [vmem:[%s1616_s12 + $0x18] sm:$0xff] %v807_v19  ;;  %v885_v39 = vsel %vm876_vm0, %v807_v19, 0.0 }
 0x1c6   :  { %v916_v1 = vmul.f32 %v885_v39, %v885_v39  ;;  %v901_v3 = vadd.f32 %v900_v45, %v885_v39 }
 0x1c8   :  { %v924_v22 = vadd.f32 %v923_v6, %v916_v1 }
 0x1cb   :  { %v794_v15 = vpop.permute.xlu0 %793 }
 0x1cc   :  { %v808_v28 = vsel %vm803_vm11, %v792_v18, %v794_v15 }
 0x1cd   :  { %826 = vst [vmem:[%s1616_s12 + $0x20] sm:$0xff] %v808_v28  ;;  %v886_v38 = vsel %vm877_vm1, %v808_v28, 0.0 }
 0x1ce   :  { %v917_v47 = vmul.f32 %v886_v38, %v886_v38  ;;  %v902_v50 = vadd.f32 %v901_v3, %v886_v38 }
 0x1d0   :  { %v925_v2 = vadd.f32 %v924_v22, %v917_v47 }
 0x1d7   :  { %v796_v46 = vpop.permute.xlu1 %795 }
 0x1d8   :  { %v809_v48 = vsel %vm803_vm11, %v794_v15, %v796_v46 }
 0x1d9   :  { %827 = vst [vmem:[%s1616_s12 + $0x28] sm:$0xff] %v809_v48  ;;  %v887_v42 = vsel %vm878_vm3, %v809_v48, 0.0 }
 0x1da   :  { %v918_v49 = vmul.f32 %v887_v42, %v887_v42  ;;  %v903_v10 = vadd.f32 %v902_v50, %v887_v42 }
 0x1db   :  { %v798_v11 = vpop.permute.xlu0 %797  ;;  %v800_v5 = vpop.permute.xlu1 %799 }
 0x1dc   :  { %v810_v32 = vsel %vm803_vm11, %v796_v46, %v798_v11  ;;  %v811_v60 = vsel %vm803_vm11, %v798_v11, %v800_v5  ;;  %v926_v17 = vadd.f32 %v925_v2, %v918_v49 }
 0x1dd   :  { %828 = vst [vmem:[%s1616_s12 + $0x30] sm:$0xff] %v810_v32  ;;  %v888_v52 = vsel %vm879_vm4, %v810_v32, 0.0  ;;  %829 = vst [vmem:[%s1616_s12 + $0x38] sm:$0xff] %v811_v60  ;;  %v889_v53 = vsel %vm880_vm5, %v811_v60, 0.0 }
 0x1de   :  { %v904_v23 = vadd.f32 %v903_v10, %v888_v52  ;;  %v919_v54 = vmul.f32 %v888_v52, %v888_v52  ;;  %v920_v56 = vmul.f32 %v889_v53, %v889_v53 }
 0x1df   :  { %v802_v55 = vpop.permute.xlu0 %801 }
 0x1e0   :  { %v812_v20 = vsel %vm803_vm11, %v800_v5, %v802_v55  ;;  %v905_v57 = vadd.f32 %v904_v23, %v889_v53  ;;  %v927_v58 = vadd.f32 %v926_v17, %v919_v54 }
 0x1e1   :  { %830 = vst [vmem:[%s1616_s12 + $0x40] sm:$0xff] %v812_v20  ;;  %v890_v63 = vsel %vm881_vm6, %v812_v20, 0.0 }
 0x1e2   :  { %v906_v0 = vadd.f32 %v905_v57, %v890_v63  ;;  %v921_v7 = vmul.f32 %v890_v63, %v890_v63  ;;  %v928_v33 = vadd.f32 %v927_v58, %v920_v56 }
 0x1e4   :  { %907 = vadd.xlane.f32.xlu1 %v906_v0  ;;  %v929_v9 = vadd.f32 %v928_v33, %v921_v7 }
 0x1e6   :  { %930 = vadd.xlane.f32.xlu0 %v929_v9 }
 0x271   :  { %v908_v4 = vpop.xlane.xlu1 %907 }
 0x272   :  { %v909_v27 = vadd.f32 %v908_v4, %v898_v16 }
 0x273   :  { %v931_v12 = vpop.xlane.xlu0 %930 }
 0x274   :  { %911 = vst.msk [vmem:[%s1615_s13] sm:$0xff] %vm895_vm10, %v909_v27  ;;  %v932_v18 = vadd.f32 %v931_v12, %v912_v51 }
 0x276   :  { %933 = vst.msk [vmem:[%s1617_s14] sm:$0xff] %vm895_vm10, %v932_v18 }

// kernel: lska11_forward.8
= control target key start
LH: loop header
LB: loop body
LE: loop exit
PB: predicated region body
PF: predicated region fallthrough
CT: control target
= control target key end

     0   :  { %v1035_v0 = vmov 1   ;;  %v1036_v2 = vmov 0   ;;  %v1037_v8 = vmov 2   ;;  %v1038_v12 = vmov 4   ;;  %s1040_s15 = smov 126   ;;  %s1042_s19 = smov 122   ;;  %s1591_s6 = inlined_call_operand.vmem [shape: f32[8,5], index: 6, kind: input, shape index: {}]   ;;  %s1592_s8 = inlined_call_operand.vmem [shape: f32[1,8,1], index: 8, kind: input, shape index: {}]   ;;  %s1593_s9 = inlined_call_operand.vmem [shape: f32[1,8,1], index: 9, kind: input, shape index: {}]   ;;  %s1594_s10 = inlined_call_operand.vmem [shape: f32[8,1], index: 10, kind: input, shape index: {}]   ;;  %s1595_s11 = inlined_call_operand.vmem [shape: f32[8,1], index: 11, kind: input, shape index: {}]   ;;  %s1596_s7 = inlined_call_operand.vmem [shape: f32[8,1], index: 7, kind: input, shape index: {}]   ;;  %s1597_s4 = inlined_call_operand.vmem [shape: f32[1,1,1152], index: 4, kind: input, shape index: {}, may-alias: {3,4,5}]   ;;  %s1598_s3 = inlined_call_operand.vmem [shape: f32[1,1,1152], index: 3, kind: input, shape index: {}, may-alias: {3,4,5}]   ;;  %s1599_s1 = inlined_call_operand.vmem [shape: f32[1,8,1152], index: 1, kind: input, shape index: {}, may-alias: {0,1,2}]   ;;  %s1600_s0 = inlined_call_operand.vmem [shape: f32[1,8,1152], index: 0, kind: input, shape index: {}, may-alias: {0,1,2}]   ;;  %s1601_s2 = inlined_call_operand.vmem [shape: f32[1,8,1152], index: 2, kind: input, shape index: {}, may-alias: {0,1,2}]   ;;  %s1602_s5 = inlined_call_operand.vmem [shape: f32[1,1,1152], index: 5, kind: input, shape index: {}, may-alias: {3,4,5}]   ;;  %s1603_s13 = inlined_call_operand.vmem [shape: f32[1,8,1], index: 13, kind: output, shape index: {1}]   ;;  %s1604_s12 = inlined_call_operand.vmem [shape: f32[1,8,1152], index: 12, kind: output, shape index: {0}]   ;;  %s1605_s14 = inlined_call_operand.vmem [shape: f32[1,8,1], index: 14, kind: output, shape index: {2}]  }
   0x1   :  { %1026 = vset.pattern.permute.xlu1 %v1035_v0  ;;  %v430_v1 = vld [vmem:[%s1591_s6] sm:$0xff]  ;;  %1028 = vset.pattern.permute.xlu0 %v1036_v2  ;;  %v1039_v19 = vmov 3   ;;  %v251_v21 = vlaneseq  ;;  %v1013_v28 = vld [vmem:[%s1598_s3 + $0x8] sm:$0x1]  ;;  %v237_v42 = vld [vmem:[%s1599_s1 + $0x10] sm:$0xff] }
   0x2   :  { %v296_v3 = vld [vmem:[%s1592_s8] sm:$0xff]  ;;  %457 = vperm.xlu1 %1026, %v430_v1   ;;  %vm310_vm1 = vcmp.gt.f32.partialorder %v1013_v28, 0.5  ;;  %v236_v43 = vld [vmem:[%s1599_s1 + $0x8] sm:$0xff]  ;;  %v238_v53 = vld [vmem:[%s1599_s1 + $0x18] sm:$0xff] }
   0x3   :  { %v297_v4 = vld [vmem:[%s1593_s9] sm:$0xff]  ;;  %v298_v5 = vmul.f32 0.001953125, %v296_v3  ;;  %v1142_v22 = vshrl.u32 %v251_v21, 7  ;;  %v353_v34 = vsel %vm310_vm1, 1, %v1036_v2 }
   0x4   :  { %v299_v6 = vmul.f32 0.001953125, %v297_v4  ;;  %v303_v13 = vld [vmem:[%s1594_s10] sm:$0xff]  ;;  %s1043_s10 = smov 120  }
   0x5   :  { %v300_v7 = vmul.f32 %v298_v5, %v298_v5  ;;  %v307_v16 = vld [vmem:[%s1595_s11] sm:$0xff]  ;;  %v1145_v23 = vsub.s32 0, %v1142_v22  ;;  %v261_v25 = vsub.s32 2, %v1142_v22  ;;  %v257_v26 = vsub.s32 1, %v1142_v22 }
   0x6   :  { %1027 = vset.pattern.permute.xlu1 %v1037_v8  ;;  %v747_v20 = vld [vmem:[%s1596_s7] sm:$0xff]  ;;  %v265_v29 = vsub.s32 3, %v1142_v22  ;;  %v269_v44 = vsub.s32 4, %v1142_v22 }
   0x7   :  { %v301_v9 = vsub.f32 %v299_v6, %v300_v7  ;;  %531 = vperm.xlu1 %1027, %v430_v1   ;;  %v1150_v24 = vld [vmem:[%s1597_s4] sm:$0xff]  ;;  %v367_v41 = vrot.slane %v353_v34, %v1145_v23 }
   0x8   :  { %v254_v27 = vrot.slane %v1150_v24, %v1145_v23  ;;  %v262_v30 = vrot.slane %v1150_v24, %v261_v25  ;;  %v258_v31 = vrot.slane %v1150_v24, %v257_v26  ;;  %v266_v32 = vrot.slane %v1150_v24, %v265_v29  ;;  %v235_v35 = vld [vmem:[%s1599_s1] sm:$0xff] }
   0x9   :  { %v302_v10 = vmax.f32 %v301_v9, 0.0  ;;  %v1012_v40 = vld [vmem:[%s1600_s0 + $0x40] sm:$0xff]  ;;  %vm408_vm6 = vcmp.eq.s32.totalorder %v367_v41, 1  ;;  %v270_v54 = vrot.slane %v1150_v24, %v269_v44 }
   0xa   :  { %vm311_vm0 = vcmp.gt.f32.partialorder %v254_v27, 0.5  ;;  %vm313_vm2 = vcmp.gt.f32.partialorder %v262_v30, 0.5  ;;  %vm312_vm3 = vcmp.gt.f32.partialorder %v258_v31, 0.5  ;;  %vm314_vm4 = vcmp.gt.f32.partialorder %v266_v32, 0.5  ;;  %v239_v9 = vld [vmem:[%s1599_s1 + $0x20] sm:$0xff] }
   0xb   :  { %v304_v11 = vadd.f32 1e-05, %v302_v10  ;;  %1030 = vset.pattern.permute.xlu1 %v1038_v12  ;;  %v354_v33 = vsel %vm311_vm0, 1, %v1036_v2  ;;  %v356_v36 = vsel %vm313_vm2, 1, %v1036_v2  ;;  %v355_v37 = vsel %vm312_vm3, 1, %v1036_v2 }
   0xc   :  { %674 = vperm.xlu1 %1030, %v430_v1   ;;  %v371_v39 = vrot.slane %v354_v33, %v1145_v23  ;;  %v379_v45 = vrot.slane %v356_v36, %v1145_v23  ;;  %v375_v46 = vrot.slane %v355_v37, %v1145_v23  ;;  %v357_v47 = vsel %vm314_vm4, 1, %v1036_v2 }
   0xd   :  { %1033 = vrsqrt.f32 %v304_v11  ;;  %v383_v59 = vrot.slane %v357_v47, %v1145_v23  ;;  %vm315_vm9 = vcmp.gt.f32.partialorder %v270_v54, 0.5  ;;  %v273_v10 = vsub.s32 5, %v1142_v22  ;;  %v244_v11 = vld [vmem:[%s1601_s2] sm:$0xff]  ;;  %s1041_s2 = smov 124   ;;  %v241_v54 = vld [vmem:[%s1599_s1 + $0x30] sm:$0xff] }
   0xe   :  { %vm409_vm5 = vcmp.eq.s32.totalorder %v371_v39, 1  ;;  %vm411_vm7 = vcmp.eq.s32.totalorder %v379_v45, 1  ;;  %vm410_vm8 = vcmp.eq.s32.totalorder %v375_v46, 1  ;;  %v358_v6 = vsel %vm315_vm9, 1, %v1036_v2 }
   0xf   :  { %vm412_vm10 = vcmp.eq.s32.totalorder %v383_v59, 1  ;;  %v277_v36 = vsub.s32 6, %v1142_v22  ;;  %v281_v47 = vsub.s32 7, %v1142_v22  ;;  %vm717_vm9 = vcmask 982016  }
  0x10   :  { %1031 = vset.pattern.permute.xlu1 %v1036_v2 }
  0x11   :  { %433 = vperm.xlu1 %1031, %v430_v1  }
  0x17   :  { %v1034_v14 = vpop.eup %1033 }
  0x18   :  { %v306_v15 = vmul.f32 %v1034_v14, %v303_v13  ;;  %v387_v13 = vrot.slane %v358_v6, %v1145_v23  ;;  %v242_v6 = vld [vmem:[%s1599_s1 + $0x38] sm:$0xff] }
  0x1a   :  { %323 = vperm.xlu0 %1028, %v306_v15   ;;  %v308_v17 = vmul.f32 %v306_v15, %v298_v5  ;;  %vm413_vm11 = vcmp.eq.s32.totalorder %v387_v13, 1 }
  0x1c   :  { %v309_v18 = vsub.f32 %v307_v16, %v308_v17 }
  0x1e   :  { %339 = vperm.xlu0 %1028, %v309_v18  }
  0x22   :  { %1029 = vset.pattern.permute.xlu0 %v1039_v19  ;;  %v274_v19 = vrot.slane %v1150_v24, %v273_v10 }
  0x23   :  { %600 = vperm.xlu0 %1029, %v430_v1  }
  0x24   :  { %vm316_vm12 = vcmp.gt.f32.partialorder %v274_v19, 0.5 }
  0x25   :  { %v359_v32 = vsel %vm316_vm12, 1, %v1036_v2  ;;  %vm833_vm12 = vcmp.gt.f32.partialorder %v1150_v24, 0.5 }
  0x26   :  { %v391_v37 = vrot.slane %v359_v32, %v1145_v23 }
  0x27   :  { %1032 = vset.pattern.permute.xlu0 %v1036_v2 }
  0x28   :  { %750 = vperm.xlu0 %1032, %v747_v20   ;;  %vm414_vm13 = vcmp.eq.s32.totalorder %v391_v37, 1  ;;  %v248_v37 = vld [vmem:[%s1602_s5] sm:$0x1]  ;;  %s1044_s5 = smov 4  }
  0x29   :  { %vm320_vm4 = vcmp.gt.f32.partialorder %v248_v37, 0.5 }
  0x81   :  { %v1210_v60 = vpop.permute.xlu1 %457 }
  0x86   :  { %v1245_v14 = vpop.permute.xlu1 %531 }
  0x99   :  { %v1176_v38 = vpop.permute.xlu0 %323 }
  0x9a   :  { %v327_v48 = vmul.f32 %v1176_v38, %v235_v35  ;;  %v326_v49 = vmul.f32 %v1012_v40, %v1176_v38  ;;  %v329_v50 = vmul.f32 %v1176_v38, %v237_v42  ;;  %v328_v51 = vmul.f32 %v1176_v38, %v236_v43  ;;  %v240_v35 = vld [vmem:[%s1599_s1 + $0x28] sm:$0xff] }
  0x9b   :  { %v330_v63 = vmul.f32 %v1176_v38, %v238_v53  ;;  %v331_v15 = vmul.f32 %v1176_v38, %v239_v9  ;;  %v336_v16 = vmul.f32 %v1176_v38, %v244_v11  ;;  %v332_v39 = vmul.f32 %v1176_v38, %v240_v35 }
  0x9c   :  { %v278_v42 = vrot.slane %v1150_v24, %v277_v36  ;;  %v334_v11 = vmul.f32 %v1176_v38, %v242_v6 }
  0x9d   :  { %v1197_v52 = vpop.permute.xlu0 %339 }
  0x9e   :  { %v343_v55 = vadd.f32 %v1197_v52, %v327_v48  ;;  %v342_v56 = vadd.f32 %v1197_v52, %v326_v49  ;;  %v345_v57 = vadd.f32 %v1197_v52, %v329_v50  ;;  %v344_v58 = vadd.f32 %v1197_v52, %v328_v51  ;;  %v1304_v49 = vpop.permute.xlu1 %674 }
  0x9f   :  { %v346_v5 = vadd.f32 %v1197_v52, %v330_v63  ;;  %v347_v20 = vadd.f32 %v1197_v52, %v331_v15  ;;  %v1258_v21 = vadd.f32 %v1197_v52, %v336_v16  ;;  %v348_v43 = vadd.f32 %v1197_v52, %v332_v39 }
  0xa0   :  { %v1212_v61 = vsel %vm409_vm5, %v343_v55, 0.0  ;;  %v1214_v62 = vsel %vm408_vm6, %v342_v56, 0.0  ;;  %v1221_v3 = vsel %vm411_vm7, %v345_v57, 0.0  ;;  %v1223_v4 = vsel %vm410_vm8, %v344_v58, 0.0 }
  0xa1   :  { %v461_v0 = vmul.f32 %v1210_v60, %v1212_v61  ;;  %v460_v1 = vmul.f32 %v1210_v60, %v1214_v62  ;;  %v463_v7 = vmul.f32 %v1210_v60, %v1221_v3  ;;  %v462_v8 = vmul.f32 %v1210_v60, %v1223_v4 }
  0xa2   :  { %v1240_v12 = vsel %vm412_vm10, %v346_v5, 0.0  ;;  %v534_v17 = vmul.f32 %v1245_v14, %v1212_v61  ;;  %v536_v27 = vmul.f32 %v1245_v14, %v1221_v3  ;;  %v535_v28 = vmul.f32 %v1245_v14, %v1223_v4  ;;  %v1266_v30 = vpop.permute.xlu0 %600 }
  0xa3   :  { %482 = vrot.lane.b32.xlu1 %v461_v0, %s1040_s15  ;;  %480 = vrot.lane.b32.xlu0 %v460_v1, %s1040_s15  ;;  %v464_v18 = vmul.f32 %v1210_v60, %v1240_v12  ;;  %v1268_v31 = vsel %vm413_vm11, %v347_v20, 0.0  ;;  %v603_v34 = vmul.f32 %v1266_v30, %v1212_v61  ;;  %v537_v40 = vmul.f32 %v1245_v14, %v1240_v12  ;;  %v243_v20 = vld [vmem:[%s1599_s1 + $0x40] sm:$0xff] }
  0xa4   :  { %v465_v33 = vmul.f32 %v1210_v60, %v1268_v31  ;;  %v605_v41 = vmul.f32 %v1266_v30, %v1221_v3  ;;  %v604_v45 = vmul.f32 %v1266_v30, %v1223_v4  ;;  %v538_v46 = vmul.f32 %v1245_v14, %v1268_v31 }
  0xa5   :  { %vm317_vm14 = vcmp.gt.f32.partialorder %v278_v42, 0.5  ;;  %v1300_v48 = vsel %vm414_vm13, %v348_v43, 0.0  ;;  %v677_v53 = vmul.f32 %v1304_v49, %v1212_v61  ;;  %v282_v55 = vrot.slane %v1150_v24, %v281_v47 }
  0xa6   :  { %v360_v50 = vsel %vm317_vm14, 1, %v1036_v2  ;;  %v466_v51 = vmul.f32 %v1210_v60, %v1300_v48  ;;  %v333_v57 = vmul.f32 %v1176_v38, %v241_v54  ;;  %v606_v58 = vmul.f32 %v1266_v30, %v1240_v12 }
  0xa7   :  { %486 = vrot.lane.b32.xlu1 %v463_v7, %s1040_s15  ;;  %484 = vrot.lane.b32.xlu0 %v462_v8, %s1040_s15  ;;  %v395_v56 = vrot.slane %v360_v50, %v1145_v23  ;;  %v679_v59 = vmul.f32 %v1304_v49, %v1221_v3  ;;  %vm318_vm15 = vcmp.gt.f32.partialorder %v282_v55, 0.5  ;;  %v678_v1 = vmul.f32 %v1304_v49, %v1223_v4  ;;  %v1014_v8 = vld [vmem:[%s1597_s4 + $0x8] ss:$0 sm:$0xff] }
  0xa8   :  { %v349_v63 = vadd.f32 %v1197_v52, %v333_v57  ;;  %v361_v0 = vsel %vm318_vm15, 1, %v1036_v2  ;;  %v539_v5 = vmul.f32 %v1245_v14, %v1300_v48  ;;  %v680_v15 = vmul.f32 %v1304_v49, %v1240_v12 }
  0xa9   :  { %vm415_vm0 = vcmp.eq.s32.totalorder %v395_v56, 1  ;;  %v399_v9 = vrot.slane %v361_v0, %v1145_v23  ;;  %vm319_vm1 = vcmp.gt.f32.partialorder %v1014_v8, 0.5  ;;  %v350_v16 = vadd.f32 %v1197_v52, %v334_v11  ;;  %v1418_v56 = vpop.permute.xlu0 %750 }
  0xaa   :  { %v1336_v7 = vsel %vm415_vm0, %v349_v63, 0.0  ;;  %v335_v32 = vmul.f32 %v1176_v38, %v243_v20  ;;  %v608_v38 = vmul.f32 %v1266_v30, %v1300_v48  ;;  %v363_v42 = vsel %vm320_vm4, 1, %v1036_v2 }
  0xab   :  { %552 = vrot.lane.b32.xlu1 %v534_v17, %s1041_s2  ;;  %488 = vrot.lane.b32.xlu0 %v464_v18, %s1040_s15  ;;  %v467_v13 = vmul.f32 %v1210_v60, %v1336_v7  ;;  %vm416_vm2 = vcmp.eq.s32.totalorder %v399_v9, 1  ;;  %v362_v17 = vsel %vm319_vm1, 1, %v1036_v2  ;;  %v607_v18 = vmul.f32 %v1266_v30, %v1268_v31 }
  0xac   :  { %v540_v19 = vmul.f32 %v1245_v14, %v1336_v7  ;;  %v351_v35 = vadd.f32 %v1197_v52, %v335_v32  ;;  %v609_v43 = vmul.f32 %v1266_v30, %v1336_v7  ;;  %vm500_vm6 = vcmask 1031168  }
  0xad   :  { %vm570_vm7 = vcmask 1014784   ;;  %vm643_vm8 = vcmask 998400   ;;  %vm895_vm10 = vcmask 7168   ;;  %vm803_vm11 = vcmask 31744  }
  0xaf   :  { %556 = vrot.lane.b32.xlu1 %v536_v27, %s1041_s2  ;;  %554 = vrot.lane.b32.xlu0 %v535_v28, %s1041_s2  ;;  %v1360_v27 = vsel %vm416_vm2, %v350_v16, 0.0  ;;  %v403_v28 = vrot.slane %v362_v17, %v1145_v23 }
  0xb0   :  { %v541_v39 = vmul.f32 %v1245_v14, %v1360_v27 }
  0xb1   :  { %vm417_vm3 = vcmp.eq.s32.totalorder %v403_v28, 1 }
  0xb3   :  { %490 = vrot.lane.b32.xlu1 %v465_v33, %s1040_s15  ;;  %623 = vrot.lane.b32.xlu0 %v603_v34, %s1042_s19  ;;  %v468_v33 = vmul.f32 %v1210_v60, %v1360_v27  ;;  %v681_v34 = vmul.f32 %v1304_v49, %v1268_v31 }
  0xb7   :  { %558 = vrot.lane.b32.xlu1 %v537_v40, %s1041_s2  ;;  %627 = vrot.lane.b32.xlu0 %v605_v41, %s1042_s19  ;;  %v1380_v40 = vsel %vm417_vm3, %v351_v35, 0.0  ;;  %v682_v41 = vmul.f32 %v1304_v49, %v1300_v48 }
  0xb8   :  { %v469_v52 = vmul.f32 %v1210_v60, %v1380_v40  ;;  %v542_v60 = vmul.f32 %v1245_v14, %v1380_v40  ;;  %v611_v50 = vmul.f32 %v1266_v30, %v1380_v40  ;;  %v684_v14 = vmul.f32 %v1304_v49, %v1360_v27 }
  0xbb   :  { %625 = vrot.lane.b32.xlu1 %v604_v45, %s1042_s19  ;;  %560 = vrot.lane.b32.xlu0 %v538_v46, %s1041_s2  ;;  %v610_v45 = vmul.f32 %v1266_v30, %v1360_v27  ;;  %v407_v46 = vrot.slane %v363_v42, %v1145_v23 }
  0xbd   :  { %vm418_vm5 = vcmp.eq.s32.totalorder %v407_v46, 1 }
  0xbf   :  { %492 = vrot.lane.b32.xlu1 %v466_v51, %s1040_s15  ;;  %697 = vrot.lane.b32.xlu0 %v677_v53, %s1043_s10  ;;  %v429_v51 = vsel %vm418_vm5, %v1258_v21, 0.0  ;;  %v683_v53 = vmul.f32 %v1304_v49, %v1336_v7  ;;  %v685_v21 = vmul.f32 %v1304_v49, %v1380_v40 }
  0xc0   :  { %v612_v54 = vmul.f32 %v1266_v30, %v429_v51  ;;  %v686_v55 = vmul.f32 %v1304_v49, %v429_v51  ;;  %v1420_v30 = vpop.permute.xlu1 %433 }
  0xc1   :  { %v437_v37 = vmul.f32 %v1420_v30, %v1212_v61 }
  0xc3   :  { %629 = vrot.lane.b32.xlu1 %v606_v58, %s1042_s19  ;;  %701 = vrot.lane.b32.xlu0 %v679_v59, %s1043_s10 }
  0xc7   :  { %699 = vrot.lane.b32.xlu1 %v678_v1, %s1043_s10  ;;  %562 = vrot.lane.b32.xlu0 %v539_v5, %s1041_s2 }
  0xcb   :  { %494 = vrot.lane.b32.xlu1 %v467_v13, %s1040_s15  ;;  %703 = vrot.lane.b32.xlu0 %v680_v15, %s1043_s10  ;;  %v436_v15 = vmul.f32 %v1420_v30, %v1214_v62  ;;  %v438_v62 = vmul.f32 %v1420_v30, %v1223_v4  ;;  %v439_v4 = vmul.f32 %v1420_v30, %v1221_v3 }
  0xcf   :  { %631 = vrot.lane.b32.xlu1 %v607_v18, %s1042_s19  ;;  %564 = vrot.lane.b32.xlu0 %v540_v19, %s1041_s2 }
  0xd3   :  { %496 = vrot.lane.b32.xlu1 %v468_v33, %s1040_s15  ;;  %705 = vrot.lane.b32.xlu0 %v681_v34, %s1043_s10 }
  0xd7   :  { %633 = vrot.lane.b32.xlu1 %v608_v38, %s1042_s19  ;;  %566 = vrot.lane.b32.xlu0 %v541_v39, %s1041_s2 }
  0xdb   :  { %498 = vrot.lane.b32.xlu1 %v469_v52, %s1040_s15  ;;  %707 = vrot.lane.b32.xlu0 %v682_v41, %s1043_s10 }
  0xdf   :  { %635 = vrot.lane.b32.xlu1 %v609_v43, %s1042_s19  ;;  %637 = vrot.lane.b32.xlu0 %v610_v45, %s1042_s19 }
  0xe3   :  { %568 = vrot.lane.b32.xlu1 %v542_v60, %s1041_s2  ;;  %639 = vrot.lane.b32.xlu0 %v611_v50, %s1042_s19 }
  0xe7   :  { %709 = vrot.lane.b32.xlu1 %v683_v53, %s1043_s10  ;;  %641 = vrot.lane.b32.xlu0 %v612_v54, %s1042_s19 }
  0xeb   :  { %711 = vrot.lane.b32.xlu1 %v684_v14, %s1043_s10  ;;  %715 = vrot.lane.b32.xlu0 %v686_v55, %s1043_s10 }
  0xef   :  { %713 = vrot.lane.b32.xlu1 %v685_v21, %s1043_s10 }
 0x115   :  { %v483_v57 = vpop.permute.xlu1 %482  ;;  %v481_v58 = vpop.permute.xlu0 %480 }
 0x116   :  { %v501_v49 = vsel %vm500_vm6, %v481_v58, %v483_v57 }
 0x117   :  { %v520_v16 = vadd.f32 %v501_v49, %v436_v15 }
 0x119   :  { %v487_v59 = vpop.permute.xlu1 %486  ;;  %v485_v63 = vpop.permute.xlu0 %484 }
 0x11a   :  { %v502_v33 = vsel %vm500_vm6, %v483_v57, %v485_v63  ;;  %v503_v34 = vsel %vm500_vm6, %v485_v63, %v487_v59 }
 0x11b   :  { %v521_v41 = vadd.f32 %v502_v33, %v437_v37  ;;  %v522_v42 = vadd.f32 %v503_v34, %v438_v62 }
 0x11d   :  { %v553_v0 = vpop.permute.xlu1 %552  ;;  %v489_v1 = vpop.permute.xlu0 %488 }
 0x11e   :  { %v589_v19 = vadd.f32 %v553_v0, %v520_v16  ;;  %v504_v46 = vsel %vm500_vm6, %v487_v59, %v489_v1 }
 0x11f   :  { %v523_v14 = vadd.f32 %v504_v46, %v439_v4 }
 0x121   :  { %v557_v5 = vpop.permute.xlu1 %556  ;;  %v555_v6 = vpop.permute.xlu0 %554 }
 0x122   :  { %v571_v38 = vsel %vm570_vm7, %v553_v0, %v555_v6  ;;  %v572_v39 = vsel %vm570_vm7, %v555_v6, %v557_v5 }
 0x123   :  { %v590_v51 = vadd.f32 %v571_v38, %v521_v41  ;;  %v591_v53 = vadd.f32 %v572_v39, %v522_v42 }
 0x125   :  { %v1422_v8 = vpop.permute.xlu1 %490  ;;  %v624_v9 = vpop.permute.xlu0 %623 }
 0x126   :  { %v663_v20 = vadd.f32 %v624_v9, %v589_v19  ;;  %v505_v19 = vsel %vm500_vm6, %v489_v1, %v1422_v8 }
 0x129   :  { %v559_v11 = vpop.permute.xlu1 %558  ;;  %v628_v13 = vpop.permute.xlu0 %627 }
 0x12a   :  { %v573_v54 = vsel %vm570_vm7, %v557_v5, %v559_v11 }
 0x12b   :  { %v592_v3 = vadd.f32 %v573_v54, %v523_v14 }
 0x12d   :  { %v626_v17 = vpop.permute.xlu1 %625  ;;  %v1427_v18 = vpop.permute.xlu0 %560 }
 0x12e   :  { %v644_v60 = vsel %vm643_vm8, %v624_v9, %v626_v17  ;;  %v645_v61 = vsel %vm643_vm8, %v626_v17, %v628_v13 }
 0x12f   :  { %v664_v55 = vadd.f32 %v644_v60, %v590_v51  ;;  %v665_v21 = vadd.f32 %v645_v61, %v591_v53  ;;  %v441_v60 = vmul.f32 %v1420_v30, %v1268_v31 }
 0x131   :  { %v1429_v28 = vpop.permute.xlu1 %492  ;;  %v698_v32 = vpop.permute.xlu0 %697 }
 0x132   :  { %v737_v35 = vadd.f32 %v698_v32, %v663_v20 }
 0x134   :  { %v753_v52 = vadd.f32 %v1418_v56, %v737_v35  ;;  %v574_v35 = vsel %vm570_vm7, %v559_v11, %v1427_v18  ;;  %v506_v11 = vsel %vm500_vm6, %v1422_v8, %v1429_v28 }
 0x135   :  { %v630_v43 = vpop.permute.xlu1 %629  ;;  %v702_v45 = vpop.permute.xlu0 %701 }
 0x136   :  { %v763_v50 = vmax.f32 %v753_v52, 0.0  ;;  %v646_v59 = vsel %vm643_vm8, %v628_v13, %v630_v43  ;;  %v440_v13 = vmul.f32 %v1420_v30, %v1240_v12 }
 0x137   :  { %v666_v49 = vadd.f32 %v646_v59, %v592_v3 }
 0x138   :  { %783 = vrot.lane.b32.xlu1 %v763_v50, %s1044_s5  ;;  %v524_v37 = vadd.f32 %v505_v19, %v440_v13  ;;  %v525_v50 = vadd.f32 %v506_v11, %v441_v60 }
 0x139   :  { %v700_v57 = vpop.permute.xlu1 %699  ;;  %v563_v58 = vpop.permute.xlu0 %562 }
 0x13a   :  { %v718_v63 = vsel %vm717_vm9, %v698_v32, %v700_v57  ;;  %v719_v0 = vsel %vm717_vm9, %v700_v57, %v702_v45  ;;  %v593_v52 = vadd.f32 %v574_v35, %v524_v37 }
 0x13b   :  { %v738_v6 = vadd.f32 %v718_v63, %v664_v55  ;;  %v739_v9 = vadd.f32 %v719_v0, %v665_v21 }
 0x13d   :  { %v495_v15 = vpop.permute.xlu1 %494  ;;  %v704_v5 = vpop.permute.xlu0 %703  ;;  %v754_v16 = vadd.f32 %v1418_v56, %v738_v6  ;;  %v755_v17 = vadd.f32 %v1418_v56, %v739_v9  ;;  %v442_v6 = vmul.f32 %v1420_v30, %v1300_v48 }
 0x13e   :  { %v720_v20 = vsel %vm717_vm9, %v702_v45, %v704_v5  ;;  %v507_v3 = vsel %vm500_vm6, %v1429_v28, %v495_v15 }
 0x13f   :  { %v740_v32 = vadd.f32 %v720_v20, %v666_v49  ;;  %v764_v33 = vmax.f32 %v754_v16, 0.0  ;;  %v765_v34 = vmax.f32 %v755_v17, 0.0 }
 0x141   :  { %v632_v62 = vpop.permute.xlu1 %631  ;;  %785 = vrot.lane.b32.xlu0 %v764_v33, %s1044_s5  ;;  %v565_v38 = vpop.permute.xlu0 %564  ;;  %787 = vrot.lane.b32.xlu1 %v765_v34, %s1044_s5  ;;  %v756_v1 = vadd.f32 %v1418_v56, %v740_v32  ;;  %v443_v32 = vmul.f32 %v1420_v30, %v1336_v7  ;;  %v445_v7 = vmul.f32 %v1420_v30, %v1380_v40 }
 0x142   :  { %v647_v39 = vsel %vm643_vm8, %v630_v43, %v632_v62  ;;  %v575_v43 = vsel %vm570_vm7, %v1427_v18, %v563_v58  ;;  %v576_v49 = vsel %vm570_vm7, %v563_v58, %v565_v38  ;;  %v444_v58 = vmul.f32 %v1420_v30, %v1360_v27 }
 0x143   :  { %v766_v41 = vmax.f32 %v756_v1, 0.0  ;;  %v667_v12 = vadd.f32 %v647_v39, %v593_v52  ;;  %v594_v14 = vadd.f32 %v575_v43, %v525_v50 }
 0x145   :  { %v497_v42 = vpop.permute.xlu1 %496  ;;  %789 = vrot.lane.b32.xlu0 %v766_v41, %s1044_s5  ;;  %v706_v45 = vpop.permute.xlu0 %705 }
 0x146   :  { %v721_v46 = vsel %vm717_vm9, %v704_v5, %v706_v45  ;;  %v526_v5 = vadd.f32 %v507_v3, %v442_v6  ;;  %v508_v19 = vsel %vm500_vm6, %v495_v15, %v497_v42 }
 0x147   :  { %v741_v61 = vadd.f32 %v721_v46, %v667_v12  ;;  %v527_v33 = vadd.f32 %v508_v19, %v443_v32  ;;  %v835_v19 = vsel %vm833_vm12, 1, %v1036_v2 }
 0x148   :  { %v595_v13 = vadd.f32 %v576_v49, %v526_v5  ;;  %v852_v24 = vrot.slane %v835_v19, %v265_v29 }
 0x149   :  { %v634_v4 = vpop.permute.xlu1 %633  ;;  %v567_v51 = vpop.permute.xlu0 %566  ;;  %v757_v53 = vadd.f32 %v1418_v56, %v741_v61 }
 0x14a   :  { %v648_v54 = vsel %vm643_vm8, %v632_v62, %v634_v4  ;;  %v577_v28 = vsel %vm570_vm7, %v565_v38, %v567_v51  ;;  %vm876_vm0 = vcmp.eq.s32.totalorder %v852_v24, 1 }
 0x14b   :  { %v767_v55 = vmax.f32 %v757_v53, 0.0  ;;  %v668_v21 = vadd.f32 %v648_v54, %v594_v14  ;;  %v596_v1 = vadd.f32 %v577_v28, %v527_v33  ;;  %v848_v28 = vrot.slane %v835_v19, %v261_v25  ;;  %v832_v25 = vld [vmem:[%s1597_s4 + $0x8] sm:$0x1] }
 0x14c   :  { %v856_v33 = vrot.slane %v835_v19, %v269_v44  ;;  %vm834_vm2 = vcmp.gt.f32.partialorder %v832_v25, 0.5 }
 0x14d   :  { %v499_v8 = vpop.permute.xlu1 %498  ;;  %v708_v57 = vpop.permute.xlu0 %707  ;;  %791 = vrot.lane.b32.xlu1 %v767_v55, %s1044_s5  ;;  %vm875_vm15 = vcmp.eq.s32.totalorder %v848_v28, 1 }
 0x14e   :  { %v722_v31 = vsel %vm717_vm9, %v706_v45, %v708_v57  ;;  %v509_v48 = vsel %vm500_vm6, %v497_v42, %v499_v8  ;;  %v529_v41 = vadd.f32 %v499_v8, %v445_v7  ;;  %vm877_vm1 = vcmp.eq.s32.totalorder %v856_v33, 1 }
 0x14f   :  { %v742_v59 = vadd.f32 %v722_v31, %v668_v21  ;;  %v528_v39 = vadd.f32 %v509_v48, %v444_v58 }
 0x151   :  { %v636_v63 = vpop.permute.xlu1 %635  ;;  %v638_v0 = vpop.permute.xlu0 %637  ;;  %v758_v18 = vadd.f32 %v1418_v56, %v742_v59  ;;  %v1045_v59 = vmov 0.0  }
 0x152   :  { %v649_v20 = vsel %vm643_vm8, %v634_v4, %v636_v63  ;;  %v650_v37 = vsel %vm643_vm8, %v636_v63, %v638_v0  ;;  %896 = vst.msk [vmem:[%s1603_s13] sm:$0xff] %vm895_vm10, %v1045_v59  ;;  %897 = vst.msk [vmem:[%s1605_s14] sm:$0xff] %vm895_vm10, %v1045_v59 }
 0x153   :  { %v768_v9 = vmax.f32 %v758_v18, 0.0  ;;  %v669_v34 = vadd.f32 %v649_v20, %v595_v13  ;;  %v670_v12 = vadd.f32 %v650_v37, %v596_v1  ;;  %v840_v20 = vrot.slane %v835_v19, %v1145_v23 }
 0x154   :  { %v844_v13 = vrot.slane %v835_v19, %v257_v26 }
 0x155   :  { %v569_v16 = vpop.permute.xlu1 %568  ;;  %793 = vrot.lane.b32.xlu0 %v768_v9, %s1044_s5  ;;  %v640_v17 = vpop.permute.xlu0 %639  ;;  %vm873_vm13 = vcmp.eq.s32.totalorder %v840_v20, 1 }
 0x156   :  { %v578_v15 = vsel %vm570_vm7, %v567_v51, %v569_v16  ;;  %v598_v60 = vadd.f32 %v569_v16, %v529_v41  ;;  %v651_v50 = vsel %vm643_vm8, %v638_v0, %v640_v17  ;;  %vm874_vm14 = vcmp.eq.s32.totalorder %v844_v13, 1 }
 0x157   :  { %v597_v42 = vadd.f32 %v578_v15, %v528_v39 }
 0x159   :  { %v710_v35 = vpop.permute.xlu1 %709  ;;  %v642_v52 = vpop.permute.xlu0 %641  ;;  %v671_v4 = vadd.f32 %v651_v50, %v597_v42 }
 0x15a   :  { %v723_v62 = vsel %vm717_vm9, %v708_v57, %v710_v35  ;;  %v652_v11 = vsel %vm643_vm8, %v640_v17, %v642_v52 }
 0x15b   :  { %v743_v38 = vadd.f32 %v723_v62, %v669_v34  ;;  %v672_v40 = vadd.f32 %v652_v11, %v598_v60  ;;  %v860_v34 = vrot.slane %v835_v19, %v273_v10  ;;  %v864_v62 = vrot.slane %v835_v19, %v277_v36 }
 0x15c   :  { %v868_v36 = vrot.slane %v835_v19, %v281_v47 }
 0x15d   :  { %v712_v45 = vpop.permute.xlu1 %711  ;;  %v759_v27 = vadd.f32 %v1418_v56, %v743_v38  ;;  %v716_v30 = vpop.permute.xlu0 %715  ;;  %vm878_vm3 = vcmp.eq.s32.totalorder %v860_v34, 1  ;;  %v836_v38 = vsel %vm834_vm2, 1, %v1036_v2  ;;  %vm879_vm4 = vcmp.eq.s32.totalorder %v864_v62, 1 }
 0x15e   :  { %v724_v46 = vsel %vm717_vm9, %v710_v35, %v712_v45  ;;  %vm880_vm5 = vcmp.eq.s32.totalorder %v868_v36, 1 }
 0x15f   :  { %v744_v61 = vadd.f32 %v724_v46, %v670_v12  ;;  %v769_v43 = vmax.f32 %v759_v27, 0.0  ;;  %v872_v46 = vrot.slane %v836_v38, %v1145_v23 }
 0x161   :  { %v714_v51 = vpop.permute.xlu1 %713  ;;  %795 = vrot.lane.b32.xlu1 %v769_v43, %s1044_s5  ;;  %v760_v53 = vadd.f32 %v1418_v56, %v744_v61  ;;  %vm881_vm6 = vcmp.eq.s32.totalorder %v872_v46, 1 }
 0x162   :  { %v725_v54 = vsel %vm717_vm9, %v712_v45, %v714_v51  ;;  %v726_v14 = vsel %vm717_vm9, %v714_v51, %v716_v30 }
 0x163   :  { %v745_v55 = vadd.f32 %v725_v54, %v671_v4  ;;  %v746_v21 = vadd.f32 %v726_v14, %v672_v40  ;;  %v770_v8 = vmax.f32 %v760_v53, 0.0 }
 0x165   :  { %797 = vrot.lane.b32.xlu0 %v770_v8, %s1044_s5  ;;  %v762_v57 = vadd.f32 %v1418_v56, %v746_v21  ;;  %v761_v31 = vadd.f32 %v1418_v56, %v745_v55 }
 0x167   :  { %v772_v63 = vmax.f32 %v762_v57, 0.0  ;;  %v771_v0 = vmax.f32 %v761_v31, 0.0 }
 0x169   :  { %801 = vrot.lane.b32.xlu0 %v772_v63, %s1044_s5  ;;  %799 = vrot.lane.b32.xlu1 %v771_v0, %s1044_s5 }
 0x1aa   :  { %v784_v18 = vpop.permute.xlu1 %783 }
 0x1b3   :  { %v786_v3 = vpop.permute.xlu0 %785  ;;  %v788_v6 = vpop.permute.xlu1 %787 }
 0x1b4   :  { %v804_v9 = vsel %vm803_vm11, %v784_v18, %v786_v3  ;;  %v805_v56 = vsel %vm803_vm11, %v786_v3, %v788_v6 }
 0x1b5   :  { %822 = vst [vmem:[%s1604_s12] sm:$0xff] %v804_v9  ;;  %823 = vst [vmem:[%s1604_s12 + $0x8] sm:$0xff] %v805_v56  ;;  %v882_v26 = vsel %vm873_vm13, %v804_v9, 0.0  ;;  %v883_v58 = vsel %vm874_vm14, %v805_v56, 0.0  ;;  %v912_v56 = vld [vmem:[%s1605_s14] sm:$0xff] }
 0x1b6   :  { %v913_v37 = vmul.f32 %v882_v26, %v882_v26  ;;  %v914_v15 = vmul.f32 %v883_v58, %v883_v58  ;;  %v899_v44 = vadd.f32 %v883_v58, %v882_v26 }
 0x1b7   :  { %v790_v49 = vpop.permute.xlu0 %789 }
 0x1b8   :  { %v806_v5 = vsel %vm803_vm11, %v788_v6, %v790_v49  ;;  %v922_v52 = vadd.f32 %v914_v15, %v913_v37  ;;  %v898_v6 = vld [vmem:[%s1603_s13] sm:$0xff] }
 0x1b9   :  { %824 = vst [vmem:[%s1604_s12 + $0x10] sm:$0xff] %v806_v5  ;;  %v884_v35 = vsel %vm875_vm15, %v806_v5, 0.0 }
 0x1ba   :  { %v915_v1 = vmul.f32 %v884_v35, %v884_v35  ;;  %v900_v41 = vadd.f32 %v899_v44, %v884_v35 }
 0x1bc   :  { %v923_v45 = vadd.f32 %v922_v52, %v915_v1 }
 0x1bf   :  { %v792_v16 = vpop.permute.xlu1 %791 }
 0x1c0   :  { %v807_v17 = vsel %vm803_vm11, %v790_v49, %v792_v16 }
 0x1c1   :  { %825 = vst [vmem:[%s1604_s12 + $0x18] sm:$0xff] %v807_v17  ;;  %v885_v29 = vsel %vm876_vm0, %v807_v17, 0.0 }
 0x1c2   :  { %v916_v12 = vmul.f32 %v885_v29, %v885_v29  ;;  %v901_v27 = vadd.f32 %v900_v41, %v885_v29 }
 0x1c4   :  { %v924_v60 = vadd.f32 %v923_v45, %v916_v12 }
 0x1c7   :  { %v794_v32 = vpop.permute.xlu0 %793 }
 0x1c8   :  { %v808_v48 = vsel %vm803_vm11, %v792_v16, %v794_v32 }
 0x1c9   :  { %826 = vst [vmem:[%s1604_s12 + $0x20] sm:$0xff] %v808_v48  ;;  %v886_v7 = vsel %vm877_vm1, %v808_v48, 0.0 }
 0x1ca   :  { %v917_v11 = vmul.f32 %v886_v7, %v886_v7  ;;  %v902_v61 = vadd.f32 %v901_v27, %v886_v7 }
 0x1cc   :  { %v925_v40 = vadd.f32 %v924_v60, %v917_v11 }
 0x1d3   :  { %v796_v39 = vpop.permute.xlu1 %795 }
 0x1d4   :  { %v809_v10 = vsel %vm803_vm11, %v794_v32, %v796_v39 }
 0x1d5   :  { %827 = vst [vmem:[%s1604_s12 + $0x28] sm:$0xff] %v809_v10  ;;  %v887_v42 = vsel %vm878_vm3, %v809_v10, 0.0 }
 0x1d6   :  { %v918_v43 = vmul.f32 %v887_v42, %v887_v42  ;;  %v903_v22 = vadd.f32 %v902_v61, %v887_v42 }
 0x1d7   :  { %v798_v2 = vpop.permute.xlu0 %797 }
 0x1d8   :  { %v810_v50 = vsel %vm803_vm11, %v796_v39, %v798_v2  ;;  %v926_v53 = vadd.f32 %v925_v40, %v918_v43 }
 0x1d9   :  { %828 = vst [vmem:[%s1604_s12 + $0x30] sm:$0xff] %v810_v50  ;;  %v888_v4 = vsel %vm879_vm4, %v810_v50, 0.0 }
 0x1da   :  { %v919_v47 = vmul.f32 %v888_v4, %v888_v4  ;;  %v904_v23 = vadd.f32 %v903_v22, %v888_v4 }
 0x1db   :  { %v802_v30 = vpop.permute.xlu0 %801  ;;  %v800_v51 = vpop.permute.xlu1 %799 }
 0x1dc   :  { %v811_v54 = vsel %vm803_vm11, %v798_v2, %v800_v51  ;;  %v812_v14 = vsel %vm803_vm11, %v800_v51, %v802_v30  ;;  %v927_v31 = vadd.f32 %v926_v53, %v919_v47 }
 0x1dd   :  { %829 = vst [vmem:[%s1604_s12 + $0x38] sm:$0xff] %v811_v54  ;;  %830 = vst [vmem:[%s1604_s12 + $0x40] sm:$0xff] %v812_v14  ;;  %v889_v55 = vsel %vm880_vm5, %v811_v54, 0.0  ;;  %v890_v21 = vsel %vm881_vm6, %v812_v14, 0.0 }
 0x1de   :  { %v920_v8 = vmul.f32 %v889_v55, %v889_v55  ;;  %v905_v57 = vadd.f32 %v904_v23, %v889_v55  ;;  %v921_v0 = vmul.f32 %v890_v21, %v890_v21 }
 0x1e0   :  { %v906_v63 = vadd.f32 %v905_v57, %v890_v21  ;;  %v928_v18 = vadd.f32 %v927_v31, %v920_v8 }
 0x1e2   :  { %907 = vadd.xlane.f32.xlu1 %v906_v63  ;;  %v929_v3 = vadd.f32 %v928_v18, %v921_v0 }
 0x1e4   :  { %930 = vadd.xlane.f32.xlu0 %v929_v3 }
 0x26f   :  { %v908_v9 = vpop.xlane.xlu1 %907 }
 0x270   :  { %v909_v49 = vadd.f32 %v908_v9, %v898_v6 }
 0x271   :  { %v931_v5 = vpop.xlane.xlu0 %930 }
 0x272   :  { %911 = vst.msk [vmem:[%s1603_s13] sm:$0xff] %vm895_vm10, %v909_v49  ;;  %v932_v16 = vadd.f32 %v931_v5, %v912_v56 }
 0x274   :  { %933 = vst.msk [vmem:[%s1605_s14] sm:$0xff] %vm895_vm10, %v932_v16 }

// kernel: lska11_forward.7
= control target key start
LH: loop header
LB: loop body
LE: loop exit
PB: predicated region body
PF: predicated region fallthrough
CT: control target
= control target key end

     0   :  { %v880_v0 = vmov 0   ;;  %v881_v3 = vmov 1   ;;  %v882_v9 = vmov 2   ;;  %v251_v19 = vlaneseq  ;;  %s883_s17 = smov 104   ;;  %s1335_s8 = inlined_call_operand.vmem [shape: f32[1,8,1], index: 8, kind: input, shape index: {}]   ;;  %s1336_s9 = inlined_call_operand.vmem [shape: f32[1,8,1], index: 9, kind: input, shape index: {}]   ;;  %s1337_s6 = inlined_call_operand.vmem [shape: f32[8,3], index: 6, kind: input, shape index: {}]   ;;  %s1338_s7 = inlined_call_operand.vmem [shape: f32[8,1], index: 7, kind: input, shape index: {}]   ;;  %s1339_s10 = inlined_call_operand.vmem [shape: f32[8,1], index: 10, kind: input, shape index: {}]   ;;  %s1340_s11 = inlined_call_operand.vmem [shape: f32[8,1], index: 11, kind: input, shape index: {}]   ;;  %s1341_s4 = inlined_call_operand.vmem [shape: f32[1,1,1152], index: 4, kind: input, shape index: {}, may-alias: {3,4,5}]   ;;  %s1342_s1 = inlined_call_operand.vmem [shape: f32[1,8,1152], index: 1, kind: input, shape index: {}, may-alias: {0,1,2}]   ;;  %s1343_s0 = inlined_call_operand.vmem [shape: f32[1,8,1152], index: 0, kind: input, shape index: {}, may-alias: {0,1,2}]   ;;  %s1344_s5 = inlined_call_operand.vmem [shape: f32[1,1,1152], index: 5, kind: input, shape index: {}, may-alias: {3,4,5}]   ;;  %s1345_s2 = inlined_call_operand.vmem [shape: f32[1,8,1152], index: 2, kind: input, shape index: {}, may-alias: {0,1,2}]   ;;  %s1346_s3 = inlined_call_operand.vmem [shape: f32[1,1,1152], index: 3, kind: input, shape index: {}, may-alias: {3,4,5}]   ;;  %s1347_s13 = inlined_call_operand.vmem [shape: f32[1,8,1], index: 13, kind: output, shape index: {1}]   ;;  %s1348_s12 = inlined_call_operand.vmem [shape: f32[1,8,1152], index: 12, kind: output, shape index: {0}]   ;;  %s1349_s14 = inlined_call_operand.vmem [shape: f32[1,8,1], index: 14, kind: output, shape index: {2}]  }
   0x1   :  { %874 = vset.pattern.permute.xlu0 %v880_v0  ;;  %v296_v1 = vld [vmem:[%s1335_s8] sm:$0xff]  ;;  %875 = vset.pattern.permute.xlu1 %v881_v3  ;;  %v236_v33 = vld [vmem:[%s1342_s1 + $0x8] sm:$0xff]  ;;  %v238_v40 = vld [vmem:[%s1342_s1 + $0x18] sm:$0xff] }
   0x2   :  { %v297_v2 = vld [vmem:[%s1336_s9] sm:$0xff]  ;;  %v298_v4 = vmul.f32 0.001953125, %v296_v1  ;;  %v982_v20 = vshrl.u32 %v251_v19, 7  ;;  %v237_v41 = vld [vmem:[%s1342_s1 + $0x10] sm:$0xff] }
   0x3   :  { %v299_v5 = vmul.f32 0.001953125, %v297_v2  ;;  %v430_v6 = vld [vmem:[%s1337_s6] sm:$0xff]  ;;  %s884_s6 = smov 80  }
   0x4   :  { %457 = vperm.xlu1 %875, %v430_v6   ;;  %v300_v7 = vmul.f32 %v298_v4, %v298_v4  ;;  %v599_v12 = vld [vmem:[%s1338_s7] sm:$0xff]  ;;  %v985_v21 = vsub.s32 0, %v982_v20  ;;  %v257_v22 = vsub.s32 1, %v982_v20  ;;  %v265_v24 = vsub.s32 3, %v982_v20 }
   0x5   :  { %v303_v13 = vld [vmem:[%s1339_s10] sm:$0xff]  ;;  %v261_v25 = vsub.s32 2, %v982_v20  ;;  %v269_v30 = vsub.s32 4, %v982_v20  ;;  %v273_v43 = vsub.s32 5, %v982_v20  ;;  %v277_v46 = vsub.s32 6, %v982_v20 }
   0x6   :  { %v301_v8 = vsub.f32 %v299_v5, %v300_v7  ;;  %v307_v16 = vld [vmem:[%s1340_s11] sm:$0xff]  ;;  %v281_v2 = vsub.s32 7, %v982_v20 }
   0x7   :  { %v991_v23 = vld [vmem:[%s1341_s4] sm:$0xff] }
   0x8   :  { %876 = vset.pattern.permute.xlu1 %v882_v9  ;;  %v302_v10 = vmax.f32 %v301_v8, 0.0  ;;  %v258_v26 = vrot.slane %v991_v23, %v257_v22  ;;  %v254_v27 = vrot.slane %v991_v23, %v985_v21  ;;  %v266_v28 = vrot.slane %v991_v23, %v265_v24  ;;  %v235_v38 = vld [vmem:[%s1342_s1] sm:$0xff] }
   0x9   :  { %526 = vperm.xlu1 %876, %v430_v6   ;;  %v262_v29 = vrot.slane %v991_v23, %v261_v25  ;;  %v270_v42 = vrot.slane %v991_v23, %v269_v30  ;;  %v274_v52 = vrot.slane %v991_v23, %v273_v43  ;;  %v278_v61 = vrot.slane %v991_v23, %v277_v46  ;;  %v239_v1 = vld [vmem:[%s1342_s1 + $0x20] sm:$0xff] }
   0xa   :  { %v304_v11 = vadd.f32 1e-05, %v302_v10  ;;  %vm312_vm0 = vcmp.gt.f32.partialorder %v258_v26, 0.5  ;;  %vm311_vm1 = vcmp.gt.f32.partialorder %v254_v27, 0.5  ;;  %vm314_vm2 = vcmp.gt.f32.partialorder %v266_v28, 0.5  ;;  %v864_v3 = vld [vmem:[%s1343_s0 + $0x40] sm:$0xff] }
   0xb   :  { %vm313_vm3 = vcmp.gt.f32.partialorder %v262_v29, 0.5  ;;  %v355_v31 = vsel %vm312_vm0, 1, %v880_v0  ;;  %v354_v32 = vsel %vm311_vm1, 1, %v880_v0  ;;  %v357_v34 = vsel %vm314_vm2, 1, %v880_v0  ;;  %v241_v28 = vld [vmem:[%s1342_s1 + $0x30] sm:$0xff] }
   0xc   :  { %878 = vrsqrt.f32 %v304_v11  ;;  %v356_v35 = vsel %vm313_vm3, 1, %v880_v0  ;;  %v375_v37 = vrot.slane %v355_v31, %v985_v21  ;;  %v371_v39 = vrot.slane %v354_v32, %v985_v21  ;;  %v866_v32 = vld [vmem:[%s1341_s4 + $0x8] ss:$0 sm:$0xff] }
   0xd   :  { %877 = vset.pattern.permute.xlu1 %v880_v0  ;;  %v383_v44 = vrot.slane %v357_v34, %v985_v21  ;;  %v379_v45 = vrot.slane %v356_v35, %v985_v21  ;;  %vm315_vm6 = vcmp.gt.f32.partialorder %v270_v42, 0.5  ;;  %vm316_vm9 = vcmp.gt.f32.partialorder %v274_v52, 0.5 }
   0xe   :  { %602 = vperm.xlu1 %877, %v599_v12   ;;  %vm410_vm4 = vcmp.eq.s32.totalorder %v375_v37, 1  ;;  %vm409_vm5 = vcmp.eq.s32.totalorder %v371_v39, 1  ;;  %v358_v60 = vsel %vm315_vm6, 1, %v880_v0  ;;  %v359_v8 = vsel %vm316_vm9, 1, %v880_v0  ;;  %v240_v12 = vld [vmem:[%s1342_s1 + $0x28] sm:$0xff]  ;;  %v242_v39 = vld [vmem:[%s1342_s1 + $0x38] sm:$0xff] }
   0xf   :  { %vm412_vm7 = vcmp.eq.s32.totalorder %v383_v44, 1  ;;  %vm411_vm8 = vcmp.eq.s32.totalorder %v379_v45, 1  ;;  %vm317_vm10 = vcmp.gt.f32.partialorder %v278_v61, 0.5  ;;  %vm319_vm14 = vcmp.gt.f32.partialorder %v866_v32, 0.5 }
  0x10   :  { %v360_v19 = vsel %vm317_vm10, 1, %v880_v0  ;;  %v362_v45 = vsel %vm319_vm14, 1, %v880_v0  ;;  %vm496_vm6 = vcmask 850944   ;;  %vm655_vm9 = vcmask 195584  }
  0x11   :  { %vm685_vm10 = vcmp.gt.f32.partialorder %v991_v23, 0.5 }
  0x16   :  { %v879_v14 = vpop.eup %878 }
  0x17   :  { %v306_v15 = vmul.f32 %v879_v14, %v303_v13  ;;  %v282_v13 = vrot.slane %v991_v23, %v281_v2 }
  0x19   :  { %323 = vperm.xlu0 %874, %v306_v15   ;;  %v308_v17 = vmul.f32 %v306_v15, %v298_v4  ;;  %vm318_vm12 = vcmp.gt.f32.partialorder %v282_v13, 0.5 }
  0x1a   :  { %v361_v35 = vsel %vm318_vm12, 1, %v880_v0 }
  0x1b   :  { %v309_v18 = vsub.f32 %v307_v16, %v308_v17  ;;  %v391_v17 = vrot.slane %v359_v8, %v985_v21  ;;  %v399_v42 = vrot.slane %v361_v35, %v985_v21 }
  0x1d   :  { %339 = vperm.xlu0 %874, %v309_v18   ;;  %vm414_vm13 = vcmp.eq.s32.totalorder %v391_v17, 1  ;;  %vm416_vm0 = vcmp.eq.s32.totalorder %v399_v42, 1 }
  0x21   :  { %433 = vperm.xlu0 %874, %v430_v6   ;;  %v387_v6 = vrot.slane %v358_v60, %v985_v21 }
  0x23   :  { %vm413_vm11 = vcmp.eq.s32.totalorder %v387_v6, 1  ;;  %v244_v6 = vld [vmem:[%s1345_s2] sm:$0xff] }
  0x83   :  { %v1047_v57 = vpop.permute.xlu1 %457 }
  0x88   :  { %v1088_v14 = vpop.permute.xlu1 %526 }
  0x98   :  { %v1014_v36 = vpop.permute.xlu0 %323 }
  0x99   :  { %v328_v47 = vmul.f32 %v1014_v36, %v236_v33  ;;  %v327_v48 = vmul.f32 %v1014_v36, %v235_v38  ;;  %v330_v49 = vmul.f32 %v1014_v36, %v238_v40  ;;  %v329_v50 = vmul.f32 %v1014_v36, %v237_v41 }
  0x9a   :  { %v331_v7 = vmul.f32 %v1014_v36, %v239_v1  ;;  %v326_v9 = vmul.f32 %v864_v3, %v1014_v36  ;;  %v332_v18 = vmul.f32 %v1014_v36, %v240_v12  ;;  %v395_v33 = vrot.slane %v360_v19, %v985_v21 }
  0x9b   :  { %v333_v34 = vmul.f32 %v1014_v36, %v241_v28  ;;  %v334_v44 = vmul.f32 %v1014_v36, %v242_v39 }
  0x9c   :  { %v1038_v51 = vpop.permute.xlu0 %339  ;;  %vm415_vm15 = vcmp.eq.s32.totalorder %v395_v33, 1 }
  0x9d   :  { %v344_v53 = vadd.f32 %v1038_v51, %v328_v47  ;;  %v343_v54 = vadd.f32 %v1038_v51, %v327_v48  ;;  %v346_v55 = vadd.f32 %v1038_v51, %v330_v49  ;;  %v345_v56 = vadd.f32 %v1038_v51, %v329_v50  ;;  %v243_v49 = vld [vmem:[%s1342_s1 + $0x40] sm:$0xff] }
  0x9e   :  { %v347_v15 = vadd.f32 %v1038_v51, %v331_v7  ;;  %v1092_v16 = vadd.f32 %v1038_v51, %v326_v9  ;;  %v348_v31 = vadd.f32 %v1038_v51, %v332_v18  ;;  %v349_v41 = vadd.f32 %v1038_v51, %v333_v34  ;;  %v1191_v18 = vpop.permute.xlu1 %602 }
  0x9f   :  { %v1049_v58 = vsel %vm410_vm4, %v344_v53, 0.0  ;;  %v1051_v59 = vsel %vm409_vm5, %v343_v54, 0.0  ;;  %v1068_v4 = vsel %vm412_vm7, %v346_v55, 0.0  ;;  %v1070_v5 = vsel %vm411_vm8, %v345_v56, 0.0  ;;  %v248_v53 = vld [vmem:[%s1344_s5] sm:$0x1] }
  0xa0   :  { %v461_v62 = vmul.f32 %v1047_v57, %v1049_v58  ;;  %v460_v63 = vmul.f32 %v1047_v57, %v1051_v59  ;;  %v463_v10 = vmul.f32 %v1047_v57, %v1068_v4  ;;  %v462_v11 = vmul.f32 %v1047_v57, %v1070_v5 }
  0xa1   :  { %v530_v26 = vmul.f32 %v1088_v14, %v1049_v58  ;;  %v529_v27 = vmul.f32 %v1088_v14, %v1051_v59  ;;  %v1106_v29 = vsel %vm413_vm11, %v347_v15, 0.0  ;;  %v531_v38 = vmul.f32 %v1088_v14, %v1070_v5 }
  0xa2   :  { %480 = vrot.lane.b32.xlu1 %v461_v62, %s883_s17  ;;  %478 = vrot.lane.b32.xlu0 %v460_v63, %s883_s17  ;;  %v464_v37 = vmul.f32 %v1047_v57, %v1106_v29  ;;  %v1124_v40 = vsel %vm414_vm13, %v348_v31, 0.0  ;;  %v532_v48 = vmul.f32 %v1088_v14, %v1068_v4  ;;  %v1139_v50 = vsel %vm415_vm15, %v349_v41, 0.0 }
  0xa3   :  { %v465_v47 = vmul.f32 %v1047_v57, %v1124_v40  ;;  %v350_v52 = vadd.f32 %v1038_v51, %v334_v44  ;;  %v403_v54 = vrot.slane %v362_v45, %v985_v21  ;;  %v335_v55 = vmul.f32 %v1014_v36, %v243_v49 }
  0xa4   :  { %v466_v56 = vmul.f32 %v1047_v57, %v1139_v50  ;;  %v533_v60 = vmul.f32 %v1088_v14, %v1106_v29  ;;  %vm320_vm1 = vcmp.gt.f32.partialorder %v248_v53, 0.5  ;;  %v534_v3 = vmul.f32 %v1088_v14, %v1124_v40 }
  0xa5   :  { %v1153_v61 = vsel %vm416_vm0, %v350_v52, 0.0  ;;  %v351_v62 = vadd.f32 %v1038_v51, %v335_v55  ;;  %vm417_vm2 = vcmp.eq.s32.totalorder %v403_v54, 1  ;;  %v363_v63 = vsel %vm320_vm1, 1, %v880_v0 }
  0xa6   :  { %484 = vrot.lane.b32.xlu1 %v463_v10, %s883_s17  ;;  %482 = vrot.lane.b32.xlu0 %v462_v11, %s883_s17  ;;  %v467_v1 = vmul.f32 %v1047_v57, %v1153_v61  ;;  %v407_v8 = vrot.slane %v363_v63, %v985_v21  ;;  %v336_v9 = vmul.f32 %v1014_v36, %v244_v6  ;;  %vm569_vm7 = vcmask 654336  }
  0xa7   :  { %v1166_v7 = vsel %vm417_vm2, %v351_v62, 0.0  ;;  %v535_v11 = vmul.f32 %v1088_v14, %v1139_v50  ;;  %v536_v15 = vmul.f32 %v1088_v14, %v1153_v61  ;;  %vm747_vm8 = vcmask 7168  }
  0xa8   :  { %v468_v10 = vmul.f32 %v1047_v57, %v1166_v7  ;;  %v352_v12 = vadd.f32 %v1038_v51, %v336_v9  ;;  %vm418_vm3 = vcmp.eq.s32.totalorder %v407_v8, 1  ;;  %v537_v13 = vmul.f32 %v1088_v14, %v1166_v7  ;;  %v865_v51 = vld [vmem:[%s1346_s3 + $0x8] sm:$0x1]  ;;  %s885_s3 = smov 24  }
  0xa9   :  { %vm310_vm4 = vcmp.gt.f32.partialorder %v865_v51, 0.5 }
  0xaa   :  { %551 = vrot.lane.b32.xlu1 %v530_v26, %s884_s6  ;;  %549 = vrot.lane.b32.xlu0 %v529_v27, %s884_s6  ;;  %v429_v36 = vsel %vm418_vm3, %v352_v12, 0.0  ;;  %v353_v17 = vsel %vm310_vm4, 1, %v880_v0  ;;  %v1194_v26 = vpop.permute.xlu0 %433 }
  0xab   :  { %v538_v57 = vmul.f32 %v1088_v14, %v429_v36  ;;  %v367_v19 = vrot.slane %v353_v17, %v985_v21  ;;  %v437_v35 = vmul.f32 %v1194_v26, %v1051_v59  ;;  %v441_v17 = vmul.f32 %v1194_v26, %v1106_v29 }
  0xad   :  { %vm408_vm5 = vcmp.eq.s32.totalorder %v367_v19, 1 }
  0xae   :  { %486 = vrot.lane.b32.xlu1 %v464_v37, %s883_s17  ;;  %553 = vrot.lane.b32.xlu0 %v531_v38, %s884_s6  ;;  %v419_v14 = vsel %vm408_vm5, %v1092_v16, 0.0  ;;  %v438_v16 = vmul.f32 %v1194_v26, %v1049_v58 }
  0xaf   :  { %v436_v33 = vmul.f32 %v1194_v26, %v419_v14 }
  0xb2   :  { %488 = vrot.lane.b32.xlu1 %v465_v47, %s883_s17  ;;  %555 = vrot.lane.b32.xlu0 %v532_v48, %s884_s6 }
  0xb6   :  { %490 = vrot.lane.b32.xlu1 %v466_v56, %s883_s17  ;;  %557 = vrot.lane.b32.xlu0 %v533_v60, %s884_s6  ;;  %v439_v60 = vmul.f32 %v1194_v26, %v1070_v5 }
  0xba   :  { %492 = vrot.lane.b32.xlu1 %v467_v1, %s883_s17  ;;  %559 = vrot.lane.b32.xlu0 %v534_v3, %s884_s6 }
  0xbe   :  { %494 = vrot.lane.b32.xlu1 %v468_v10, %s883_s17  ;;  %561 = vrot.lane.b32.xlu0 %v535_v11, %s884_s6  ;;  %v440_v10 = vmul.f32 %v1194_v26, %v1068_v4 }
  0xc2   :  { %565 = vrot.lane.b32.xlu1 %v537_v13, %s884_s6  ;;  %563 = vrot.lane.b32.xlu0 %v536_v15, %s884_s6 }
  0xc6   :  { %567 = vrot.lane.b32.xlu0 %v538_v57, %s884_s6 }
 0x114   :  { %v481_v27 = vpop.permute.xlu1 %480  ;;  %v479_v28 = vpop.permute.xlu0 %478 }
 0x115   :  { %v497_v34 = vsel %vm496_vm6, %v479_v28, %v481_v27  ;;  %v515_v37 = vadd.f32 %v479_v28, %v436_v33 }
 0x116   :  { %v516_v38 = vadd.f32 %v497_v34, %v437_v35  ;;  %v442_v34 = vmul.f32 %v1194_v26, %v1124_v40  ;;  %v444_v40 = vmul.f32 %v1194_v26, %v1153_v61 }
 0x118   :  { %v485_v31 = vpop.permute.xlu1 %484  ;;  %v483_v32 = vpop.permute.xlu0 %482 }
 0x119   :  { %v498_v42 = vsel %vm496_vm6, %v481_v27, %v483_v32  ;;  %v499_v54 = vsel %vm496_vm6, %v483_v32, %v485_v31 }
 0x11a   :  { %v517_v49 = vadd.f32 %v498_v42, %v438_v16  ;;  %v518_v58 = vadd.f32 %v499_v54, %v439_v60  ;;  %v443_v16 = vmul.f32 %v1194_v26, %v1139_v50  ;;  %v445_v50 = vmul.f32 %v1194_v26, %v1166_v7 }
 0x11c   :  { %v552_v39 = vpop.permute.xlu1 %551  ;;  %v550_v41 = vpop.permute.xlu0 %549 }
 0x11d   :  { %v570_v44 = vsel %vm569_vm7, %v550_v41, %v552_v39  ;;  %v589_v45 = vadd.f32 %v550_v41, %v515_v37 }
 0x11e   :  { %v590_v47 = vadd.f32 %v570_v44, %v516_v38 }
 0x11f   :  { %v605_v48 = vadd.f32 %v1191_v18, %v589_v45 }
 0x120   :  { %v487_v52 = vpop.permute.xlu1 %486  ;;  %v554_v53 = vpop.permute.xlu0 %553  ;;  %v606_v59 = vadd.f32 %v1191_v18, %v590_v47 }
 0x121   :  { %v571_v55 = vsel %vm569_vm7, %v552_v39, %v554_v53  ;;  %v615_v56 = vmax.f32 %v605_v48, 0.0  ;;  %v500_v8 = vsel %vm496_vm6, %v485_v31, %v487_v52 }
 0x122   :  { %v591_v62 = vadd.f32 %v571_v55, %v517_v49  ;;  %v616_v63 = vmax.f32 %v606_v59, 0.0  ;;  %v519_v12 = vadd.f32 %v500_v8, %v440_v10 }
 0x123   :  { %635 = vrot.lane.b32.xlu1 %v615_v56, %s885_s3 }
 0x124   :  { %v489_v1 = vpop.permute.xlu1 %488  ;;  %v556_v3 = vpop.permute.xlu0 %555  ;;  %637 = vrot.lane.b32.xlu0 %v616_v63, %s885_s3  ;;  %v607_v6 = vadd.f32 %v1191_v18, %v591_v62 }
 0x125   :  { %v572_v9 = vsel %vm569_vm7, %v554_v53, %v556_v3  ;;  %v501_v57 = vsel %vm496_vm6, %v487_v52, %v489_v1 }
 0x126   :  { %v592_v5 = vadd.f32 %v572_v9, %v518_v58  ;;  %v617_v11 = vmax.f32 %v607_v6, 0.0  ;;  %v520_v28 = vadd.f32 %v501_v57, %v441_v17 }
 0x128   :  { %v491_v13 = vpop.permute.xlu1 %490  ;;  %v558_v15 = vpop.permute.xlu0 %557  ;;  %639 = vrot.lane.b32.xlu1 %v617_v11, %s885_s3  ;;  %v608_v36 = vadd.f32 %v1191_v18, %v592_v5  ;;  %v886_v5 = vmov 0.0  }
 0x129   :  { %v573_v51 = vsel %vm569_vm7, %v556_v3, %v558_v15  ;;  %v502_v32 = vsel %vm496_vm6, %v489_v1, %v491_v13  ;;  %748 = vst.msk [vmem:[%s1347_s13] sm:$0xff] %vm747_vm8, %v886_v5  ;;  %749 = vst.msk [vmem:[%s1349_s14] sm:$0xff] %vm747_vm8, %v886_v5 }
 0x12a   :  { %v593_v19 = vadd.f32 %v573_v51, %v519_v12  ;;  %v618_v27 = vmax.f32 %v608_v36, 0.0  ;;  %v521_v38 = vadd.f32 %v502_v32, %v442_v34 }
 0x12c   :  { %v493_v4 = vpop.permute.xlu1 %492  ;;  %v560_v14 = vpop.permute.xlu0 %559  ;;  %641 = vrot.lane.b32.xlu0 %v618_v27, %s885_s3  ;;  %v609_v31 = vadd.f32 %v1191_v18, %v593_v19 }
 0x12d   :  { %v574_v33 = vsel %vm569_vm7, %v558_v15, %v560_v14  ;;  %v503_v42 = vsel %vm496_vm6, %v491_v13, %v493_v4  ;;  %v687_v15 = vsel %vm685_vm10, 1, %v880_v0 }
 0x12e   :  { %v594_v35 = vadd.f32 %v574_v33, %v520_v28  ;;  %v619_v37 = vmax.f32 %v609_v31, 0.0  ;;  %v522_v49 = vadd.f32 %v503_v42, %v443_v16  ;;  %v692_v23 = vrot.slane %v687_v15, %v985_v21 }
 0x12f   :  { %v700_v51 = vrot.slane %v687_v15, %v261_v25  ;;  %v704_v27 = vrot.slane %v687_v15, %v265_v24  ;;  %v720_v42 = vrot.slane %v687_v15, %v281_v2 }
 0x130   :  { %v495_v29 = vpop.permute.xlu1 %494  ;;  %v562_v39 = vpop.permute.xlu0 %561  ;;  %643 = vrot.lane.b32.xlu1 %v619_v37, %s885_s3  ;;  %v610_v41 = vadd.f32 %v1191_v18, %v594_v35  ;;  %vm725_vm12 = vcmp.eq.s32.totalorder %v692_v23, 1 }
 0x131   :  { %v504_v44 = vsel %vm496_vm6, %v493_v4, %v495_v29  ;;  %v575_v45 = vsel %vm569_vm7, %v560_v14, %v562_v39  ;;  %v524_v63 = vadd.f32 %v495_v29, %v445_v50  ;;  %vm727_vm13 = vcmp.eq.s32.totalorder %v700_v51, 1  ;;  %v684_v14 = vld [vmem:[%s1341_s4 + $0x8] sm:$0x1] }
 0x132   :  { %v595_v47 = vadd.f32 %v575_v45, %v521_v38  ;;  %v620_v48 = vmax.f32 %v610_v41, 0.0  ;;  %v523_v52 = vadd.f32 %v504_v44, %v444_v40  ;;  %vm728_vm14 = vcmp.eq.s32.totalorder %v704_v27, 1 }
 0x133   :  { %vm686_vm0 = vcmp.gt.f32.partialorder %v684_v14, 0.5  ;;  %v716_v41 = vrot.slane %v687_v15, %v277_v46  ;;  %vm732_vm3 = vcmp.eq.s32.totalorder %v720_v42, 1 }
 0x134   :  { %v566_v53 = vpop.permute.xlu1 %565  ;;  %v564_v59 = vpop.permute.xlu0 %563  ;;  %645 = vrot.lane.b32.xlu0 %v620_v48, %s885_s3  ;;  %v611_v54 = vadd.f32 %v1191_v18, %v595_v47  ;;  %v688_v40 = vsel %vm686_vm0, 1, %v880_v0 }
 0x135   :  { %v576_v55 = vsel %vm569_vm7, %v562_v39, %v564_v59  ;;  %v577_v56 = vsel %vm569_vm7, %v564_v59, %v566_v53  ;;  %vm731_vm2 = vcmp.eq.s32.totalorder %v716_v41, 1  ;;  %v724_v59 = vrot.slane %v688_v40, %v985_v21 }
 0x136   :  { %v596_v60 = vadd.f32 %v576_v55, %v522_v49  ;;  %v597_v62 = vadd.f32 %v577_v56, %v523_v52  ;;  %v621_v61 = vmax.f32 %v611_v54, 0.0 }
 0x137   :  { %vm733_vm4 = vcmp.eq.s32.totalorder %v724_v59, 1 }
 0x138   :  { %v568_v58 = vpop.permute.xlu0 %567  ;;  %647 = vrot.lane.b32.xlu1 %v621_v61, %s885_s3  ;;  %v612_v1 = vadd.f32 %v1191_v18, %v596_v60  ;;  %v613_v3 = vadd.f32 %v1191_v18, %v597_v62 }
 0x139   :  { %v578_v6 = vsel %vm569_vm7, %v566_v53, %v568_v58 }
 0x13a   :  { %v598_v8 = vadd.f32 %v578_v6, %v524_v63  ;;  %v622_v9 = vmax.f32 %v612_v1, 0.0  ;;  %v623_v10 = vmax.f32 %v613_v3, 0.0 }
 0x13c   :  { %649 = vrot.lane.b32.xlu0 %v622_v9, %s885_s3  ;;  %651 = vrot.lane.b32.xlu1 %v623_v10, %s885_s3  ;;  %v614_v7 = vadd.f32 %v1191_v18, %v598_v8  ;;  %v696_v18 = vrot.slane %v687_v15, %v257_v22  ;;  %v708_v22 = vrot.slane %v687_v15, %v269_v30 }
 0x13d   :  { %v712_v30 = vrot.slane %v687_v15, %v273_v43 }
 0x13e   :  { %v624_v26 = vmax.f32 %v614_v7, 0.0  ;;  %vm726_vm11 = vcmp.eq.s32.totalorder %v696_v18, 1  ;;  %vm729_vm15 = vcmp.eq.s32.totalorder %v708_v22, 1 }
 0x13f   :  { %vm730_vm1 = vcmp.eq.s32.totalorder %v712_v30, 1 }
 0x140   :  { %653 = vrot.lane.b32.xlu0 %v624_v26, %s885_s3 }
 0x195   :  { %v636_v11 = vpop.permute.xlu1 %635 }
 0x196   :  { %v638_v12 = vpop.permute.xlu0 %637 }
 0x197   :  { %v656_v13 = vsel %vm655_vm9, %v636_v11, %v638_v12 }
 0x198   :  { %674 = vst [vmem:[%s1348_s12] sm:$0xff] %v656_v13  ;;  %v734_v31 = vsel %vm725_vm12, %v656_v13, 0.0  ;;  %v750_v13 = vld [vmem:[%s1347_s13] sm:$0xff] }
 0x199   :  { %v765_v35 = vmul.f32 %v734_v31, %v734_v31 }
 0x19a   :  { %v640_v36 = vpop.permute.xlu1 %639 }
 0x19b   :  { %v657_v57 = vsel %vm655_vm9, %v638_v12, %v640_v36 }
 0x19c   :  { %675 = vst [vmem:[%s1348_s12 + $0x8] sm:$0xff] %v657_v57  ;;  %v735_v28 = vsel %vm726_vm11, %v657_v57, 0.0 }
 0x19d   :  { %v766_v32 = vmul.f32 %v735_v28, %v735_v28  ;;  %v751_v37 = vadd.f32 %v735_v28, %v734_v31 }
 0x19e   :  { %v642_v17 = vpop.permute.xlu0 %641 }
 0x19f   :  { %v658_v19 = vsel %vm655_vm9, %v640_v36, %v642_v17  ;;  %v774_v43 = vadd.f32 %v766_v32, %v765_v35  ;;  %v764_v36 = vld [vmem:[%s1349_s14] sm:$0xff] }
 0x1a0   :  { %676 = vst [vmem:[%s1348_s12 + $0x10] sm:$0xff] %v658_v19  ;;  %v736_v24 = vsel %vm727_vm13, %v658_v19, 0.0 }
 0x1a1   :  { %v767_v38 = vmul.f32 %v736_v24, %v736_v24  ;;  %v752_v44 = vadd.f32 %v751_v37, %v736_v24 }
 0x1a2   :  { %v644_v4 = vpop.permute.xlu1 %643 }
 0x1a3   :  { %v659_v25 = vsel %vm655_vm9, %v642_v17, %v644_v4  ;;  %v775_v47 = vadd.f32 %v774_v43, %v767_v38 }
 0x1a4   :  { %677 = vst [vmem:[%s1348_s12 + $0x18] sm:$0xff] %v659_v25  ;;  %v737_v33 = vsel %vm728_vm14, %v659_v25, 0.0 }
 0x1a5   :  { %v768_v45 = vmul.f32 %v737_v33, %v737_v33  ;;  %v753_v48 = vadd.f32 %v752_v44, %v737_v33 }
 0x1a6   :  { %v646_v34 = vpop.permute.xlu0 %645 }
 0x1a7   :  { %v660_v29 = vsel %vm655_vm9, %v644_v4, %v646_v34  ;;  %v776_v20 = vadd.f32 %v775_v47, %v768_v45 }
 0x1a8   :  { %678 = vst [vmem:[%s1348_s12 + $0x20] sm:$0xff] %v660_v29  ;;  %v738_v39 = vsel %vm729_vm15, %v660_v29, 0.0 }
 0x1a9   :  { %v769_v49 = vmul.f32 %v738_v39, %v738_v39  ;;  %v754_v2 = vadd.f32 %v753_v48, %v738_v39 }
 0x1aa   :  { %v648_v16 = vpop.permute.xlu1 %647 }
 0x1ab   :  { %v661_v52 = vsel %vm655_vm9, %v646_v34, %v648_v16  ;;  %v777_v0 = vadd.f32 %v776_v20, %v769_v49 }
 0x1ac   :  { %679 = vst [vmem:[%s1348_s12 + $0x28] sm:$0xff] %v661_v52  ;;  %v739_v46 = vsel %vm730_vm1, %v661_v52, 0.0 }
 0x1ad   :  { %v770_v53 = vmul.f32 %v739_v46, %v739_v46  ;;  %v755_v56 = vadd.f32 %v754_v2, %v739_v46 }
 0x1ae   :  { %v650_v54 = vpop.permute.xlu0 %649  ;;  %v652_v55 = vpop.permute.xlu1 %651 }
 0x1af   :  { %v662_v50 = vsel %vm655_vm9, %v648_v16, %v650_v54  ;;  %v663_v60 = vsel %vm655_vm9, %v650_v54, %v652_v55  ;;  %v778_v63 = vadd.f32 %v777_v0, %v770_v53 }
 0x1b0   :  { %680 = vst [vmem:[%s1348_s12 + $0x30] sm:$0xff] %v662_v50  ;;  %v740_v62 = vsel %vm731_vm2, %v662_v50, 0.0  ;;  %681 = vst [vmem:[%s1348_s12 + $0x38] sm:$0xff] %v663_v60  ;;  %v741_v61 = vsel %vm732_vm3, %v663_v60, 0.0 }
 0x1b1   :  { %v756_v21 = vadd.f32 %v755_v56, %v740_v62  ;;  %v771_v58 = vmul.f32 %v740_v62, %v740_v62  ;;  %v772_v3 = vmul.f32 %v741_v61, %v741_v61 }
 0x1b2   :  { %v654_v1 = vpop.permute.xlu0 %653 }
 0x1b3   :  { %v664_v6 = vsel %vm655_vm9, %v652_v55, %v654_v1  ;;  %v757_v8 = vadd.f32 %v756_v21, %v741_v61  ;;  %v779_v9 = vadd.f32 %v778_v63, %v771_v58 }
 0x1b4   :  { %682 = vst [vmem:[%s1348_s12 + $0x40] sm:$0xff] %v664_v6  ;;  %v742_v10 = vsel %vm733_vm4, %v664_v6, 0.0 }
 0x1b5   :  { %v758_v7 = vadd.f32 %v757_v8, %v742_v10  ;;  %v773_v26 = vmul.f32 %v742_v10, %v742_v10  ;;  %v780_v11 = vadd.f32 %v779_v9, %v772_v3 }
 0x1b7   :  { %759 = vadd.xlane.f32.xlu1 %v758_v7  ;;  %v781_v12 = vadd.f32 %v780_v11, %v773_v26 }
 0x1b9   :  { %782 = vadd.xlane.f32.xlu0 %v781_v12 }
 0x244   :  { %v760_v15 = vpop.xlane.xlu1 %759 }
 0x245   :  { %v761_v18 = vadd.f32 %v760_v15, %v750_v13 }
 0x246   :  { %v783_v57 = vpop.xlane.xlu0 %782 }
 0x247   :  { %763 = vst.msk [vmem:[%s1347_s13] sm:$0xff] %vm747_vm8, %v761_v18  ;;  %v784_v23 = vadd.f32 %v783_v57, %v764_v36 }
 0x249   :  { %785 = vst.msk [vmem:[%s1349_s14] sm:$0xff] %vm747_vm8, %v784_v23 }

// kernel: lska11_forward.11
= control target key start
LH: loop header
LB: loop body
LE: loop exit
PB: predicated region body
PF: predicated region fallthrough
CT: control target
= control target key end

     0   :  { %v261_v0 = vmov 0   ;;  %vm171_vm0 = vcmask 7168   ;;  %v262_v15 = vmov 0.0   ;;  %s425_s2 = inlined_call_operand.vmem [shape: f32[1,8,1], index: 2, kind: input, shape index: {}]   ;;  %s426_s3 = inlined_call_operand.vmem [shape: f32[1,8,1], index: 3, kind: input, shape index: {}]   ;;  %s427_s4 = inlined_call_operand.vmem [shape: f32[8,1], index: 4, kind: input, shape index: {}]   ;;  %s428_s5 = inlined_call_operand.vmem [shape: f32[8,1], index: 5, kind: input, shape index: {}]   ;;  %s429_s7 = inlined_call_operand.vmem [shape: f32[1,8,1], index: 7, kind: output, shape index: {1}]   ;;  %s430_s1 = inlined_call_operand.vmem [shape: f32[1,8,1152], index: 1, kind: input, shape index: {}]   ;;  %s431_s0 = inlined_call_operand.vmem [shape: f32[1,8,1152], index: 0, kind: input, shape index: {}]   ;;  %s432_s6 = inlined_call_operand.vmem [shape: f32[8,1152], index: 6, kind: output, shape index: {0}]   ;;  %s433_s8 = inlined_call_operand.vmem [shape: f32[1,8,1], index: 8, kind: output, shape index: {2}]  }
   0x1   :  { %258 = vset.pattern.permute.xlu0 %v261_v0  ;;  %v80_v1 = vld [vmem:[%s425_s2] sm:$0xff]  ;;  %172 = vst.msk [vmem:[%s429_s7] sm:$0xff] %vm171_vm0, %v262_v15  ;;  %v95_v17 = vld [vmem:[%s430_s1 + $0x8] sm:$0xff]  ;;  %v96_v18 = vld [vmem:[%s430_s1 + $0x10] sm:$0xff] }
   0x2   :  { %v81_v2 = vld [vmem:[%s426_s3] sm:$0xff]  ;;  %v82_v3 = vmul.f32 0.001953125, %v80_v1  ;;  %v97_v20 = vld [vmem:[%s430_s1 + $0x18] sm:$0xff]  ;;  %v99_v22 = vld [vmem:[%s430_s1 + $0x28] sm:$0xff]  ;;  %173 = vst.msk [vmem:[%s433_s8] sm:$0xff] %vm171_vm0, %v262_v15 }
   0x3   :  { %v83_v4 = vmul.f32 0.001953125, %v81_v2  ;;  %v87_v9 = vld [vmem:[%s427_s4] sm:$0xff]  ;;  %v100_v23 = vld [vmem:[%s430_s1 + $0x30] sm:$0xff]  ;;  %v101_v24 = vld [vmem:[%s430_s1 + $0x38] sm:$0xff] }
   0x4   :  { %v84_v5 = vmul.f32 %v82_v3, %v82_v3  ;;  %v91_v12 = vld [vmem:[%s428_s5] sm:$0xff]  ;;  %v132_v37 = vld [vmem:[%s431_s0 + $0x8] sm:$0xff]  ;;  %v133_v38 = vld [vmem:[%s431_s0 + $0x10] sm:$0xff] }
   0x5   :  { %v94_v16 = vld [vmem:[%s430_s1] sm:$0xff]  ;;  %v134_v39 = vld [vmem:[%s431_s0 + $0x18] sm:$0xff]  ;;  %v136_v45 = vld [vmem:[%s431_s0 + $0x28] sm:$0xff] }
   0x6   :  { %v85_v6 = vsub.f32 %v83_v4, %v84_v5  ;;  %v98_v21 = vld [vmem:[%s430_s1 + $0x20] sm:$0xff]  ;;  %v137_v46 = vld [vmem:[%s431_s0 + $0x30] sm:$0xff]  ;;  %v138_v51 = vld [vmem:[%s431_s0 + $0x38] sm:$0xff] }
   0x7   :  { %v102_v25 = vld [vmem:[%s430_s1 + $0x40] sm:$0xff] }
   0x8   :  { %v86_v7 = vmax.f32 %v85_v6, 0.0  ;;  %v131_v31 = vld [vmem:[%s431_s0] sm:$0xff] }
   0x9   :  { %v135_v44 = vld [vmem:[%s431_s0 + $0x20] sm:$0xff] }
   0xa   :  { %v88_v8 = vadd.f32 1e-05, %v86_v7  ;;  %v139_v52 = vld [vmem:[%s431_s0 + $0x40] sm:$0xff] }
   0xc   :  { %259 = vrsqrt.f32 %v88_v8 }
  0x16   :  { %v260_v10 = vpop.eup %259 }
  0x17   :  { %v90_v11 = vmul.f32 %v260_v10, %v87_v9 }
  0x19   :  { %105 = vperm.xlu0 %258, %v90_v11   ;;  %v92_v13 = vmul.f32 %v90_v11, %v82_v3 }
  0x1b   :  { %v93_v14 = vsub.f32 %v91_v12, %v92_v13 }
  0x1d   :  { %119 = vperm.xlu0 %258, %v93_v14  }
  0x98   :  { %v106_v19 = vpop.permute.xlu0 %105 }
  0x99   :  { %v108_v26 = vmul.f32 %v106_v19, %v94_v16  ;;  %v109_v27 = vmul.f32 %v106_v19, %v95_v17  ;;  %v110_v28 = vmul.f32 %v106_v19, %v96_v18  ;;  %v111_v29 = vmul.f32 %v106_v19, %v97_v20 }
  0x9a   :  { %v112_v30 = vmul.f32 %v106_v19, %v98_v21  ;;  %v113_v33 = vmul.f32 %v106_v19, %v99_v22  ;;  %v114_v34 = vmul.f32 %v106_v19, %v100_v23  ;;  %v115_v35 = vmul.f32 %v106_v19, %v101_v24 }
  0x9b   :  { %v116_v36 = vmul.f32 %v106_v19, %v102_v25 }
  0x9c   :  { %v120_v32 = vpop.permute.xlu0 %119 }
  0x9d   :  { %v122_v40 = vadd.f32 %v120_v32, %v108_v26  ;;  %v123_v41 = vadd.f32 %v120_v32, %v109_v27  ;;  %v124_v42 = vadd.f32 %v120_v32, %v110_v28  ;;  %v125_v43 = vadd.f32 %v120_v32, %v111_v29 }
  0x9e   :  { %v126_v47 = vadd.f32 %v120_v32, %v112_v30  ;;  %v127_v48 = vadd.f32 %v120_v32, %v113_v33  ;;  %v128_v49 = vadd.f32 %v120_v32, %v114_v34  ;;  %v129_v50 = vadd.f32 %v120_v32, %v115_v35  ;;  %v174_v34 = vld [vmem:[%s429_s7] sm:$0xff] }
  0x9f   :  { %v130_v53 = vadd.f32 %v120_v32, %v116_v36  ;;  %v140_v54 = vmul.f32 %v131_v31, %v122_v40  ;;  %v141_v55 = vmul.f32 %v132_v37, %v123_v41  ;;  %v142_v56 = vmul.f32 %v133_v38, %v124_v42  ;;  %v188_v37 = vld [vmem:[%s433_s8] sm:$0xff] }
  0xa0   :  { %v143_v57 = vmul.f32 %v134_v39, %v125_v43  ;;  %v144_v58 = vmul.f32 %v135_v44, %v126_v47  ;;  %v145_v59 = vmul.f32 %v136_v45, %v127_v48  ;;  %v146_v60 = vmul.f32 %v137_v46, %v128_v49 }
  0xa1   :  { %v147_v61 = vmul.f32 %v138_v51, %v129_v50  ;;  %v148_v62 = vmul.f32 %v139_v52, %v130_v53  ;;  %v149_v63 = vmax.f32 %v140_v54, 0.0  ;;  %v150_v0 = vmax.f32 %v141_v55, 0.0 }
  0xa2   :  { %v151_v1 = vmax.f32 %v142_v56, 0.0  ;;  %v152_v2 = vmax.f32 %v143_v57, 0.0  ;;  %v153_v3 = vmax.f32 %v144_v58, 0.0  ;;  %v154_v4 = vmax.f32 %v145_v59, 0.0 }
  0xa3   :  { %v155_v5 = vmax.f32 %v146_v60, 0.0  ;;  %v156_v6 = vmax.f32 %v147_v61, 0.0  ;;  %v157_v7 = vmax.f32 %v148_v62, 0.0  ;;  %159 = vst [vmem:[%s432_s6 + $0x8] sm:$0xff] %v150_v0  ;;  %v175_v8 = vadd.f32 %v150_v0, %v149_v63  ;;  %158 = vst [vmem:[%s432_s6] sm:$0xff] %v149_v63 }
  0xa4   :  { %160 = vst [vmem:[%s432_s6 + $0x10] sm:$0xff] %v151_v1  ;;  %161 = vst [vmem:[%s432_s6 + $0x18] sm:$0xff] %v152_v2  ;;  %v189_v9 = vmul.f32 %v149_v63, %v149_v63  ;;  %v190_v10 = vmul.f32 %v150_v0, %v150_v0  ;;  %v191_v12 = vmul.f32 %v151_v1, %v151_v1 }
  0xa5   :  { %162 = vst [vmem:[%s432_s6 + $0x20] sm:$0xff] %v153_v3  ;;  %163 = vst [vmem:[%s432_s6 + $0x28] sm:$0xff] %v154_v4  ;;  %v176_v11 = vadd.f32 %v175_v8, %v151_v1  ;;  %v192_v16 = vmul.f32 %v152_v2, %v152_v2  ;;  %v193_v19 = vmul.f32 %v153_v3, %v153_v3 }
  0xa6   :  { %164 = vst [vmem:[%s432_s6 + $0x30] sm:$0xff] %v155_v5  ;;  %165 = vst [vmem:[%s432_s6 + $0x38] sm:$0xff] %v156_v6  ;;  %v198_v13 = vadd.f32 %v190_v10, %v189_v9  ;;  %v194_v22 = vmul.f32 %v154_v4, %v154_v4  ;;  %v195_v25 = vmul.f32 %v155_v5, %v155_v5 }
  0xa7   :  { %166 = vst [vmem:[%s432_s6 + $0x40] sm:$0xff] %v157_v7  ;;  %v177_v14 = vadd.f32 %v176_v11, %v152_v2  ;;  %v196_v28 = vmul.f32 %v156_v6, %v156_v6  ;;  %v197_v32 = vmul.f32 %v157_v7, %v157_v7 }
  0xa8   :  { %v199_v17 = vadd.f32 %v198_v13, %v191_v12 }
  0xa9   :  { %v178_v18 = vadd.f32 %v177_v14, %v153_v3 }
  0xaa   :  { %v200_v20 = vadd.f32 %v199_v17, %v192_v16 }
  0xab   :  { %v179_v21 = vadd.f32 %v178_v18, %v154_v4 }
  0xac   :  { %v201_v23 = vadd.f32 %v200_v20, %v193_v19 }
  0xad   :  { %v180_v24 = vadd.f32 %v179_v21, %v155_v5 }
  0xae   :  { %v202_v26 = vadd.f32 %v201_v23, %v194_v22 }
  0xaf   :  { %v181_v27 = vadd.f32 %v180_v24, %v156_v6 }
  0xb0   :  { %v203_v29 = vadd.f32 %v202_v26, %v195_v25 }
  0xb1   :  { %v182_v30 = vadd.f32 %v181_v27, %v157_v7 }
  0xb2   :  { %v204_v31 = vadd.f32 %v203_v29, %v196_v28 }
  0xb3   :  { %183 = vadd.xlane.f32.xlu1 %v182_v30 }
  0xb4   :  { %v205_v33 = vadd.f32 %v204_v31, %v197_v32 }
  0xb7   :  { %206 = vadd.xlane.f32.xlu1 %v205_v33 }
 0x140   :  { %v184_v35 = vpop.xlane.xlu1 %183 }
 0x141   :  { %v185_v36 = vadd.f32 %v184_v35, %v174_v34 }
 0x143   :  { %187 = vst.msk [vmem:[%s429_s7] sm:$0xff] %vm171_vm0, %v185_v36 }
 0x144   :  { %v207_v38 = vpop.xlane.xlu1 %206 }
 0x145   :  { %v208_v39 = vadd.f32 %v207_v38, %v188_v37 }
 0x147   :  { %209 = vst.msk [vmem:[%s433_s8] sm:$0xff] %vm171_vm0, %v208_v39 }

// kernel: lska11_forward.10
= control target key start
LH: loop header
LB: loop body
LE: loop exit
PB: predicated region body
PF: predicated region fallthrough
CT: control target
= control target key end

     0   :  { %v810_v0 = vmov 0   ;;  %v811_v7 = vmov 1   ;;  %v812_v11 = vmov 3   ;;  %v813_v12 = vmov 4   ;;  %s1240_s2 = inlined_call_operand.vmem [shape: f32[8,8], index: 2, kind: input, shape index: {}]   ;;  %s1241_s4 = inlined_call_operand.vmem [shape: f32[1,8,1], index: 4, kind: input, shape index: {}]   ;;  %s1242_s5 = inlined_call_operand.vmem [shape: f32[1,8,1], index: 5, kind: input, shape index: {}]   ;;  %s1243_s6 = inlined_call_operand.vmem [shape: f32[8,1], index: 6, kind: input, shape index: {}]   ;;  %s1244_s7 = inlined_call_operand.vmem [shape: f32[8,1], index: 7, kind: input, shape index: {}]   ;;  %s1245_s3 = inlined_call_operand.vmem [shape: f32[8,1], index: 3, kind: input, shape index: {}]   ;;  %s1246_s9 = inlined_call_operand.vmem [shape: f32[1,8,1], index: 9, kind: output, shape index: {1}]   ;;  %s1247_s1 = inlined_call_operand.vmem [shape: f32[1,1,1152], index: 1, kind: input, shape index: {}]   ;;  %s1248_s0 = inlined_call_operand.vmem [shape: f32[1,8,1152], index: 0, kind: input, shape index: {}]   ;;  %s1249_s8 = inlined_call_operand.vmem [shape: f32[1,8,1152], index: 8, kind: output, shape index: {0}]   ;;  %s1250_s10 = inlined_call_operand.vmem [shape: f32[1,8,1], index: 10, kind: output, shape index: {2}]  }
   0x1   :  { %798 = vset.pattern.permute.xlu1 %v810_v0  ;;  %v193_v1 = vld [vmem:[%s1240_s2] sm:$0xff]  ;;  %800 = vset.pattern.permute.xlu0 %v810_v0  ;;  %v814_v14 = vmov 6   ;;  %v815_v19 = vmov 7   ;;  %v816_v21 = vmov 2   ;;  %v817_v22 = vmov 5   ;;  %v101_v49 = vld [vmem:[%s1248_s0 + $0x8] sm:$0xff] }
   0x2   :  { %v82_v2 = vld [vmem:[%s1241_s4] sm:$0xff]  ;;  %196 = vperm.xlu1 %798, %v193_v1   ;;  %vm705_vm0 = vcmask 7168   ;;  %v818_v24 = vmov 0.0   ;;  %v139_v25 = vlaneseq  ;;  %v97_v28 = vld [vmem:[%s1247_s1 + $0x8] sm:$0x1]  ;;  %v102_v50 = vld [vmem:[%s1248_s0 + $0x10] sm:$0xff] }
   0x3   :  { %v83_v3 = vld [vmem:[%s1242_s5] sm:$0xff]  ;;  %v84_v4 = vmul.f32 0.001953125, %v82_v2  ;;  %706 = vst.msk [vmem:[%s1246_s9] sm:$0xff] %vm705_vm0, %v818_v24  ;;  %vm99_vm2 = vcmp.gt.f32.partialorder %v97_v28, 0.5  ;;  %v103_v51 = vld [vmem:[%s1248_s0 + $0x18] sm:$0xff]  ;;  %v105_v54 = vld [vmem:[%s1248_s0 + $0x28] sm:$0xff] }
   0x4   :  { %v85_v5 = vmul.f32 0.001953125, %v83_v3  ;;  %v89_v13 = vld [vmem:[%s1243_s6] sm:$0xff]  ;;  %v140_v27 = vshrl.u32 %v139_v25, 7  ;;  %v138_v38 = vsel %vm99_vm2, 1, %v810_v0  ;;  %v106_v55 = vld [vmem:[%s1248_s0 + $0x30] sm:$0xff]  ;;  %v107_v58 = vld [vmem:[%s1248_s0 + $0x38] sm:$0xff] }
   0x5   :  { %v86_v6 = vmul.f32 %v84_v4, %v84_v4  ;;  %v93_v17 = vld [vmem:[%s1244_s7] sm:$0xff]  ;;  %707 = vst.msk [vmem:[%s1250_s10] sm:$0xff] %vm705_vm0, %v818_v24 }
   0x6   :  { %799 = vset.pattern.permute.xlu1 %v811_v7  ;;  %v659_v23 = vld [vmem:[%s1245_s3] sm:$0xff]  ;;  %v906_v29 = vsub.s32 0, %v140_v27  ;;  %v908_v30 = vsub.s32 1, %v140_v27  ;;  %v910_v31 = vsub.s32 2, %v140_v27  ;;  %v913_v33 = vsub.s32 3, %v140_v27 }
   0x7   :  { %v87_v8 = vsub.f32 %v85_v5, %v86_v6  ;;  %254 = vperm.xlu1 %799, %v193_v1   ;;  %v96_v26 = vld [vmem:[%s1247_s1] sm:$0xff]  ;;  %v915_v34 = vsub.s32 4, %v140_v27  ;;  %v917_v35 = vsub.s32 5, %v140_v27  ;;  %v919_v36 = vsub.s32 6, %v140_v27 }
   0x8   :  { %vm98_vm1 = vcmp.gt.f32.partialorder %v96_v26, 0.5  ;;  %v921_v37 = vsub.s32 7, %v140_v27  ;;  %v100_v45 = vld [vmem:[%s1248_s0] sm:$0xff]  ;;  %v174_v48 = vrot.slane %v138_v38, %v906_v29 }
   0x9   :  { %v88_v9 = vmax.f32 %v87_v8, 0.0  ;;  %v137_v32 = vsel %vm98_vm1, 1, %v810_v0  ;;  %v104_v53 = vld [vmem:[%s1248_s0 + $0x20] sm:$0xff] }
   0xa   :  { %v142_v39 = vrot.slane %v137_v32, %v906_v29  ;;  %v146_v40 = vrot.slane %v137_v32, %v908_v30  ;;  %v150_v41 = vrot.slane %v137_v32, %v910_v31  ;;  %v154_v42 = vrot.slane %v137_v32, %v913_v33  ;;  %v108_v59 = vld [vmem:[%s1248_s0 + $0x40] sm:$0xff] }
   0xb   :  { %v90_v10 = vadd.f32 1e-05, %v88_v9  ;;  %802 = vset.pattern.permute.xlu1 %v812_v11  ;;  %v158_v43 = vrot.slane %v137_v32, %v915_v34  ;;  %v162_v44 = vrot.slane %v137_v32, %v917_v35  ;;  %v166_v46 = vrot.slane %v137_v32, %v919_v36  ;;  %v708_v2 = vld [vmem:[%s1246_s9] sm:$0xff] }
   0xc   :  { %370 = vperm.xlu1 %802, %v193_v1   ;;  %v170_v47 = vrot.slane %v137_v32, %v921_v37  ;;  %vm954_vm3 = vcmp.eq.s32.totalorder %v142_v39, 1  ;;  %vm958_vm4 = vcmp.eq.s32.totalorder %v146_v40, 1  ;;  %vm968_vm5 = vcmp.eq.s32.totalorder %v150_v41, 1 }
   0xd   :  { %808 = vrsqrt.f32 %v90_v10  ;;  %vm972_vm6 = vcmp.eq.s32.totalorder %v154_v42, 1  ;;  %vm976_vm7 = vcmp.eq.s32.totalorder %v158_v43, 1  ;;  %vm980_vm8 = vcmp.eq.s32.totalorder %v162_v44, 1 }
   0xe   :  { %vm984_vm9 = vcmp.eq.s32.totalorder %v166_v46, 1  ;;  %vm988_vm10 = vcmp.eq.s32.totalorder %v170_v47, 1  ;;  %vm992_vm11 = vcmp.eq.s32.totalorder %v174_v48, 1 }
  0x10   :  { %803 = vset.pattern.permute.xlu1 %v813_v12 }
  0x11   :  { %428 = vperm.xlu1 %803, %v193_v1  }
  0x15   :  { %805 = vset.pattern.permute.xlu1 %v814_v14 }
  0x16   :  { %544 = vperm.xlu1 %805, %v193_v1  }
  0x17   :  { %v809_v15 = vpop.eup %808 }
  0x18   :  { %v92_v16 = vmul.f32 %v809_v15, %v89_v13 }
  0x1a   :  { %111 = vperm.xlu0 %800, %v92_v16   ;;  %v94_v18 = vmul.f32 %v92_v16, %v84_v4  ;;  %806 = vset.pattern.permute.xlu1 %v815_v19 }
  0x1b   :  { %602 = vperm.xlu1 %806, %v193_v1  }
  0x1c   :  { %v95_v20 = vsub.f32 %v93_v17, %v94_v18 }
  0x1e   :  { %125 = vperm.xlu0 %800, %v95_v20  }
  0x22   :  { %801 = vset.pattern.permute.xlu0 %v816_v21 }
  0x23   :  { %312 = vperm.xlu0 %801, %v193_v1  }
  0x27   :  { %804 = vset.pattern.permute.xlu0 %v817_v22 }
  0x28   :  { %486 = vperm.xlu0 %804, %v193_v1  }
  0x2c   :  { %807 = vset.pattern.permute.xlu0 %v810_v0 }
  0x2d   :  { %662 = vperm.xlu0 %807, %v659_v23  }
  0x81   :  { %v197_v38 = vpop.permute.xlu1 %196 }
  0x99   :  { %v112_v52 = vpop.permute.xlu0 %111 }
  0x9a   :  { %v114_v0 = vmul.f32 %v112_v52, %v100_v45  ;;  %v115_v4 = vmul.f32 %v112_v52, %v101_v49  ;;  %v116_v5 = vmul.f32 %v112_v52, %v102_v50  ;;  %v117_v6 = vmul.f32 %v112_v52, %v103_v51 }
  0x9b   :  { %v118_v7 = vmul.f32 %v112_v52, %v104_v53  ;;  %v119_v9 = vmul.f32 %v112_v52, %v105_v54  ;;  %v120_v10 = vmul.f32 %v112_v52, %v106_v55  ;;  %v121_v11 = vmul.f32 %v112_v52, %v107_v58 }
  0x9c   :  { %v122_v12 = vmul.f32 %v112_v52, %v108_v59 }
  0x9d   :  { %v126_v8 = vpop.permute.xlu0 %125 }
  0x9e   :  { %v128_v13 = vadd.f32 %v126_v8, %v114_v0  ;;  %v129_v14 = vadd.f32 %v126_v8, %v115_v4  ;;  %v130_v15 = vadd.f32 %v126_v8, %v116_v5  ;;  %v131_v16 = vadd.f32 %v126_v8, %v117_v6 }
  0x9f   :  { %v132_v17 = vadd.f32 %v126_v8, %v118_v7  ;;  %v133_v18 = vadd.f32 %v126_v8, %v119_v9  ;;  %v134_v19 = vadd.f32 %v126_v8, %v120_v10  ;;  %v135_v20 = vadd.f32 %v126_v8, %v121_v11  ;;  %v255_v7 = vpop.permute.xlu1 %254 }
  0xa0   :  { %v136_v21 = vadd.f32 %v126_v8, %v122_v12  ;;  %v998_v22 = vsel %vm954_vm3, %v128_v13, 0.0  ;;  %v1002_v23 = vsel %vm958_vm4, %v129_v14, 0.0  ;;  %v1006_v25 = vsel %vm968_vm5, %v130_v15, 0.0 }
  0xa1   :  { %v1010_v26 = vsel %vm972_vm6, %v131_v16, 0.0  ;;  %v1014_v27 = vsel %vm976_vm7, %v132_v17, 0.0  ;;  %v1018_v28 = vsel %vm980_vm8, %v133_v18, 0.0  ;;  %v1022_v32 = vsel %vm984_vm9, %v134_v19, 0.0 }
  0xa2   :  { %v1026_v39 = vsel %vm988_vm10, %v135_v20, 0.0  ;;  %v1030_v40 = vsel %vm992_vm11, %v136_v21, 0.0  ;;  %v202_v41 = vrot.slane %v998_v22, %v906_v29  ;;  %v206_v42 = vrot.slane %v1002_v23, %v906_v29 }
  0xa3   :  { %v210_v43 = vrot.slane %v1006_v25, %v906_v29  ;;  %v214_v44 = vrot.slane %v1010_v26, %v906_v29  ;;  %v218_v45 = vrot.slane %v1014_v27, %v906_v29  ;;  %v222_v46 = vrot.slane %v1018_v28, %v906_v29 }
  0xa4   :  { %v226_v47 = vrot.slane %v1022_v32, %v906_v29  ;;  %v230_v48 = vrot.slane %v1026_v39, %v906_v29  ;;  %v234_v49 = vrot.slane %v1030_v40, %v906_v29  ;;  %v235_v50 = vmul.f32 %v202_v41, %v197_v38 }
  0xa5   :  { %v236_v51 = vmul.f32 %v206_v42, %v197_v38  ;;  %v237_v52 = vmul.f32 %v210_v43, %v197_v38  ;;  %v238_v53 = vmul.f32 %v214_v44, %v197_v38  ;;  %v239_v54 = vmul.f32 %v218_v45, %v197_v38 }
  0xa6   :  { %v240_v55 = vmul.f32 %v222_v46, %v197_v38  ;;  %v241_v58 = vmul.f32 %v226_v47, %v197_v38  ;;  %v242_v59 = vmul.f32 %v230_v48, %v197_v38  ;;  %v243_v0 = vmul.f32 %v234_v49, %v197_v38  ;;  %v313_v46 = vpop.permute.xlu0 %312 }
  0xa7   :  { %v260_v4 = vrot.slane %v998_v22, %v908_v30  ;;  %v264_v5 = vrot.slane %v1002_v23, %v908_v30  ;;  %v268_v6 = vrot.slane %v1006_v25, %v908_v30  ;;  %v272_v29 = vrot.slane %v1010_v26, %v908_v30 }
  0xa8   :  { %v276_v8 = vrot.slane %v1014_v27, %v908_v30  ;;  %v280_v9 = vrot.slane %v1018_v28, %v908_v30  ;;  %v284_v10 = vrot.slane %v1022_v32, %v908_v30  ;;  %v288_v11 = vrot.slane %v1026_v39, %v908_v30 }
  0xa9   :  { %v292_v12 = vrot.slane %v1030_v40, %v908_v30  ;;  %v293_v13 = vmul.f32 %v260_v4, %v255_v7  ;;  %v294_v14 = vmul.f32 %v264_v5, %v255_v7  ;;  %v295_v15 = vmul.f32 %v268_v6, %v255_v7 }
  0xaa   :  { %v296_v16 = vmul.f32 %v272_v29, %v255_v7  ;;  %v297_v17 = vmul.f32 %v276_v8, %v255_v7  ;;  %v298_v18 = vmul.f32 %v280_v9, %v255_v7  ;;  %v299_v19 = vmul.f32 %v284_v10, %v255_v7 }
  0xab   :  { %v300_v20 = vmul.f32 %v288_v11, %v255_v7  ;;  %v301_v21 = vmul.f32 %v292_v12, %v255_v7  ;;  %v302_v38 = vadd.f32 %v293_v13, %v235_v50  ;;  %v303_v41 = vadd.f32 %v294_v14, %v236_v51 }
  0xac   :  { %v304_v42 = vadd.f32 %v295_v15, %v237_v52  ;;  %v305_v43 = vadd.f32 %v296_v16, %v238_v53  ;;  %v306_v44 = vadd.f32 %v297_v17, %v239_v54  ;;  %v307_v45 = vadd.f32 %v298_v18, %v240_v55 }
  0xad   :  { %v308_v47 = vadd.f32 %v299_v19, %v241_v58  ;;  %v309_v48 = vadd.f32 %v300_v20, %v242_v59  ;;  %v310_v49 = vadd.f32 %v301_v21, %v243_v0  ;;  %v318_v30 = vrot.slane %v998_v22, %v910_v31  ;;  %v371_v21 = vpop.permute.xlu1 %370 }
  0xae   :  { %v322_v4 = vrot.slane %v1002_v23, %v910_v31  ;;  %v326_v5 = vrot.slane %v1006_v25, %v910_v31  ;;  %v330_v50 = vrot.slane %v1010_v26, %v910_v31  ;;  %v334_v51 = vrot.slane %v1014_v27, %v910_v31 }
  0xaf   :  { %v338_v52 = vrot.slane %v1018_v28, %v910_v31  ;;  %v342_v53 = vrot.slane %v1022_v32, %v910_v31  ;;  %v346_v54 = vrot.slane %v1026_v39, %v910_v31  ;;  %v350_v55 = vrot.slane %v1030_v40, %v910_v31 }
  0xb0   :  { %v351_v58 = vmul.f32 %v318_v30, %v313_v46  ;;  %v352_v59 = vmul.f32 %v322_v4, %v313_v46  ;;  %v353_v0 = vmul.f32 %v326_v5, %v313_v46  ;;  %v354_v6 = vmul.f32 %v330_v50, %v313_v46 }
  0xb1   :  { %v355_v29 = vmul.f32 %v334_v51, %v313_v46  ;;  %v356_v7 = vmul.f32 %v338_v52, %v313_v46  ;;  %v357_v8 = vmul.f32 %v342_v53, %v313_v46  ;;  %v358_v9 = vmul.f32 %v346_v54, %v313_v46 }
  0xb2   :  { %v359_v10 = vmul.f32 %v350_v55, %v313_v46  ;;  %v360_v11 = vadd.f32 %v351_v58, %v302_v38  ;;  %v361_v12 = vadd.f32 %v352_v59, %v303_v41  ;;  %v362_v13 = vadd.f32 %v353_v0, %v304_v42 }
  0xb3   :  { %v363_v14 = vadd.f32 %v354_v6, %v305_v43  ;;  %v364_v15 = vadd.f32 %v355_v29, %v306_v44  ;;  %v365_v16 = vadd.f32 %v356_v7, %v307_v45  ;;  %v366_v17 = vadd.f32 %v357_v8, %v308_v47 }
  0xb4   :  { %v367_v18 = vadd.f32 %v358_v9, %v309_v48  ;;  %v368_v19 = vadd.f32 %v359_v10, %v310_v49  ;;  %v376_v31 = vrot.slane %v998_v22, %v913_v33  ;;  %v380_v20 = vrot.slane %v1002_v23, %v913_v33  ;;  %v429_v10 = vpop.permute.xlu1 %428 }
  0xb5   :  { %v384_v30 = vrot.slane %v1006_v25, %v913_v33  ;;  %v388_v38 = vrot.slane %v1010_v26, %v913_v33  ;;  %v392_v41 = vrot.slane %v1014_v27, %v913_v33  ;;  %v396_v42 = vrot.slane %v1018_v28, %v913_v33 }
  0xb6   :  { %v400_v43 = vrot.slane %v1022_v32, %v913_v33  ;;  %v404_v44 = vrot.slane %v1026_v39, %v913_v33  ;;  %v408_v45 = vrot.slane %v1030_v40, %v913_v33  ;;  %v409_v46 = vmul.f32 %v376_v31, %v371_v21 }
  0xb7   :  { %v410_v47 = vmul.f32 %v380_v20, %v371_v21  ;;  %v411_v48 = vmul.f32 %v384_v30, %v371_v21  ;;  %v412_v49 = vmul.f32 %v388_v38, %v371_v21  ;;  %v413_v4 = vmul.f32 %v392_v41, %v371_v21 }
  0xb8   :  { %v414_v5 = vmul.f32 %v396_v42, %v371_v21  ;;  %v415_v50 = vmul.f32 %v400_v43, %v371_v21  ;;  %v416_v51 = vmul.f32 %v404_v44, %v371_v21  ;;  %v417_v52 = vmul.f32 %v408_v45, %v371_v21 }
  0xb9   :  { %v418_v53 = vadd.f32 %v409_v46, %v360_v11  ;;  %v419_v54 = vadd.f32 %v410_v47, %v361_v12  ;;  %v420_v55 = vadd.f32 %v411_v48, %v362_v13  ;;  %v421_v58 = vadd.f32 %v412_v49, %v363_v14  ;;  %v487_v47 = vpop.permute.xlu0 %486 }
  0xba   :  { %v422_v59 = vadd.f32 %v413_v4, %v364_v15  ;;  %v423_v0 = vadd.f32 %v414_v5, %v365_v16  ;;  %v424_v6 = vadd.f32 %v415_v50, %v366_v17  ;;  %v425_v29 = vadd.f32 %v416_v51, %v367_v18 }
  0xbb   :  { %v426_v7 = vadd.f32 %v417_v52, %v368_v19  ;;  %v434_v33 = vrot.slane %v998_v22, %v915_v34  ;;  %v438_v8 = vrot.slane %v1002_v23, %v915_v34  ;;  %v442_v9 = vrot.slane %v1006_v25, %v915_v34 }
  0xbc   :  { %v446_v11 = vrot.slane %v1010_v26, %v915_v34  ;;  %v450_v12 = vrot.slane %v1014_v27, %v915_v34  ;;  %v454_v13 = vrot.slane %v1018_v28, %v915_v34  ;;  %v458_v14 = vrot.slane %v1022_v32, %v915_v34 }
  0xbd   :  { %v462_v15 = vrot.slane %v1026_v39, %v915_v34  ;;  %v466_v16 = vrot.slane %v1030_v40, %v915_v34  ;;  %v467_v17 = vmul.f32 %v434_v33, %v429_v10  ;;  %v468_v18 = vmul.f32 %v438_v8, %v429_v10 }
  0xbe   :  { %v469_v19 = vmul.f32 %v442_v9, %v429_v10  ;;  %v470_v31 = vmul.f32 %v446_v11, %v429_v10  ;;  %v471_v20 = vmul.f32 %v450_v12, %v429_v10  ;;  %v472_v21 = vmul.f32 %v454_v13, %v429_v10 }
  0xbf   :  { %v473_v30 = vmul.f32 %v458_v14, %v429_v10  ;;  %v474_v38 = vmul.f32 %v462_v15, %v429_v10  ;;  %v475_v41 = vmul.f32 %v466_v16, %v429_v10  ;;  %v476_v42 = vadd.f32 %v467_v17, %v418_v53 }
  0xc0   :  { %v477_v43 = vadd.f32 %v468_v18, %v419_v54  ;;  %v478_v44 = vadd.f32 %v469_v19, %v420_v55  ;;  %v479_v45 = vadd.f32 %v470_v31, %v421_v58  ;;  %v480_v46 = vadd.f32 %v471_v20, %v422_v59  ;;  %v545_v18 = vpop.permute.xlu1 %544 }
  0xc1   :  { %v481_v48 = vadd.f32 %v472_v21, %v423_v0  ;;  %v482_v49 = vadd.f32 %v473_v30, %v424_v6  ;;  %v483_v4 = vadd.f32 %v474_v38, %v425_v29  ;;  %v484_v5 = vadd.f32 %v475_v41, %v426_v7 }
  0xc2   :  { %v492_v34 = vrot.slane %v998_v22, %v917_v35  ;;  %v496_v50 = vrot.slane %v1002_v23, %v917_v35  ;;  %v500_v51 = vrot.slane %v1006_v25, %v917_v35  ;;  %v504_v52 = vrot.slane %v1010_v26, %v917_v35 }
  0xc3   :  { %v508_v53 = vrot.slane %v1014_v27, %v917_v35  ;;  %v512_v54 = vrot.slane %v1018_v28, %v917_v35  ;;  %v516_v55 = vrot.slane %v1022_v32, %v917_v35  ;;  %v520_v58 = vrot.slane %v1026_v39, %v917_v35 }
  0xc4   :  { %v524_v59 = vrot.slane %v1030_v40, %v917_v35  ;;  %v525_v0 = vmul.f32 %v492_v34, %v487_v47  ;;  %v526_v6 = vmul.f32 %v496_v50, %v487_v47  ;;  %v527_v29 = vmul.f32 %v500_v51, %v487_v47 }
  0xc5   :  { %v528_v7 = vmul.f32 %v504_v52, %v487_v47  ;;  %v529_v33 = vmul.f32 %v508_v53, %v487_v47  ;;  %v530_v8 = vmul.f32 %v512_v54, %v487_v47  ;;  %v531_v9 = vmul.f32 %v516_v55, %v487_v47  ;;  %v603_v55 = vpop.permute.xlu1 %602 }
  0xc6   :  { %v532_v10 = vmul.f32 %v520_v58, %v487_v47  ;;  %v533_v11 = vmul.f32 %v524_v59, %v487_v47  ;;  %v534_v12 = vadd.f32 %v525_v0, %v476_v42  ;;  %v535_v13 = vadd.f32 %v526_v6, %v477_v43 }
  0xc7   :  { %v536_v14 = vadd.f32 %v527_v29, %v478_v44  ;;  %v537_v15 = vadd.f32 %v528_v7, %v479_v45  ;;  %v538_v16 = vadd.f32 %v529_v33, %v480_v46  ;;  %v539_v17 = vadd.f32 %v530_v8, %v481_v48 }
  0xc8   :  { %v540_v19 = vadd.f32 %v531_v9, %v482_v49  ;;  %v541_v31 = vadd.f32 %v532_v10, %v483_v4  ;;  %v542_v20 = vadd.f32 %v533_v11, %v484_v5  ;;  %v550_v35 = vrot.slane %v998_v22, %v919_v36 }
  0xc9   :  { %v554_v21 = vrot.slane %v1002_v23, %v919_v36  ;;  %v558_v30 = vrot.slane %v1006_v25, %v919_v36  ;;  %v562_v38 = vrot.slane %v1010_v26, %v919_v36  ;;  %v566_v41 = vrot.slane %v1014_v27, %v919_v36 }
  0xca   :  { %v570_v42 = vrot.slane %v1018_v28, %v919_v36  ;;  %v574_v43 = vrot.slane %v1022_v32, %v919_v36  ;;  %v578_v44 = vrot.slane %v1026_v39, %v919_v36  ;;  %v582_v45 = vrot.slane %v1030_v40, %v919_v36 }
  0xcb   :  { %v583_v46 = vmul.f32 %v550_v35, %v545_v18  ;;  %v584_v47 = vmul.f32 %v554_v21, %v545_v18  ;;  %v585_v48 = vmul.f32 %v558_v30, %v545_v18  ;;  %v586_v49 = vmul.f32 %v562_v38, %v545_v18 }
  0xcc   :  { %v587_v4 = vmul.f32 %v566_v41, %v545_v18  ;;  %v588_v5 = vmul.f32 %v570_v42, %v545_v18  ;;  %v589_v34 = vmul.f32 %v574_v43, %v545_v18  ;;  %v590_v50 = vmul.f32 %v578_v44, %v545_v18 }
  0xcd   :  { %v591_v51 = vmul.f32 %v582_v45, %v545_v18  ;;  %v592_v52 = vadd.f32 %v583_v46, %v534_v12  ;;  %v593_v53 = vadd.f32 %v584_v47, %v535_v13  ;;  %v594_v54 = vadd.f32 %v585_v48, %v536_v14 }
  0xce   :  { %v595_v58 = vadd.f32 %v586_v49, %v537_v15  ;;  %v596_v59 = vadd.f32 %v587_v4, %v538_v16  ;;  %v597_v0 = vadd.f32 %v588_v5, %v539_v17  ;;  %v598_v6 = vadd.f32 %v589_v34, %v540_v19  ;;  %v663_v16 = vpop.permute.xlu0 %662 }
  0xcf   :  { %v599_v29 = vadd.f32 %v590_v50, %v541_v31  ;;  %v600_v7 = vadd.f32 %v591_v51, %v542_v20  ;;  %v608_v36 = vrot.slane %v998_v22, %v921_v37  ;;  %v612_v33 = vrot.slane %v1002_v23, %v921_v37 }
  0xd0   :  { %v616_v8 = vrot.slane %v1006_v25, %v921_v37  ;;  %v620_v9 = vrot.slane %v1010_v26, %v921_v37  ;;  %v624_v10 = vrot.slane %v1014_v27, %v921_v37  ;;  %v628_v11 = vrot.slane %v1018_v28, %v921_v37 }
  0xd1   :  { %v632_v12 = vrot.slane %v1022_v32, %v921_v37  ;;  %v636_v22 = vrot.slane %v1026_v39, %v921_v37  ;;  %v640_v23 = vrot.slane %v1030_v40, %v921_v37  ;;  %v641_v13 = vmul.f32 %v608_v36, %v603_v55 }
  0xd2   :  { %v642_v25 = vmul.f32 %v612_v33, %v603_v55  ;;  %v643_v14 = vmul.f32 %v616_v8, %v603_v55  ;;  %v644_v15 = vmul.f32 %v620_v9, %v603_v55  ;;  %v645_v26 = vmul.f32 %v624_v10, %v603_v55 }
  0xd3   :  { %v646_v17 = vmul.f32 %v628_v11, %v603_v55  ;;  %v647_v27 = vmul.f32 %v632_v12, %v603_v55  ;;  %v648_v18 = vmul.f32 %v636_v22, %v603_v55  ;;  %v649_v19 = vmul.f32 %v640_v23, %v603_v55 }
  0xd4   :  { %v650_v28 = vadd.f32 %v641_v13, %v592_v52  ;;  %v651_v31 = vadd.f32 %v642_v25, %v593_v53  ;;  %v652_v20 = vadd.f32 %v643_v14, %v594_v54  ;;  %v653_v32 = vadd.f32 %v644_v15, %v595_v58 }
  0xd5   :  { %v654_v35 = vadd.f32 %v645_v26, %v596_v59  ;;  %v655_v21 = vadd.f32 %v646_v17, %v597_v0  ;;  %v656_v39 = vadd.f32 %v647_v27, %v598_v6  ;;  %v657_v30 = vadd.f32 %v648_v18, %v599_v29 }
  0xd6   :  { %v658_v38 = vadd.f32 %v649_v19, %v600_v7  ;;  %v665_v37 = vadd.f32 %v663_v16, %v650_v28  ;;  %v666_v40 = vadd.f32 %v663_v16, %v651_v31  ;;  %v667_v41 = vadd.f32 %v663_v16, %v652_v20  ;;  %v722_v28 = vld [vmem:[%s1250_s10] sm:$0xff] }
  0xd7   :  { %v668_v42 = vadd.f32 %v663_v16, %v653_v32  ;;  %v669_v43 = vadd.f32 %v663_v16, %v654_v35  ;;  %v670_v44 = vadd.f32 %v663_v16, %v655_v21  ;;  %v671_v45 = vadd.f32 %v663_v16, %v656_v39 }
  0xd8   :  { %v672_v46 = vadd.f32 %v663_v16, %v657_v30  ;;  %v673_v47 = vadd.f32 %v663_v16, %v658_v38  ;;  %v674_v48 = vmax.f32 %v665_v37, 0.0  ;;  %v675_v49 = vmax.f32 %v666_v40, 0.0 }
  0xd9   :  { %v676_v4 = vmax.f32 %v667_v41, 0.0  ;;  %v677_v5 = vmax.f32 %v668_v42, 0.0  ;;  %v678_v34 = vmax.f32 %v669_v43, 0.0  ;;  %v679_v50 = vmax.f32 %v670_v44, 0.0 }
  0xda   :  { %v680_v51 = vmax.f32 %v671_v45, 0.0  ;;  %v681_v52 = vmax.f32 %v672_v46, 0.0  ;;  %v682_v53 = vmax.f32 %v673_v47, 0.0  ;;  %684 = vst [vmem:[%s1249_s8 + $0x8] sm:$0xff] %v675_v49  ;;  %v692_v54 = vsel %vm954_vm3, %v674_v48, 0.0  ;;  %683 = vst [vmem:[%s1249_s8] sm:$0xff] %v674_v48 }
  0xdb   :  { %685 = vst [vmem:[%s1249_s8 + $0x10] sm:$0xff] %v676_v4  ;;  %686 = vst [vmem:[%s1249_s8 + $0x18] sm:$0xff] %v677_v5  ;;  %v693_v56 = vsel %vm958_vm4, %v675_v49, 0.0  ;;  %v694_v55 = vsel %vm968_vm5, %v676_v4, 0.0  ;;  %v723_v59 = vmul.f32 %v692_v54, %v692_v54  ;;  %v695_v57 = vsel %vm972_vm6, %v677_v5, 0.0 }
  0xdc   :  { %687 = vst [vmem:[%s1249_s8 + $0x20] sm:$0xff] %v678_v34  ;;  %688 = vst [vmem:[%s1249_s8 + $0x28] sm:$0xff] %v679_v50  ;;  %v709_v58 = vadd.f32 %v693_v56, %v692_v54  ;;  %v724_v0 = vmul.f32 %v693_v56, %v693_v56  ;;  %v725_v29 = vmul.f32 %v694_v55, %v694_v55  ;;  %v696_v36 = vsel %vm976_vm7, %v678_v34, 0.0 }
  0xdd   :  { %689 = vst [vmem:[%s1249_s8 + $0x30] sm:$0xff] %v680_v51  ;;  %690 = vst [vmem:[%s1249_s8 + $0x38] sm:$0xff] %v681_v52  ;;  %v726_v8 = vmul.f32 %v695_v57, %v695_v57  ;;  %v697_v10 = vsel %vm980_vm8, %v679_v50, 0.0  ;;  %v727_v11 = vmul.f32 %v696_v36, %v696_v36  ;;  %v698_v22 = vsel %vm984_vm9, %v680_v51, 0.0 }
  0xde   :  { %691 = vst [vmem:[%s1249_s8 + $0x40] sm:$0xff] %v682_v53  ;;  %v710_v6 = vadd.f32 %v709_v58, %v694_v55  ;;  %v732_v7 = vadd.f32 %v724_v0, %v723_v59  ;;  %v728_v23 = vmul.f32 %v697_v10, %v697_v10  ;;  %v699_v25 = vsel %vm988_vm10, %v681_v52, 0.0 }
  0xdf   :  { %v729_v14 = vmul.f32 %v698_v22, %v698_v22  ;;  %v700_v26 = vsel %vm992_vm11, %v682_v53, 0.0  ;;  %v730_v16 = vmul.f32 %v699_v25, %v699_v25 }
  0xe0   :  { %v711_v33 = vadd.f32 %v710_v6, %v695_v57  ;;  %v733_v9 = vadd.f32 %v732_v7, %v725_v29  ;;  %v731_v18 = vmul.f32 %v700_v26, %v700_v26 }
  0xe2   :  { %v712_v60 = vadd.f32 %v711_v33, %v696_v36  ;;  %v734_v12 = vadd.f32 %v733_v9, %v726_v8 }
  0xe4   :  { %v713_v61 = vadd.f32 %v712_v60, %v697_v10  ;;  %v735_v13 = vadd.f32 %v734_v12, %v727_v11 }
  0xe6   :  { %v714_v62 = vadd.f32 %v713_v61, %v698_v22  ;;  %v736_v15 = vadd.f32 %v735_v13, %v728_v23 }
  0xe8   :  { %v715_v63 = vadd.f32 %v714_v62, %v699_v25  ;;  %v737_v17 = vadd.f32 %v736_v15, %v729_v14 }
  0xea   :  { %v716_v27 = vadd.f32 %v715_v63, %v700_v26  ;;  %v738_v19 = vadd.f32 %v737_v17, %v730_v16 }
  0xec   :  { %717 = vadd.xlane.f32.xlu1 %v716_v27  ;;  %v739_v1 = vadd.f32 %v738_v19, %v731_v18 }
  0xee   :  { %740 = vadd.xlane.f32.xlu0 %v739_v1 }
 0x179   :  { %v718_v3 = vpop.xlane.xlu1 %717 }
 0x17a   :  { %v719_v31 = vadd.f32 %v718_v3, %v708_v2 }
 0x17b   :  { %v741_v20 = vpop.xlane.xlu0 %740 }
 0x17c   :  { %721 = vst.msk [vmem:[%s1246_s9] sm:$0xff] %vm705_vm0, %v719_v31  ;;  %v742_v32 = vadd.f32 %v741_v20, %v722_v28 }
 0x17e   :  { %743 = vst.msk [vmem:[%s1250_s10] sm:$0xff] %vm705_vm0, %v742_v32 }

</bundles_post_ra>
